<compile_context>
chip_gen: v5e
topology: v5e:2x2
jax: 0.10.0
libtpu: 0.0.40
codegen_flags: <defaults>
</compile_context>

<pallas_src>
import functools
import math

import jax
import jax.numpy as jnp
from jax import lax
from jax.experimental import pallas as pl
from jax.experimental.pallas import tpu as pltpu


def _loop(lo, hi, body, carry, unroll_threshold=16):
    """fori_loop wrapper: bounds live ranges (unlike a Python for); unrolls short loops."""
    n = hi - lo
    if n <= 0:
        return carry
    if n == 1:
        return body(lo, carry)
    unroll = True if n <= unroll_threshold else None
    return lax.fori_loop(lo, hi, body, carry, unroll=unroll)


def _autoencoder_kernel(len_ref, xemb_ref, init_ref, emb_ref,
                        enc_wih_ref, enc_whh_ref, enc_b_ref,
                        dec_wih_ref, dec_whh_ref, dec_b_ref,
                        lin_w_ref, lin_b_ref,
                        out_ref,
                        *, hidden_size, emb_dim, voc_size, voc_pad,
                        batch_tile, seq_len, t_out, n_teacher, training):
    H, E, V, Vp, Bt = hidden_size, emb_dim, voc_size, voc_pad, batch_tile
    cdt = emb_ref.dtype                      # MXU operand dtype (bf16 or f32)

    enc_wih = enc_wih_ref[...]               # [E, 4H]
    enc_whh = enc_whh_ref[...]               # [H, 4H]
    enc_b = enc_b_ref[...]                   # [1, 4H]  (b_ih + b_hh, f32)
    dec_wih = dec_wih_ref[...]
    dec_whh = dec_whh_ref[...]
    dec_b = dec_b_ref[...]
    lin_w = lin_w_ref[...]                   # [H, Vp]  (cols >= V are zero)
    lin_b = lin_b_ref[...]                   # [1, Vp]  f32
    emb_tab = emb_ref[...]                   # [Vp, E]  (rows >= V are zero)
    lengths = len_ref[...]                   # [Bt, 1]  int32

    # hoisted constants (iota / broadcast are not CSE'd by JAX)
    lane_v = lax.broadcasted_iota(jnp.int32, (Bt, Vp), 1)
    valid_lane = lane_v < V

    # NOTE: with H not a multiple of 128 (demo H=32) each gate slice below is a
    # lane-masked sub-vreg slice; keep H a multiple of 128 for non-demo configs.
    # With large batch tiles the single EUP slot (3 sigmoid + 2 tanh / step) is
    # the expected binding unit, not the MXU.
    def lstm_step(x, h, c, wih, whh, b):
        # Two MXU pushes accumulating into one f32 result; no VMEM round trip
        # on the serial chain (previously: concat [x,h] through a scratch).
        gates = (jnp.dot(x, wih, preferred_element_type=jnp.float32)
                 + jnp.dot(h.astype(cdt), whh, preferred_element_type=jnp.float32)
                 + b)
        i = jax.nn.sigmoid(gates[:, 0 * H:1 * H])
        f = jax.nn.sigmoid(gates[:, 1 * H:2 * H])
        g = jnp.tanh(gates[:, 2 * H:3 * H])
        o = jax.nn.sigmoid(gates[:, 3 * H:4 * H])
        c_new = f * c + i * g
        h_new = o * jnp.tanh(c_new)
        return h_new, c_new

    # ---------- encoder (pack_padded_sequence equivalent via length masking) ----------
    def enc_body(t, carry):
        h, c = carry
        h_new, c_new = lstm_step(xemb_ref[t], h, c, enc_wih, enc_whh, enc_b)
        mask = t < lengths                                  # [Bt, 1]
        return jnp.where(mask, h_new, h), jnp.where(mask, c_new, c)

    h0 = jnp.zeros((Bt, H), jnp.float32)
    c0 = jnp.zeros((Bt, H), jnp.float32)
    h_enc, _ = _loop(0, seq_len, enc_body, (h0, c0))

    # ------------------------------- decoder -----------------------------------------
    def dec_out(x, h, c):
        h, c = lstm_step(x, h, c, dec_wih, dec_whh, dec_b)
        logits = jnp.dot(h.astype(cdt), lin_w,
                         preferred_element_type=jnp.float32) + lin_b
        return h, c, logits

    def greedy_embed(logits):
        # argmax(softmax(logits)) == argmax(logits); padded lanes masked out;
        # first occurrence on ties (matches torch.max).
        lm = jnp.where(valid_lane, logits, -1e30)
        max_val = jnp.max(lm, axis=-1, keepdims=True)
        idx = jnp.where(lm == max_val, lane_v, Vp)
        step = jnp.min(idx, axis=-1, keepdims=True)          # [Bt, 1]
        onehot = (step == lane_v).astype(cdt)
        # TODO(synk): for realistic V replace this one-hot matmul with
        # argmax indices in SMEM + per-row DMA gather of embedding rows from HBM.
        x = jnp.dot(onehot, emb_tab, preferred_element_type=jnp.float32)
        return x.astype(cdt)

    x0 = jnp.broadcast_to(init_ref[...], (Bt, E))            # <sos> embedding (cdt)
    dec_h, dec_c = h_enc, jnp.zeros((Bt, H), jnp.float32)

    if training and n_teacher > 0:
        # teacher-forced steps: next input is the pre-embedded target token i
        # (reproduces the module's `i < len(targets)` quirk; len == batch size).
        def tf_body(i, carry):
            h, c, x = carry
            h, c, logits = dec_out(x, h, c)
            out_ref[i] = logits
            return h, c, xemb_ref[i]

        dec_h, dec_c, x = _loop(0, n_teacher, tf_body, (dec_h, dec_c, x0))
        start = n_teacher
    else:
        x = x0
        start = 0

    def greedy_body(i, carry):
        h, c, x = carry
        h, c, logits = dec_out(x, h, c)
        out_ref[i] = logits
        return h, c, greedy_embed(logits)

    _loop(start, t_out, greedy_body, (dec_h, dec_c, x))


def autoencoder_forward(tokens, params, *, hidden_size, voc_size, padding_idx,
                        init_idx, max_len, training=True, batch_tile=None,
                        weight_dtype=jnp.bfloat16):
    B, S = tokens.shape
    H, V = hidden_size, voc_size
    E = params["emb"].shape[1]
    T = max_len + 1
    n_teacher = min(B, T) if training else 0
    if training:
        assert n_teacher <= S, (
            "teacher forcing indexes targets[:, i] for i < batch size; "
            "needs min(B, max_len+1) <= S (same requirement as the PyTorch module)")

    # ---- batch tiling: fat tiles to fill MXU rows; >=2 tiles when the batch
    # allows so v7x's two TensorCores both get work on the "parallel" axis. ----
    b_pad8 = -(-B // 8) * 8
    if batch_tile is None:
        batch_tile = min(256, b_pad8)
        if b_pad8 > 8 and b_pad8 // batch_tile < 2:
            batch_tile = max(8, (-(-(b_pad8 // 2) // 8)) * 8)
    Bp = -(-B // batch_tile) * batch_tile
    Vp = -(-V // 128) * 128          # lane-dense output head
    n_btiles = Bp // batch_tile
    cdt = weight_dtype

    tokens_p = jnp.pad(tokens.astype(jnp.int32), ((0, Bp - B), (0, 0)),
                       constant_values=padding_idx)

    emb = params["emb"].astype(jnp.float32)                          # [V, E]
    # Encoder / teacher-forcing embeddings gathered once in XLA; the greedy
    # decoder keeps the (small-V) one-hot gather inside the kernel.
    x_emb_seq = jnp.transpose(jnp.take(emb, tokens_p, axis=0),
                              (1, 0, 2)).astype(cdt)                 # [S, Bp, E]
    init_x = emb[init_idx][None, :].astype(cdt)                      # [1, E]
    emb_pad = jnp.pad(emb, ((0, Vp - V), (0, 0))).astype(cdt)        # [Vp, E]

    lengths = jnp.sum((tokens_p != padding_idx).astype(jnp.int32),
                      axis=1, keepdims=True)                         # [Bp, 1]

    # MXU operands in weight_dtype (bf16 halves VMEM/HBM traffic; f32 acc);
    # biases stay f32 and are added after the matmuls.
    enc_wih = params["enc_wih"].astype(cdt)                          # [E, 4H]
    enc_whh = params["enc_whh"].astype(cdt)                          # [H, 4H]
    enc_b = params["enc_b"].astype(jnp.float32)                      # [1, 4H]
    dec_wih = params["dec_wih"].astype(cdt)
    dec_whh = params["dec_whh"].astype(cdt)
    dec_b = params["dec_b"].astype(jnp.float32)
    lin_w = jnp.pad(params["lin_w"], ((0, 0), (0, Vp - V))).astype(cdt)       # [H, Vp]
    lin_b = jnp.pad(params["lin_b"], ((0, 0), (0, Vp - V))).astype(jnp.float32)

    kernel = functools.partial(
        _autoencoder_kernel,
        hidden_size=H, emb_dim=E, voc_size=V, voc_pad=Vp,
        batch_tile=batch_tile, seq_len=S, t_out=T,
        n_teacher=n_teacher, training=training)

    # ---- VMEM budget: per-tile blocks double-buffered, invariants counted once ----
    def _pad_bytes(shape, dtype):
        item = jnp.dtype(dtype).itemsize
        s = list(shape) if len(shape) >= 2 else [1] + list(shape)
        sub = 8 * max(1, 4 // item)                 # sublane packing for narrow dtypes
        s[-1] = -(-s[-1] // 128) * 128
        s[-2] = -(-s[-2] // sub) * sub
        return math.prod(s) * item

    per_tile_blocks = [((batch_tile, 1), jnp.int32),
                       ((S, batch_tile, E), cdt),
                       ((T, batch_tile, Vp), jnp.float32)]
    invariant_blocks = [((1, E), cdt), ((Vp, E), cdt),
                        ((E, 4 * H), cdt), ((H, 4 * H), cdt), ((1, 4 * H), jnp.float32),
                        ((E, 4 * H), cdt), ((H, 4 * H), cdt), ((1, 4 * H), jnp.float32),
                        ((H, Vp), cdt), ((1, Vp), jnp.float32)]

    try:
        phys_vmem = pltpu.get_tpu_info().vmem_capacity_bytes
    except Exception:
        phys_vmem = 64 << 20                       # conservative (v7x-sized) fallback
    vmem_cap = (phys_vmem * 3) // 4                # headroom for Mosaic internal scratch

    def _vmem_bytes(single_buffer):
        total = 2 * sum(_pad_bytes(s, d) for s, d in per_tile_blocks)
        total += (1 if single_buffer else 2) * sum(
            _pad_bytes(s, d) for s, d in invariant_blocks)
        return int(min(max(total + (2 << 20), 8 << 20), vmem_cap))

    def _specs(single_buffer):
        def inv(shape):
            # grid-invariant operand: constant index_map, never re-fetched ->
            # one buffer is enough (saves VMEM for the big weight blocks).
            if single_buffer:
                return pl.BlockSpec(shape, lambda b: (0,) * len(shape),
                                    pipeline_mode=pl.Buffered(1))
            return pl.BlockSpec(shape, lambda b: (0,) * len(shape))

        in_specs = [
            pl.BlockSpec((batch_tile, 1), lambda b: (b, 0)),          # lengths
            pl.BlockSpec((S, batch_tile, E), lambda b: (0, b, 0)),    # embedded inputs
            inv((1, E)),                                              # <sos> embedding
            inv((Vp, E)),                                             # embedding table
            inv((E, 4 * H)), inv((H, 4 * H)), inv((1, 4 * H)),        # encoder LSTM
            inv((E, 4 * H)), inv((H, 4 * H)), inv((1, 4 * H)),        # decoder LSTMCell
            inv((H, Vp)), inv((1, Vp)),                               # output head
        ]
        out_spec = pl.BlockSpec((T, batch_tile, Vp), lambda b: (0, b, 0))
        return in_specs, out_spec

    def _run(single_buffer):
        in_specs, out_spec = _specs(single_buffer)
        return pl.pallas_call(
            kernel,
            out_shape=jax.ShapeDtypeStruct((T, Bp, Vp), jnp.float32),
            grid_spec=pltpu.PrefetchScalarGridSpec(
                num_scalar_prefetch=0,
                grid=(n_btiles,),
                in_specs=in_specs,
                out_specs=out_spec),
            compiler_params=pltpu.CompilerParams(
                dimension_semantics=("parallel",),
                vmem_limit_bytes=_vmem_bytes(single_buffer)),
        )(lengths, x_emb_seq, init_x, emb_pad,
          enc_wih, enc_whh, enc_b, dec_wih, dec_whh, dec_b, lin_w, lin_b)

    try:
        out = _run(single_buffer=True)
    except Exception:
        # jax versions without BlockSpec(pipeline_mode=pl.Buffered(1)) support:
        # fall back to default (double) buffering of the invariant operands.
        out = _run(single_buffer=False)

    # Slice padding away BEFORE the transpose so the layout change only touches
    # the [B, T, V] data actually returned (PyTorch layout: [B, max_len+1, V]).
    return jnp.transpose(out[:, :B, :V], (1, 0, 2))


def init_params(key, *, hidden_size, voc_size, embedding_dim):
    H, V, E = hidden_size, voc_size, embedding_dim
    ks = jax.random.split(key, 11)
    s = 1.0 / jnp.sqrt(H)

    def u(k, shape):
        return jax.random.uniform(k, shape, jnp.float32, -s, s)

    return {
        # nn.Embedding default init ~ N(0, 1)  (the module passes no padding_idx
        # to nn.Embedding, so no row is zeroed)
        "emb": jax.random.normal(ks[0], (V, E), jnp.float32),
        # nn.LSTM (encoder): weights stored transposed [in, 4H]; b = b_ih + b_hh
        "enc_wih": u(ks[1], (E, 4 * H)),
        "enc_whh": u(ks[2], (H, 4 * H)),
        "enc_b": u(ks[3], (1, 4 * H)) + u(ks[4], (1, 4 * H)),
        # nn.LSTMCell (decoder)
        "dec_wih": u(ks[5], (E, 4 * H)),
        "dec_whh": u(ks[6], (H, 4 * H)),
        "dec_b": u(ks[7], (1, 4 * H)) + u(ks[8], (1, 4 * H)),
        # nn.Linear(H, V): stored transposed [H, V]
        "lin_w": u(ks[9], (H, V)),
        "lin_b": u(ks[10], (1, V)),
    }


if __name__ == "__main__":
    B, S = 2, 8
    hidden_size = 32
    embedding_dim = 32
    voc_size = 32
    padding_idx = 0
    init_idx = 1
    max_len = 6

    key = jax.random.PRNGKey(0)
    k_tok, k_par = jax.random.split(key)

    params = init_params(k_par, hidden_size=hidden_size, voc_size=voc_size,
                         embedding_dim=embedding_dim)

    # token ids in [2, V); pad the tails with padding_idx
    tokens = jax.random.randint(k_tok, (B, S), 2, voc_size).astype(jnp.int32)
    lengths = jnp.array([S, 5], dtype=jnp.int32)
    pos = jnp.arange(S, dtype=jnp.int32)[None, :]
    tokens = jnp.where(pos < lengths[:, None], tokens, padding_idx)

    # nn.Module defaults to training=True -> targets = inputs (teacher forcing)
    out = autoencoder_forward(
        tokens, params, hidden_size=hidden_size, voc_size=voc_size,
        padding_idx=padding_idx, init_idx=init_idx, max_len=max_len,
        training=True)
    out = jax.block_until_ready(out)

    assert out.shape == (B, max_len + 1, voc_size), out.shape
    assert out.dtype == jnp.float32
    assert bool(jnp.all(jnp.isfinite(out)))
    print("KERNEL_OK")
</pallas_src>

<mosaic_0001>
module attributes {stable_mosaic.version = 11 : i64} {
  func.func @_autoencoder_kernel(%arg0: i32, %arg1: memref<8x1xi32, #tpu.memory_space<vmem>>, %arg2: memref<8x8x32xbf16, #tpu.memory_space<vmem>>, %arg3: memref<1x32xbf16, #tpu.memory_space<vmem>>, %arg4: memref<128x32xbf16, #tpu.memory_space<vmem>>, %arg5: memref<32x128xbf16, #tpu.memory_space<vmem>>, %arg6: memref<32x128xbf16, #tpu.memory_space<vmem>>, %arg7: memref<1x128xf32, #tpu.memory_space<vmem>>, %arg8: memref<32x128xbf16, #tpu.memory_space<vmem>>, %arg9: memref<32x128xbf16, #tpu.memory_space<vmem>>, %arg10: memref<1x128xf32, #tpu.memory_space<vmem>>, %arg11: memref<32x128xbf16, #tpu.memory_space<vmem>>, %arg12: memref<1x128xf32, #tpu.memory_space<vmem>>, %arg13: memref<7x8x128xf32, #tpu.memory_space<vmem>>) attributes {dimension_semantics = [#tpu.dimension_semantics<parallel>], iteration_bounds = array<i64: 1>, scalar_prefetch = 0 : i64, scratch_operands = 0 : i64, tpu.core_type = #tpu.core_type<tc>, window_params = [{transform_indices = @transform_0, window_bounds = array<i64: 8, 1>}, {transform_indices = @transform_1, window_bounds = array<i64: 8, 8, 32>}, {pipeline_mode = #tpu.pipeline_mode<synchronous>, transform_indices = @transform_2, window_bounds = array<i64: 1, 32>}, {pipeline_mode = #tpu.pipeline_mode<synchronous>, transform_indices = @transform_3, window_bounds = array<i64: 128, 32>}, {pipeline_mode = #tpu.pipeline_mode<synchronous>, transform_indices = @transform_4, window_bounds = array<i64: 32, 128>}, {pipeline_mode = #tpu.pipeline_mode<synchronous>, transform_indices = @transform_5, window_bounds = array<i64: 32, 128>}, {pipeline_mode = #tpu.pipeline_mode<synchronous>, transform_indices = @transform_6, window_bounds = array<i64: 1, 128>}, {pipeline_mode = #tpu.pipeline_mode<synchronous>, transform_indices = @transform_7, window_bounds = array<i64: 32, 128>}, {pipeline_mode = #tpu.pipeline_mode<synchronous>, transform_indices = @transform_8, window_bounds = array<i64: 32, 128>}, {pipeline_mode = #tpu.pipeline_mode<synchronous>, transform_indices = @transform_9, window_bounds = array<i64: 1, 128>}, {pipeline_mode = #tpu.pipeline_mode<synchronous>, transform_indices = @transform_10, window_bounds = array<i64: 32, 128>}, {pipeline_mode = #tpu.pipeline_mode<synchronous>, transform_indices = @transform_11, window_bounds = array<i64: 1, 128>}, {transform_indices = @transform_12, window_bounds = array<i64: 7, 8, 128>}]} {
    %c0 = arith.constant 0 : index
    %c0_0 = arith.constant 0 : index
    %0 = vector.load %arg5[%c0, %c0_0] : memref<32x128xbf16, #tpu.memory_space<vmem>>, vector<32x128xbf16>
    %c0_1 = arith.constant 0 : index
    %c0_2 = arith.constant 0 : index
    %1 = vector.load %arg6[%c0_1, %c0_2] : memref<32x128xbf16, #tpu.memory_space<vmem>>, vector<32x128xbf16>
    %c0_3 = arith.constant 0 : index
    %c0_4 = arith.constant 0 : index
    %2 = vector.load %arg7[%c0_3, %c0_4] : memref<1x128xf32, #tpu.memory_space<vmem>>, vector<1x128xf32>
    %c0_5 = arith.constant 0 : index
    %c0_6 = arith.constant 0 : index
    %3 = vector.load %arg8[%c0_5, %c0_6] : memref<32x128xbf16, #tpu.memory_space<vmem>>, vector<32x128xbf16>
    %c0_7 = arith.constant 0 : index
    %c0_8 = arith.constant 0 : index
    %4 = vector.load %arg9[%c0_7, %c0_8] : memref<32x128xbf16, #tpu.memory_space<vmem>>, vector<32x128xbf16>
    %c0_9 = arith.constant 0 : index
    %c0_10 = arith.constant 0 : index
    %5 = vector.load %arg10[%c0_9, %c0_10] : memref<1x128xf32, #tpu.memory_space<vmem>>, vector<1x128xf32>
    %c0_11 = arith.constant 0 : index
    %c0_12 = arith.constant 0 : index
    %6 = vector.load %arg11[%c0_11, %c0_12] : memref<32x128xbf16, #tpu.memory_space<vmem>>, vector<32x128xbf16>
    %c0_13 = arith.constant 0 : index
    %c0_14 = arith.constant 0 : index
    %7 = vector.load %arg12[%c0_13, %c0_14] : memref<1x128xf32, #tpu.memory_space<vmem>>, vector<1x128xf32>
    %c0_15 = arith.constant 0 : index
    %c0_16 = arith.constant 0 : index
    %8 = vector.load %arg4[%c0_15, %c0_16] : memref<128x32xbf16, #tpu.memory_space<vmem>>, vector<128x32xbf16>
    %c0_17 = arith.constant 0 : index
    %c0_18 = arith.constant 0 : index
    %9 = vector.load %arg1[%c0_17, %c0_18] : memref<8x1xi32, #tpu.memory_space<vmem>>, vector<8x1xi32>
    %10 = tpu.iota {dimensions = array<i32: 1>} : vector<8x128xi32>
    %c32_i32 = arith.constant 32 : i32
    %11 = vector.broadcast %c32_i32 : i32 to vector<8x128xi32>
    %12 = arith.cmpi slt, %10, %11 : vector<8x128xi32>
    %cst = arith.constant 0.000000e+00 : f32
    %13 = vector.broadcast %cst : f32 to vector<8x32xf32>
    %cst_19 = arith.constant 0.000000e+00 : f32
    %14 = vector.broadcast %cst_19 : f32 to vector<8x32xf32>
    %c0_i32 = arith.constant 0 : i32
    %15 = arith.index_cast %c0_i32 : i32 to index
    %c0_20 = arith.constant 0 : index
    %c0_21 = arith.constant 0 : index
    %16 = vector.load %arg2[%15, %c0_20, %c0_21] : memref<8x8x32xbf16, #tpu.memory_space<vmem>>, vector<1x8x32xbf16>
    %17 = vector.shape_cast %16 : vector<1x8x32xbf16> to vector<8x32xbf16>
    %cst_22 = arith.constant dense<0.000000e+00> : vector<8x128xf32>
    %18 = tpu.matmul %17, %0, %cst_22 {dimension_numbers = #tpu.dot_dimension_numbers<[1], [0], [0], [1], [0, 0, 1, 1], [], []>} : vector<8x32xbf16>, vector<32x128xbf16>, vector<8x128xf32> -> vector<8x128xf32>
    %19 = arith.truncf %13 : vector<8x32xf32> to vector<8x32xbf16>
    %cst_23 = arith.constant dense<0.000000e+00> : vector<8x128xf32>
    %20 = tpu.matmul %19, %1, %cst_23 {dimension_numbers = #tpu.dot_dimension_numbers<[1], [0], [0], [1], [0, 0, 1, 1], [], []>} : vector<8x32xbf16>, vector<32x128xbf16>, vector<8x128xf32> -> vector<8x128xf32>
    %21 = arith.addf %18, %20 : vector<8x128xf32>
    %22 = vector.broadcast %2 : vector<1x128xf32> to vector<8x128xf32>
    %23 = arith.addf %21, %22 : vector<8x128xf32>
    %24 = vector.extract_strided_slice %23 {offsets = [0, 0], sizes = [8, 32], strides = [1, 1]} : vector<8x128xf32> to vector<8x32xf32>
    %25 = arith.negf %24 : vector<8x32xf32>
    %26 = math.exp %25 : vector<8x32xf32>
    %cst_24 = arith.constant 1.000000e+00 : f32
    %27 = vector.broadcast %cst_24 : f32 to vector<8x32xf32>
    %28 = arith.addf %27, %26 : vector<8x32xf32>
    %29 = arith.divf %27, %28 : vector<8x32xf32>
    %30 = vector.extract_strided_slice %23 {offsets = [0, 32], sizes = [8, 32], strides = [1, 1]} : vector<8x128xf32> to vector<8x32xf32>
    %31 = arith.negf %30 : vector<8x32xf32>
    %32 = math.exp %31 : vector<8x32xf32>
    %cst_25 = arith.constant 1.000000e+00 : f32
    %33 = vector.broadcast %cst_25 : f32 to vector<8x32xf32>
    %34 = arith.addf %33, %32 : vector<8x32xf32>
    %35 = arith.divf %33, %34 : vector<8x32xf32>
    %36 = vector.extract_strided_slice %23 {offsets = [0, 64], sizes = [8, 32], strides = [1, 1]} : vector<8x128xf32> to vector<8x32xf32>
    %37 = math.tanh %36 : vector<8x32xf32>
    %38 = vector.extract_strided_slice %23 {offsets = [0, 96], sizes = [8, 32], strides = [1, 1]} : vector<8x128xf32> to vector<8x32xf32>
    %39 = arith.negf %38 : vector<8x32xf32>
    %40 = math.exp %39 : vector<8x32xf32>
    %cst_26 = arith.constant 1.000000e+00 : f32
    %41 = vector.broadcast %cst_26 : f32 to vector<8x32xf32>
    %42 = arith.addf %41, %40 : vector<8x32xf32>
    %43 = arith.divf %41, %42 : vector<8x32xf32>
    %44 = arith.mulf %35, %14 : vector<8x32xf32>
    %45 = arith.mulf %29, %37 : vector<8x32xf32>
    %46 = arith.addf %44, %45 : vector<8x32xf32>
    %47 = math.tanh %46 : vector<8x32xf32>
    %48 = arith.mulf %43, %47 : vector<8x32xf32>
    %49 = vector.broadcast %c0_i32 : i32 to vector<8x1xi32>
    %50 = arith.cmpi slt, %49, %9 : vector<8x1xi32>
    %51 = vector.shape_cast %50 : vector<8x1xi1> to vector<8x1xi1>
    %52 = vector.broadcast %51 : vector<8x1xi1> to vector<8x32xi1>
    %53 = arith.select %52, %48, %13 : vector<8x32xi1>, vector<8x32xf32>
    %54 = vector.shape_cast %50 : vector<8x1xi1> to vector<8x1xi1>
    %55 = vector.broadcast %54 : vector<8x1xi1> to vector<8x32xi1>
    %56 = arith.select %55, %46, %14 : vector<8x32xi1>, vector<8x32xf32>
    %c1_i32 = arith.constant 1 : i32
    %57 = arith.index_cast %c1_i32 : i32 to index
    %c0_27 = arith.constant 0 : index
    %c0_28 = arith.constant 0 : index
    %58 = vector.load %arg2[%57, %c0_27, %c0_28] : memref<8x8x32xbf16, #tpu.memory_space<vmem>>, vector<1x8x32xbf16>
    %59 = vector.shape_cast %58 : vector<1x8x32xbf16> to vector<8x32xbf16>
    %cst_29 = arith.constant dense<0.000000e+00> : vector<8x128xf32>
    %60 = tpu.matmul %59, %0, %cst_29 {dimension_numbers = #tpu.dot_dimension_numbers<[1], [0], [0], [1], [0, 0, 1, 1], [], []>} : vector<8x32xbf16>, vector<32x128xbf16>, vector<8x128xf32> -> vector<8x128xf32>
    %61 = arith.truncf %53 : vector<8x32xf32> to vector<8x32xbf16>
    %cst_30 = arith.constant dense<0.000000e+00> : vector<8x128xf32>
    %62 = tpu.matmul %61, %1, %cst_30 {dimension_numbers = #tpu.dot_dimension_numbers<[1], [0], [0], [1], [0, 0, 1, 1], [], []>} : vector<8x32xbf16>, vector<32x128xbf16>, vector<8x128xf32> -> vector<8x128xf32>
    %63 = arith.addf %60, %62 : vector<8x128xf32>
    %64 = vector.broadcast %2 : vector<1x128xf32> to vector<8x128xf32>
    %65 = arith.addf %63, %64 : vector<8x128xf32>
    %66 = vector.extract_strided_slice %65 {offsets = [0, 0], sizes = [8, 32], strides = [1, 1]} : vector<8x128xf32> to vector<8x32xf32>
    %67 = arith.negf %66 : vector<8x32xf32>
    %68 = math.exp %67 : vector<8x32xf32>
    %cst_31 = arith.constant 1.000000e+00 : f32
    %69 = vector.broadcast %cst_31 : f32 to vector<8x32xf32>
    %70 = arith.addf %69, %68 : vector<8x32xf32>
    %71 = arith.divf %69, %70 : vector<8x32xf32>
    %72 = vector.extract_strided_slice %65 {offsets = [0, 32], sizes = [8, 32], strides = [1, 1]} : vector<8x128xf32> to vector<8x32xf32>
    %73 = arith.negf %72 : vector<8x32xf32>
    %74 = math.exp %73 : vector<8x32xf32>
    %cst_32 = arith.constant 1.000000e+00 : f32
    %75 = vector.broadcast %cst_32 : f32 to vector<8x32xf32>
    %76 = arith.addf %75, %74 : vector<8x32xf32>
    %77 = arith.divf %75, %76 : vector<8x32xf32>
    %78 = vector.extract_strided_slice %65 {offsets = [0, 64], sizes = [8, 32], strides = [1, 1]} : vector<8x128xf32> to vector<8x32xf32>
    %79 = math.tanh %78 : vector<8x32xf32>
    %80 = vector.extract_strided_slice %65 {offsets = [0, 96], sizes = [8, 32], strides = [1, 1]} : vector<8x128xf32> to vector<8x32xf32>
    %81 = arith.negf %80 : vector<8x32xf32>
    %82 = math.exp %81 : vector<8x32xf32>
    %cst_33 = arith.constant 1.000000e+00 : f32
    %83 = vector.broadcast %cst_33 : f32 to vector<8x32xf32>
    %84 = arith.addf %83, %82 : vector<8x32xf32>
    %85 = arith.divf %83, %84 : vector<8x32xf32>
    %86 = arith.mulf %77, %56 : vector<8x32xf32>
    %87 = arith.mulf %71, %79 : vector<8x32xf32>
    %88 = arith.addf %86, %87 : vector<8x32xf32>
    %89 = math.tanh %88 : vector<8x32xf32>
    %90 = arith.mulf %85, %89 : vector<8x32xf32>
    %91 = vector.broadcast %c1_i32 : i32 to vector<8x1xi32>
    %92 = arith.cmpi slt, %91, %9 : vector<8x1xi32>
    %93 = vector.shape_cast %92 : vector<8x1xi1> to vector<8x1xi1>
    %94 = vector.broadcast %93 : vector<8x1xi1> to vector<8x32xi1>
    %95 = arith.select %94, %90, %53 : vector<8x32xi1>, vector<8x32xf32>
    %96 = vector.shape_cast %92 : vector<8x1xi1> to vector<8x1xi1>
    %97 = vector.broadcast %96 : vector<8x1xi1> to vector<8x32xi1>
    %98 = arith.select %97, %88, %56 : vector<8x32xi1>, vector<8x32xf32>
    %c2_i32 = arith.constant 2 : i32
    %99 = arith.index_cast %c2_i32 : i32 to index
    %c0_34 = arith.constant 0 : index
    %c0_35 = arith.constant 0 : index
    %100 = vector.load %arg2[%99, %c0_34, %c0_35] : memref<8x8x32xbf16, #tpu.memory_space<vmem>>, vector<1x8x32xbf16>
    %101 = vector.shape_cast %100 : vector<1x8x32xbf16> to vector<8x32xbf16>
    %cst_36 = arith.constant dense<0.000000e+00> : vector<8x128xf32>
    %102 = tpu.matmul %101, %0, %cst_36 {dimension_numbers = #tpu.dot_dimension_numbers<[1], [0], [0], [1], [0, 0, 1, 1], [], []>} : vector<8x32xbf16>, vector<32x128xbf16>, vector<8x128xf32> -> vector<8x128xf32>
    %103 = arith.truncf %95 : vector<8x32xf32> to vector<8x32xbf16>
    %cst_37 = arith.constant dense<0.000000e+00> : vector<8x128xf32>
    %104 = tpu.matmul %103, %1, %cst_37 {dimension_numbers = #tpu.dot_dimension_numbers<[1], [0], [0], [1], [0, 0, 1, 1], [], []>} : vector<8x32xbf16>, vector<32x128xbf16>, vector<8x128xf32> -> vector<8x128xf32>
    %105 = arith.addf %102, %104 : vector<8x128xf32>
    %106 = vector.broadcast %2 : vector<1x128xf32> to vector<8x128xf32>
    %107 = arith.addf %105, %106 : vector<8x128xf32>
    %108 = vector.extract_strided_slice %107 {offsets = [0, 0], sizes = [8, 32], strides = [1, 1]} : vector<8x128xf32> to vector<8x32xf32>
    %109 = arith.negf %108 : vector<8x32xf32>
    %110 = math.exp %109 : vector<8x32xf32>
    %cst_38 = arith.constant 1.000000e+00 : f32
    %111 = vector.broadcast %cst_38 : f32 to vector<8x32xf32>
    %112 = arith.addf %111, %110 : vector<8x32xf32>
    %113 = arith.divf %111, %112 : vector<8x32xf32>
    %114 = vector.extract_strided_slice %107 {offsets = [0, 32], sizes = [8, 32], strides = [1, 1]} : vector<8x128xf32> to vector<8x32xf32>
    %115 = arith.negf %114 : vector<8x32xf32>
    %116 = math.exp %115 : vector<8x32xf32>
    %cst_39 = arith.constant 1.000000e+00 : f32
    %117 = vector.broadcast %cst_39 : f32 to vector<8x32xf32>
    %118 = arith.addf %117, %116 : vector<8x32xf32>
    %119 = arith.divf %117, %118 : vector<8x32xf32>
    %120 = vector.extract_strided_slice %107 {offsets = [0, 64], sizes = [8, 32], strides = [1, 1]} : vector<8x128xf32> to vector<8x32xf32>
    %121 = math.tanh %120 : vector<8x32xf32>
    %122 = vector.extract_strided_slice %107 {offsets = [0, 96], sizes = [8, 32], strides = [1, 1]} : vector<8x128xf32> to vector<8x32xf32>
    %123 = arith.negf %122 : vector<8x32xf32>
    %124 = math.exp %123 : vector<8x32xf32>
    %cst_40 = arith.constant 1.000000e+00 : f32
    %125 = vector.broadcast %cst_40 : f32 to vector<8x32xf32>
    %126 = arith.addf %125, %124 : vector<8x32xf32>
    %127 = arith.divf %125, %126 : vector<8x32xf32>
    %128 = arith.mulf %119, %98 : vector<8x32xf32>
    %129 = arith.mulf %113, %121 : vector<8x32xf32>
    %130 = arith.addf %128, %129 : vector<8x32xf32>
    %131 = math.tanh %130 : vector<8x32xf32>
    %132 = arith.mulf %127, %131 : vector<8x32xf32>
    %133 = vector.broadcast %c2_i32 : i32 to vector<8x1xi32>
    %134 = arith.cmpi slt, %133, %9 : vector<8x1xi32>
    %135 = vector.shape_cast %134 : vector<8x1xi1> to vector<8x1xi1>
    %136 = vector.broadcast %135 : vector<8x1xi1> to vector<8x32xi1>
    %137 = arith.select %136, %132, %95 : vector<8x32xi1>, vector<8x32xf32>
    %138 = vector.shape_cast %134 : vector<8x1xi1> to vector<8x1xi1>
    %139 = vector.broadcast %138 : vector<8x1xi1> to vector<8x32xi1>
    %140 = arith.select %139, %130, %98 : vector<8x32xi1>, vector<8x32xf32>
    %c3_i32 = arith.constant 3 : i32
    %141 = arith.index_cast %c3_i32 : i32 to index
    %c0_41 = arith.constant 0 : index
    %c0_42 = arith.constant 0 : index
    %142 = vector.load %arg2[%141, %c0_41, %c0_42] : memref<8x8x32xbf16, #tpu.memory_space<vmem>>, vector<1x8x32xbf16>
    %143 = vector.shape_cast %142 : vector<1x8x32xbf16> to vector<8x32xbf16>
    %cst_43 = arith.constant dense<0.000000e+00> : vector<8x128xf32>
    %144 = tpu.matmul %143, %0, %cst_43 {dimension_numbers = #tpu.dot_dimension_numbers<[1], [0], [0], [1], [0, 0, 1, 1], [], []>} : vector<8x32xbf16>, vector<32x128xbf16>, vector<8x128xf32> -> vector<8x128xf32>
    %145 = arith.truncf %137 : vector<8x32xf32> to vector<8x32xbf16>
    %cst_44 = arith.constant dense<0.000000e+00> : vector<8x128xf32>
    %146 = tpu.matmul %145, %1, %cst_44 {dimension_numbers = #tpu.dot_dimension_numbers<[1], [0], [0], [1], [0, 0, 1, 1], [], []>} : vector<8x32xbf16>, vector<32x128xbf16>, vector<8x128xf32> -> vector<8x128xf32>
    %147 = arith.addf %144, %146 : vector<8x128xf32>
    %148 = vector.broadcast %2 : vector<1x128xf32> to vector<8x128xf32>
    %149 = arith.addf %147, %148 : vector<8x128xf32>
    %150 = vector.extract_strided_slice %149 {offsets = [0, 0], sizes = [8, 32], strides = [1, 1]} : vector<8x128xf32> to vector<8x32xf32>
    %151 = arith.negf %150 : vector<8x32xf32>
    %152 = math.exp %151 : vector<8x32xf32>
    %cst_45 = arith.constant 1.000000e+00 : f32
    %153 = vector.broadcast %cst_45 : f32 to vector<8x32xf32>
    %154 = arith.addf %153, %152 : vector<8x32xf32>
    %155 = arith.divf %153, %154 : vector<8x32xf32>
    %156 = vector.extract_strided_slice %149 {offsets = [0, 32], sizes = [8, 32], strides = [1, 1]} : vector<8x128xf32> to vector<8x32xf32>
    %157 = arith.negf %156 : vector<8x32xf32>
    %158 = math.exp %157 : vector<8x32xf32>
    %cst_46 = arith.constant 1.000000e+00 : f32
    %159 = vector.broadcast %cst_46 : f32 to vector<8x32xf32>
    %160 = arith.addf %159, %158 : vector<8x32xf32>
    %161 = arith.divf %159, %160 : vector<8x32xf32>
    %162 = vector.extract_strided_slice %149 {offsets = [0, 64], sizes = [8, 32], strides = [1, 1]} : vector<8x128xf32> to vector<8x32xf32>
    %163 = math.tanh %162 : vector<8x32xf32>
    %164 = vector.extract_strided_slice %149 {offsets = [0, 96], sizes = [8, 32], strides = [1, 1]} : vector<8x128xf32> to vector<8x32xf32>
    %165 = arith.negf %164 : vector<8x32xf32>
    %166 = math.exp %165 : vector<8x32xf32>
    %cst_47 = arith.constant 1.000000e+00 : f32
    %167 = vector.broadcast %cst_47 : f32 to vector<8x32xf32>
    %168 = arith.addf %167, %166 : vector<8x32xf32>
    %169 = arith.divf %167, %168 : vector<8x32xf32>
    %170 = arith.mulf %161, %140 : vector<8x32xf32>
    %171 = arith.mulf %155, %163 : vector<8x32xf32>
    %172 = arith.addf %170, %171 : vector<8x32xf32>
    %173 = math.tanh %172 : vector<8x32xf32>
    %174 = arith.mulf %169, %173 : vector<8x32xf32>
    %175 = vector.broadcast %c3_i32 : i32 to vector<8x1xi32>
    %176 = arith.cmpi slt, %175, %9 : vector<8x1xi32>
    %177 = vector.shape_cast %176 : vector<8x1xi1> to vector<8x1xi1>
    %178 = vector.broadcast %177 : vector<8x1xi1> to vector<8x32xi1>
    %179 = arith.select %178, %174, %137 : vector<8x32xi1>, vector<8x32xf32>
    %180 = vector.shape_cast %176 : vector<8x1xi1> to vector<8x1xi1>
    %181 = vector.broadcast %180 : vector<8x1xi1> to vector<8x32xi1>
    %182 = arith.select %181, %172, %140 : vector<8x32xi1>, vector<8x32xf32>
    %c4_i32 = arith.constant 4 : i32
    %183 = arith.index_cast %c4_i32 : i32 to index
    %c0_48 = arith.constant 0 : index
    %c0_49 = arith.constant 0 : index
    %184 = vector.load %arg2[%183, %c0_48, %c0_49] : memref<8x8x32xbf16, #tpu.memory_space<vmem>>, vector<1x8x32xbf16>
    %185 = vector.shape_cast %184 : vector<1x8x32xbf16> to vector<8x32xbf16>
    %cst_50 = arith.constant dense<0.000000e+00> : vector<8x128xf32>
    %186 = tpu.matmul %185, %0, %cst_50 {dimension_numbers = #tpu.dot_dimension_numbers<[1], [0], [0], [1], [0, 0, 1, 1], [], []>} : vector<8x32xbf16>, vector<32x128xbf16>, vector<8x128xf32> -> vector<8x128xf32>
    %187 = arith.truncf %179 : vector<8x32xf32> to vector<8x32xbf16>
    %cst_51 = arith.constant dense<0.000000e+00> : vector<8x128xf32>
    %188 = tpu.matmul %187, %1, %cst_51 {dimension_numbers = #tpu.dot_dimension_numbers<[1], [0], [0], [1], [0, 0, 1, 1], [], []>} : vector<8x32xbf16>, vector<32x128xbf16>, vector<8x128xf32> -> vector<8x128xf32>
    %189 = arith.addf %186, %188 : vector<8x128xf32>
    %190 = vector.broadcast %2 : vector<1x128xf32> to vector<8x128xf32>
    %191 = arith.addf %189, %190 : vector<8x128xf32>
    %192 = vector.extract_strided_slice %191 {offsets = [0, 0], sizes = [8, 32], strides = [1, 1]} : vector<8x128xf32> to vector<8x32xf32>
    %193 = arith.negf %192 : vector<8x32xf32>
    %194 = math.exp %193 : vector<8x32xf32>
    %cst_52 = arith.constant 1.000000e+00 : f32
    %195 = vector.broadcast %cst_52 : f32 to vector<8x32xf32>
    %196 = arith.addf %195, %194 : vector<8x32xf32>
    %197 = arith.divf %195, %196 : vector<8x32xf32>
    %198 = vector.extract_strided_slice %191 {offsets = [0, 32], sizes = [8, 32], strides = [1, 1]} : vector<8x128xf32> to vector<8x32xf32>
    %199 = arith.negf %198 : vector<8x32xf32>
    %200 = math.exp %199 : vector<8x32xf32>
    %cst_53 = arith.constant 1.000000e+00 : f32
    %201 = vector.broadcast %cst_53 : f32 to vector<8x32xf32>
    %202 = arith.addf %201, %200 : vector<8x32xf32>
    %203 = arith.divf %201, %202 : vector<8x32xf32>
    %204 = vector.extract_strided_slice %191 {offsets = [0, 64], sizes = [8, 32], strides = [1, 1]} : vector<8x128xf32> to vector<8x32xf32>
    %205 = math.tanh %204 : vector<8x32xf32>
    %206 = vector.extract_strided_slice %191 {offsets = [0, 96], sizes = [8, 32], strides = [1, 1]} : vector<8x128xf32> to vector<8x32xf32>
    %207 = arith.negf %206 : vector<8x32xf32>
    %208 = math.exp %207 : vector<8x32xf32>
    %cst_54 = arith.constant 1.000000e+00 : f32
    %209 = vector.broadcast %cst_54 : f32 to vector<8x32xf32>
    %210 = arith.addf %209, %208 : vector<8x32xf32>
    %211 = arith.divf %209, %210 : vector<8x32xf32>
    %212 = arith.mulf %203, %182 : vector<8x32xf32>
    %213 = arith.mulf %197, %205 : vector<8x32xf32>
    %214 = arith.addf %212, %213 : vector<8x32xf32>
    %215 = math.tanh %214 : vector<8x32xf32>
    %216 = arith.mulf %211, %215 : vector<8x32xf32>
    %217 = vector.broadcast %c4_i32 : i32 to vector<8x1xi32>
    %218 = arith.cmpi slt, %217, %9 : vector<8x1xi32>
    %219 = vector.shape_cast %218 : vector<8x1xi1> to vector<8x1xi1>
    %220 = vector.broadcast %219 : vector<8x1xi1> to vector<8x32xi1>
    %221 = arith.select %220, %216, %179 : vector<8x32xi1>, vector<8x32xf32>
    %222 = vector.shape_cast %218 : vector<8x1xi1> to vector<8x1xi1>
    %223 = vector.broadcast %222 : vector<8x1xi1> to vector<8x32xi1>
    %224 = arith.select %223, %214, %182 : vector<8x32xi1>, vector<8x32xf32>
    %c5_i32 = arith.constant 5 : i32
    %225 = arith.index_cast %c5_i32 : i32 to index
    %c0_55 = arith.constant 0 : index
    %c0_56 = arith.constant 0 : index
    %226 = vector.load %arg2[%225, %c0_55, %c0_56] : memref<8x8x32xbf16, #tpu.memory_space<vmem>>, vector<1x8x32xbf16>
    %227 = vector.shape_cast %226 : vector<1x8x32xbf16> to vector<8x32xbf16>
    %cst_57 = arith.constant dense<0.000000e+00> : vector<8x128xf32>
    %228 = tpu.matmul %227, %0, %cst_57 {dimension_numbers = #tpu.dot_dimension_numbers<[1], [0], [0], [1], [0, 0, 1, 1], [], []>} : vector<8x32xbf16>, vector<32x128xbf16>, vector<8x128xf32> -> vector<8x128xf32>
    %229 = arith.truncf %221 : vector<8x32xf32> to vector<8x32xbf16>
    %cst_58 = arith.constant dense<0.000000e+00> : vector<8x128xf32>
    %230 = tpu.matmul %229, %1, %cst_58 {dimension_numbers = #tpu.dot_dimension_numbers<[1], [0], [0], [1], [0, 0, 1, 1], [], []>} : vector<8x32xbf16>, vector<32x128xbf16>, vector<8x128xf32> -> vector<8x128xf32>
    %231 = arith.addf %228, %230 : vector<8x128xf32>
    %232 = vector.broadcast %2 : vector<1x128xf32> to vector<8x128xf32>
    %233 = arith.addf %231, %232 : vector<8x128xf32>
    %234 = vector.extract_strided_slice %233 {offsets = [0, 0], sizes = [8, 32], strides = [1, 1]} : vector<8x128xf32> to vector<8x32xf32>
    %235 = arith.negf %234 : vector<8x32xf32>
    %236 = math.exp %235 : vector<8x32xf32>
    %cst_59 = arith.constant 1.000000e+00 : f32
    %237 = vector.broadcast %cst_59 : f32 to vector<8x32xf32>
    %238 = arith.addf %237, %236 : vector<8x32xf32>
    %239 = arith.divf %237, %238 : vector<8x32xf32>
    %240 = vector.extract_strided_slice %233 {offsets = [0, 32], sizes = [8, 32], strides = [1, 1]} : vector<8x128xf32> to vector<8x32xf32>
    %241 = arith.negf %240 : vector<8x32xf32>
    %242 = math.exp %241 : vector<8x32xf32>
    %cst_60 = arith.constant 1.000000e+00 : f32
    %243 = vector.broadcast %cst_60 : f32 to vector<8x32xf32>
    %244 = arith.addf %243, %242 : vector<8x32xf32>
    %245 = arith.divf %243, %244 : vector<8x32xf32>
    %246 = vector.extract_strided_slice %233 {offsets = [0, 64], sizes = [8, 32], strides = [1, 1]} : vector<8x128xf32> to vector<8x32xf32>
    %247 = math.tanh %246 : vector<8x32xf32>
    %248 = vector.extract_strided_slice %233 {offsets = [0, 96], sizes = [8, 32], strides = [1, 1]} : vector<8x128xf32> to vector<8x32xf32>
    %249 = arith.negf %248 : vector<8x32xf32>
    %250 = math.exp %249 : vector<8x32xf32>
    %cst_61 = arith.constant 1.000000e+00 : f32
    %251 = vector.broadcast %cst_61 : f32 to vector<8x32xf32>
    %252 = arith.addf %251, %250 : vector<8x32xf32>
    %253 = arith.divf %251, %252 : vector<8x32xf32>
    %254 = arith.mulf %245, %224 : vector<8x32xf32>
    %255 = arith.mulf %239, %247 : vector<8x32xf32>
    %256 = arith.addf %254, %255 : vector<8x32xf32>
    %257 = math.tanh %256 : vector<8x32xf32>
    %258 = arith.mulf %253, %257 : vector<8x32xf32>
    %259 = vector.broadcast %c5_i32 : i32 to vector<8x1xi32>
    %260 = arith.cmpi slt, %259, %9 : vector<8x1xi32>
    %261 = vector.shape_cast %260 : vector<8x1xi1> to vector<8x1xi1>
    %262 = vector.broadcast %261 : vector<8x1xi1> to vector<8x32xi1>
    %263 = arith.select %262, %258, %221 : vector<8x32xi1>, vector<8x32xf32>
    %264 = vector.shape_cast %260 : vector<8x1xi1> to vector<8x1xi1>
    %265 = vector.broadcast %264 : vector<8x1xi1> to vector<8x32xi1>
    %266 = arith.select %265, %256, %224 : vector<8x32xi1>, vector<8x32xf32>
    %c6_i32 = arith.constant 6 : i32
    %267 = arith.index_cast %c6_i32 : i32 to index
    %c0_62 = arith.constant 0 : index
    %c0_63 = arith.constant 0 : index
    %268 = vector.load %arg2[%267, %c0_62, %c0_63] : memref<8x8x32xbf16, #tpu.memory_space<vmem>>, vector<1x8x32xbf16>
    %269 = vector.shape_cast %268 : vector<1x8x32xbf16> to vector<8x32xbf16>
    %cst_64 = arith.constant dense<0.000000e+00> : vector<8x128xf32>
    %270 = tpu.matmul %269, %0, %cst_64 {dimension_numbers = #tpu.dot_dimension_numbers<[1], [0], [0], [1], [0, 0, 1, 1], [], []>} : vector<8x32xbf16>, vector<32x128xbf16>, vector<8x128xf32> -> vector<8x128xf32>
    %271 = arith.truncf %263 : vector<8x32xf32> to vector<8x32xbf16>
    %cst_65 = arith.constant dense<0.000000e+00> : vector<8x128xf32>
    %272 = tpu.matmul %271, %1, %cst_65 {dimension_numbers = #tpu.dot_dimension_numbers<[1], [0], [0], [1], [0, 0, 1, 1], [], []>} : vector<8x32xbf16>, vector<32x128xbf16>, vector<8x128xf32> -> vector<8x128xf32>
    %273 = arith.addf %270, %272 : vector<8x128xf32>
    %274 = vector.broadcast %2 : vector<1x128xf32> to vector<8x128xf32>
    %275 = arith.addf %273, %274 : vector<8x128xf32>
    %276 = vector.extract_strided_slice %275 {offsets = [0, 0], sizes = [8, 32], strides = [1, 1]} : vector<8x128xf32> to vector<8x32xf32>
    %277 = arith.negf %276 : vector<8x32xf32>
    %278 = math.exp %277 : vector<8x32xf32>
    %cst_66 = arith.constant 1.000000e+00 : f32
    %279 = vector.broadcast %cst_66 : f32 to vector<8x32xf32>
    %280 = arith.addf %279, %278 : vector<8x32xf32>
    %281 = arith.divf %279, %280 : vector<8x32xf32>
    %282 = vector.extract_strided_slice %275 {offsets = [0, 32], sizes = [8, 32], strides = [1, 1]} : vector<8x128xf32> to vector<8x32xf32>
    %283 = arith.negf %282 : vector<8x32xf32>
    %284 = math.exp %283 : vector<8x32xf32>
    %cst_67 = arith.constant 1.000000e+00 : f32
    %285 = vector.broadcast %cst_67 : f32 to vector<8x32xf32>
    %286 = arith.addf %285, %284 : vector<8x32xf32>
    %287 = arith.divf %285, %286 : vector<8x32xf32>
    %288 = vector.extract_strided_slice %275 {offsets = [0, 64], sizes = [8, 32], strides = [1, 1]} : vector<8x128xf32> to vector<8x32xf32>
    %289 = math.tanh %288 : vector<8x32xf32>
    %290 = vector.extract_strided_slice %275 {offsets = [0, 96], sizes = [8, 32], strides = [1, 1]} : vector<8x128xf32> to vector<8x32xf32>
    %291 = arith.negf %290 : vector<8x32xf32>
    %292 = math.exp %291 : vector<8x32xf32>
    %cst_68 = arith.constant 1.000000e+00 : f32
    %293 = vector.broadcast %cst_68 : f32 to vector<8x32xf32>
    %294 = arith.addf %293, %292 : vector<8x32xf32>
    %295 = arith.divf %293, %294 : vector<8x32xf32>
    %296 = arith.mulf %287, %266 : vector<8x32xf32>
    %297 = arith.mulf %281, %289 : vector<8x32xf32>
    %298 = arith.addf %296, %297 : vector<8x32xf32>
    %299 = math.tanh %298 : vector<8x32xf32>
    %300 = arith.mulf %295, %299 : vector<8x32xf32>
    %301 = vector.broadcast %c6_i32 : i32 to vector<8x1xi32>
    %302 = arith.cmpi slt, %301, %9 : vector<8x1xi32>
    %303 = vector.shape_cast %302 : vector<8x1xi1> to vector<8x1xi1>
    %304 = vector.broadcast %303 : vector<8x1xi1> to vector<8x32xi1>
    %305 = arith.select %304, %300, %263 : vector<8x32xi1>, vector<8x32xf32>
    %306 = vector.shape_cast %302 : vector<8x1xi1> to vector<8x1xi1>
    %307 = vector.broadcast %306 : vector<8x1xi1> to vector<8x32xi1>
    %308 = arith.select %307, %298, %266 : vector<8x32xi1>, vector<8x32xf32>
    %c7_i32 = arith.constant 7 : i32
    %309 = arith.index_cast %c7_i32 : i32 to index
    %c0_69 = arith.constant 0 : index
    %c0_70 = arith.constant 0 : index
    %310 = vector.load %arg2[%309, %c0_69, %c0_70] : memref<8x8x32xbf16, #tpu.memory_space<vmem>>, vector<1x8x32xbf16>
    %311 = vector.shape_cast %310 : vector<1x8x32xbf16> to vector<8x32xbf16>
    %cst_71 = arith.constant dense<0.000000e+00> : vector<8x128xf32>
    %312 = tpu.matmul %311, %0, %cst_71 {dimension_numbers = #tpu.dot_dimension_numbers<[1], [0], [0], [1], [0, 0, 1, 1], [], []>} : vector<8x32xbf16>, vector<32x128xbf16>, vector<8x128xf32> -> vector<8x128xf32>
    %313 = arith.truncf %305 : vector<8x32xf32> to vector<8x32xbf16>
    %cst_72 = arith.constant dense<0.000000e+00> : vector<8x128xf32>
    %314 = tpu.matmul %313, %1, %cst_72 {dimension_numbers = #tpu.dot_dimension_numbers<[1], [0], [0], [1], [0, 0, 1, 1], [], []>} : vector<8x32xbf16>, vector<32x128xbf16>, vector<8x128xf32> -> vector<8x128xf32>
    %315 = arith.addf %312, %314 : vector<8x128xf32>
    %316 = vector.broadcast %2 : vector<1x128xf32> to vector<8x128xf32>
    %317 = arith.addf %315, %316 : vector<8x128xf32>
    %318 = vector.extract_strided_slice %317 {offsets = [0, 0], sizes = [8, 32], strides = [1, 1]} : vector<8x128xf32> to vector<8x32xf32>
    %319 = arith.negf %318 : vector<8x32xf32>
    %320 = math.exp %319 : vector<8x32xf32>
    %cst_73 = arith.constant 1.000000e+00 : f32
    %321 = vector.broadcast %cst_73 : f32 to vector<8x32xf32>
    %322 = arith.addf %321, %320 : vector<8x32xf32>
    %323 = arith.divf %321, %322 : vector<8x32xf32>
    %324 = vector.extract_strided_slice %317 {offsets = [0, 32], sizes = [8, 32], strides = [1, 1]} : vector<8x128xf32> to vector<8x32xf32>
    %325 = arith.negf %324 : vector<8x32xf32>
    %326 = math.exp %325 : vector<8x32xf32>
    %cst_74 = arith.constant 1.000000e+00 : f32
    %327 = vector.broadcast %cst_74 : f32 to vector<8x32xf32>
    %328 = arith.addf %327, %326 : vector<8x32xf32>
    %329 = arith.divf %327, %328 : vector<8x32xf32>
    %330 = vector.extract_strided_slice %317 {offsets = [0, 64], sizes = [8, 32], strides = [1, 1]} : vector<8x128xf32> to vector<8x32xf32>
    %331 = math.tanh %330 : vector<8x32xf32>
    %332 = vector.extract_strided_slice %317 {offsets = [0, 96], sizes = [8, 32], strides = [1, 1]} : vector<8x128xf32> to vector<8x32xf32>
    %333 = arith.negf %332 : vector<8x32xf32>
    %334 = math.exp %333 : vector<8x32xf32>
    %cst_75 = arith.constant 1.000000e+00 : f32
    %335 = vector.broadcast %cst_75 : f32 to vector<8x32xf32>
    %336 = arith.addf %335, %334 : vector<8x32xf32>
    %337 = arith.divf %335, %336 : vector<8x32xf32>
    %338 = arith.mulf %329, %308 : vector<8x32xf32>
    %339 = arith.mulf %323, %331 : vector<8x32xf32>
    %340 = arith.addf %338, %339 : vector<8x32xf32>
    %341 = math.tanh %340 : vector<8x32xf32>
    %342 = arith.mulf %337, %341 : vector<8x32xf32>
    %343 = vector.broadcast %c7_i32 : i32 to vector<8x1xi32>
    %344 = arith.cmpi slt, %343, %9 : vector<8x1xi32>
    %345 = vector.shape_cast %344 : vector<8x1xi1> to vector<8x1xi1>
    %346 = vector.broadcast %345 : vector<8x1xi1> to vector<8x32xi1>
    %347 = arith.select %346, %342, %305 : vector<8x32xi1>, vector<8x32xf32>
    %348 = vector.shape_cast %344 : vector<8x1xi1> to vector<8x1xi1>
    %349 = vector.broadcast %348 : vector<8x1xi1> to vector<8x32xi1>
    %350 = arith.select %349, %340, %308 : vector<8x32xi1>, vector<8x32xf32>
    %c8_i32 = arith.constant 8 : i32
    %c0_76 = arith.constant 0 : index
    %c0_77 = arith.constant 0 : index
    %351 = vector.load %arg3[%c0_76, %c0_77] : memref<1x32xbf16, #tpu.memory_space<vmem>>, vector<1x32xbf16>
    %352 = vector.shape_cast %351 : vector<1x32xbf16> to vector<1x32xbf16>
    %353 = vector.broadcast %352 : vector<1x32xbf16> to vector<8x32xbf16>
    %cst_78 = arith.constant 0.000000e+00 : f32
    %354 = vector.broadcast %cst_78 : f32 to vector<8x32xf32>
    %c0_i32_79 = arith.constant 0 : i32
    %cst_80 = arith.constant dense<0.000000e+00> : vector<8x128xf32>
    %355 = tpu.matmul %353, %3, %cst_80 {dimension_numbers = #tpu.dot_dimension_numbers<[1], [0], [0], [1], [0, 0, 1, 1], [], []>} : vector<8x32xbf16>, vector<32x128xbf16>, vector<8x128xf32> -> vector<8x128xf32>
    %356 = arith.truncf %347 : vector<8x32xf32> to vector<8x32xbf16>
    %cst_81 = arith.constant dense<0.000000e+00> : vector<8x128xf32>
    %357 = tpu.matmul %356, %4, %cst_81 {dimension_numbers = #tpu.dot_dimension_numbers<[1], [0], [0], [1], [0, 0, 1, 1], [], []>} : vector<8x32xbf16>, vector<32x128xbf16>, vector<8x128xf32> -> vector<8x128xf32>
    %358 = arith.addf %355, %357 : vector<8x128xf32>
    %359 = vector.broadcast %5 : vector<1x128xf32> to vector<8x128xf32>
    %360 = arith.addf %358, %359 : vector<8x128xf32>
    %361 = vector.extract_strided_slice %360 {offsets = [0, 0], sizes = [8, 32], strides = [1, 1]} : vector<8x128xf32> to vector<8x32xf32>
    %362 = arith.negf %361 : vector<8x32xf32>
    %363 = math.exp %362 : vector<8x32xf32>
    %cst_82 = arith.constant 1.000000e+00 : f32
    %364 = vector.broadcast %cst_82 : f32 to vector<8x32xf32>
    %365 = arith.addf %364, %363 : vector<8x32xf32>
    %366 = arith.divf %364, %365 : vector<8x32xf32>
    %367 = vector.extract_strided_slice %360 {offsets = [0, 32], sizes = [8, 32], strides = [1, 1]} : vector<8x128xf32> to vector<8x32xf32>
    %368 = arith.negf %367 : vector<8x32xf32>
    %369 = math.exp %368 : vector<8x32xf32>
    %cst_83 = arith.constant 1.000000e+00 : f32
    %370 = vector.broadcast %cst_83 : f32 to vector<8x32xf32>
    %371 = arith.addf %370, %369 : vector<8x32xf32>
    %372 = arith.divf %370, %371 : vector<8x32xf32>
    %373 = vector.extract_strided_slice %360 {offsets = [0, 64], sizes = [8, 32], strides = [1, 1]} : vector<8x128xf32> to vector<8x32xf32>
    %374 = math.tanh %373 : vector<8x32xf32>
    %375 = vector.extract_strided_slice %360 {offsets = [0, 96], sizes = [8, 32], strides = [1, 1]} : vector<8x128xf32> to vector<8x32xf32>
    %376 = arith.negf %375 : vector<8x32xf32>
    %377 = math.exp %376 : vector<8x32xf32>
    %cst_84 = arith.constant 1.000000e+00 : f32
    %378 = vector.broadcast %cst_84 : f32 to vector<8x32xf32>
    %379 = arith.addf %378, %377 : vector<8x32xf32>
    %380 = arith.divf %378, %379 : vector<8x32xf32>
    %381 = arith.mulf %372, %354 : vector<8x32xf32>
    %382 = arith.mulf %366, %374 : vector<8x32xf32>
    %383 = arith.addf %381, %382 : vector<8x32xf32>
    %384 = math.tanh %383 : vector<8x32xf32>
    %385 = arith.mulf %380, %384 : vector<8x32xf32>
    %386 = arith.truncf %385 : vector<8x32xf32> to vector<8x32xbf16>
    %cst_85 = arith.constant dense<0.000000e+00> : vector<8x128xf32>
    %387 = tpu.matmul %386, %6, %cst_85 {dimension_numbers = #tpu.dot_dimension_numbers<[1], [0], [0], [1], [0, 0, 1, 1], [], []>} : vector<8x32xbf16>, vector<32x128xbf16>, vector<8x128xf32> -> vector<8x128xf32>
    %388 = vector.broadcast %7 : vector<1x128xf32> to vector<8x128xf32>
    %389 = arith.addf %387, %388 : vector<8x128xf32>
    %390 = arith.index_cast %c0_i32_79 : i32 to index
    %c0_86 = arith.constant 0 : index
    %c0_87 = arith.constant 0 : index
    %391 = vector.load %arg13[%390, %c0_86, %c0_87] : memref<7x8x128xf32, #tpu.memory_space<vmem>>, vector<1x8x128xf32>
    %392 = vector.shape_cast %391 : vector<1x8x128xf32> to vector<8x128xf32>
    %393 = vector.shape_cast %389 : vector<8x128xf32> to vector<1x8x128xf32>
    tpu.vector_store %arg13[%390, %c0_86, %c0_87], %393 {strides = array<i32>} : memref<7x8x128xf32, #tpu.memory_space<vmem>>, vector<1x8x128xf32>,
    %394 = arith.index_cast %c0_i32_79 : i32 to index
    %c0_88 = arith.constant 0 : index
    %c0_89 = arith.constant 0 : index
    %395 = vector.load %arg2[%394, %c0_88, %c0_89] : memref<8x8x32xbf16, #tpu.memory_space<vmem>>, vector<1x8x32xbf16>
    %396 = vector.shape_cast %395 : vector<1x8x32xbf16> to vector<8x32xbf16>
    %c1_i32_90 = arith.constant 1 : i32
    %cst_91 = arith.constant dense<0.000000e+00> : vector<8x128xf32>
    %397 = tpu.matmul %396, %3, %cst_91 {dimension_numbers = #tpu.dot_dimension_numbers<[1], [0], [0], [1], [0, 0, 1, 1], [], []>} : vector<8x32xbf16>, vector<32x128xbf16>, vector<8x128xf32> -> vector<8x128xf32>
    %398 = arith.truncf %385 : vector<8x32xf32> to vector<8x32xbf16>
    %cst_92 = arith.constant dense<0.000000e+00> : vector<8x128xf32>
    %399 = tpu.matmul %398, %4, %cst_92 {dimension_numbers = #tpu.dot_dimension_numbers<[1], [0], [0], [1], [0, 0, 1, 1], [], []>} : vector<8x32xbf16>, vector<32x128xbf16>, vector<8x128xf32> -> vector<8x128xf32>
    %400 = arith.addf %397, %399 : vector<8x128xf32>
    %401 = vector.broadcast %5 : vector<1x128xf32> to vector<8x128xf32>
    %402 = arith.addf %400, %401 : vector<8x128xf32>
    %403 = vector.extract_strided_slice %402 {offsets = [0, 0], sizes = [8, 32], strides = [1, 1]} : vector<8x128xf32> to vector<8x32xf32>
    %404 = arith.negf %403 : vector<8x32xf32>
    %405 = math.exp %404 : vector<8x32xf32>
    %cst_93 = arith.constant 1.000000e+00 : f32
    %406 = vector.broadcast %cst_93 : f32 to vector<8x32xf32>
    %407 = arith.addf %406, %405 : vector<8x32xf32>
    %408 = arith.divf %406, %407 : vector<8x32xf32>
    %409 = vector.extract_strided_slice %402 {offsets = [0, 32], sizes = [8, 32], strides = [1, 1]} : vector<8x128xf32> to vector<8x32xf32>
    %410 = arith.negf %409 : vector<8x32xf32>
    %411 = math.exp %410 : vector<8x32xf32>
    %cst_94 = arith.constant 1.000000e+00 : f32
    %412 = vector.broadcast %cst_94 : f32 to vector<8x32xf32>
    %413 = arith.addf %412, %411 : vector<8x32xf32>
    %414 = arith.divf %412, %413 : vector<8x32xf32>
    %415 = vector.extract_strided_slice %402 {offsets = [0, 64], sizes = [8, 32], strides = [1, 1]} : vector<8x128xf32> to vector<8x32xf32>
    %416 = math.tanh %415 : vector<8x32xf32>
    %417 = vector.extract_strided_slice %402 {offsets = [0, 96], sizes = [8, 32], strides = [1, 1]} : vector<8x128xf32> to vector<8x32xf32>
    %418 = arith.negf %417 : vector<8x32xf32>
    %419 = math.exp %418 : vector<8x32xf32>
    %cst_95 = arith.constant 1.000000e+00 : f32
    %420 = vector.broadcast %cst_95 : f32 to vector<8x32xf32>
    %421 = arith.addf %420, %419 : vector<8x32xf32>
    %422 = arith.divf %420, %421 : vector<8x32xf32>
    %423 = arith.mulf %414, %383 : vector<8x32xf32>
    %424 = arith.mulf %408, %416 : vector<8x32xf32>
    %425 = arith.addf %423, %424 : vector<8x32xf32>
    %426 = math.tanh %425 : vector<8x32xf32>
    %427 = arith.mulf %422, %426 : vector<8x32xf32>
    %428 = arith.truncf %427 : vector<8x32xf32> to vector<8x32xbf16>
    %cst_96 = arith.constant dense<0.000000e+00> : vector<8x128xf32>
    %429 = tpu.matmul %428, %6, %cst_96 {dimension_numbers = #tpu.dot_dimension_numbers<[1], [0], [0], [1], [0, 0, 1, 1], [], []>} : vector<8x32xbf16>, vector<32x128xbf16>, vector<8x128xf32> -> vector<8x128xf32>
    %430 = vector.broadcast %7 : vector<1x128xf32> to vector<8x128xf32>
    %431 = arith.addf %429, %430 : vector<8x128xf32>
    %432 = arith.index_cast %c1_i32_90 : i32 to index
    %c0_97 = arith.constant 0 : index
    %c0_98 = arith.constant 0 : index
    %433 = vector.load %arg13[%432, %c0_97, %c0_98] : memref<7x8x128xf32, #tpu.memory_space<vmem>>, vector<1x8x128xf32>
    %434 = vector.shape_cast %433 : vector<1x8x128xf32> to vector<8x128xf32>
    %435 = vector.shape_cast %431 : vector<8x128xf32> to vector<1x8x128xf32>
    tpu.vector_store %arg13[%432, %c0_97, %c0_98], %435 {strides = array<i32>} : memref<7x8x128xf32, #tpu.memory_space<vmem>>, vector<1x8x128xf32>,
    %436 = arith.index_cast %c1_i32_90 : i32 to index
    %c0_99 = arith.constant 0 : index
    %c0_100 = arith.constant 0 : index
    %437 = vector.load %arg2[%436, %c0_99, %c0_100] : memref<8x8x32xbf16, #tpu.memory_space<vmem>>, vector<1x8x32xbf16>
    %438 = vector.shape_cast %437 : vector<1x8x32xbf16> to vector<8x32xbf16>
    %c2_i32_101 = arith.constant 2 : i32
    %c2_i32_102 = arith.constant 2 : i32
    %cst_103 = arith.constant dense<0.000000e+00> : vector<8x128xf32>
    %439 = tpu.matmul %438, %3, %cst_103 {dimension_numbers = #tpu.dot_dimension_numbers<[1], [0], [0], [1], [0, 0, 1, 1], [], []>} : vector<8x32xbf16>, vector<32x128xbf16>, vector<8x128xf32> -> vector<8x128xf32>
    %440 = arith.truncf %427 : vector<8x32xf32> to vector<8x32xbf16>
    %cst_104 = arith.constant dense<0.000000e+00> : vector<8x128xf32>
    %441 = tpu.matmul %440, %4, %cst_104 {dimension_numbers = #tpu.dot_dimension_numbers<[1], [0], [0], [1], [0, 0, 1, 1], [], []>} : vector<8x32xbf16>, vector<32x128xbf16>, vector<8x128xf32> -> vector<8x128xf32>
    %442 = arith.addf %439, %441 : vector<8x128xf32>
    %443 = vector.broadcast %5 : vector<1x128xf32> to vector<8x128xf32>
    %444 = arith.addf %442, %443 : vector<8x128xf32>
    %445 = vector.extract_strided_slice %444 {offsets = [0, 0], sizes = [8, 32], strides = [1, 1]} : vector<8x128xf32> to vector<8x32xf32>
    %446 = arith.negf %445 : vector<8x32xf32>
    %447 = math.exp %446 : vector<8x32xf32>
    %cst_105 = arith.constant 1.000000e+00 : f32
    %448 = vector.broadcast %cst_105 : f32 to vector<8x32xf32>
    %449 = arith.addf %448, %447 : vector<8x32xf32>
    %450 = arith.divf %448, %449 : vector<8x32xf32>
    %451 = vector.extract_strided_slice %444 {offsets = [0, 32], sizes = [8, 32], strides = [1, 1]} : vector<8x128xf32> to vector<8x32xf32>
    %452 = arith.negf %451 : vector<8x32xf32>
    %453 = math.exp %452 : vector<8x32xf32>
    %cst_106 = arith.constant 1.000000e+00 : f32
    %454 = vector.broadcast %cst_106 : f32 to vector<8x32xf32>
    %455 = arith.addf %454, %453 : vector<8x32xf32>
    %456 = arith.divf %454, %455 : vector<8x32xf32>
    %457 = vector.extract_strided_slice %444 {offsets = [0, 64], sizes = [8, 32], strides = [1, 1]} : vector<8x128xf32> to vector<8x32xf32>
    %458 = math.tanh %457 : vector<8x32xf32>
    %459 = vector.extract_strided_slice %444 {offsets = [0, 96], sizes = [8, 32], strides = [1, 1]} : vector<8x128xf32> to vector<8x32xf32>
    %460 = arith.negf %459 : vector<8x32xf32>
    %461 = math.exp %460 : vector<8x32xf32>
    %cst_107 = arith.constant 1.000000e+00 : f32
    %462 = vector.broadcast %cst_107 : f32 to vector<8x32xf32>
    %463 = arith.addf %462, %461 : vector<8x32xf32>
    %464 = arith.divf %462, %463 : vector<8x32xf32>
    %465 = arith.mulf %456, %425 : vector<8x32xf32>
    %466 = arith.mulf %450, %458 : vector<8x32xf32>
    %467 = arith.addf %465, %466 : vector<8x32xf32>
    %468 = math.tanh %467 : vector<8x32xf32>
    %469 = arith.mulf %464, %468 : vector<8x32xf32>
    %470 = arith.truncf %469 : vector<8x32xf32> to vector<8x32xbf16>
    %cst_108 = arith.constant dense<0.000000e+00> : vector<8x128xf32>
    %471 = tpu.matmul %470, %6, %cst_108 {dimension_numbers = #tpu.dot_dimension_numbers<[1], [0], [0], [1], [0, 0, 1, 1], [], []>} : vector<8x32xbf16>, vector<32x128xbf16>, vector<8x128xf32> -> vector<8x128xf32>
    %472 = vector.broadcast %7 : vector<1x128xf32> to vector<8x128xf32>
    %473 = arith.addf %471, %472 : vector<8x128xf32>
    %474 = arith.index_cast %c2_i32_102 : i32 to index
    %c0_109 = arith.constant 0 : index
    %c0_110 = arith.constant 0 : index
    %475 = vector.load %arg13[%474, %c0_109, %c0_110] : memref<7x8x128xf32, #tpu.memory_space<vmem>>, vector<1x8x128xf32>
    %476 = vector.shape_cast %475 : vector<1x8x128xf32> to vector<8x128xf32>
    %477 = vector.shape_cast %473 : vector<8x128xf32> to vector<1x8x128xf32>
    tpu.vector_store %arg13[%474, %c0_109, %c0_110], %477 {strides = array<i32>} : memref<7x8x128xf32, #tpu.memory_space<vmem>>, vector<1x8x128xf32>,
    %cst_111 = arith.constant -1.000000e+30 : f32
    %478 = vector.broadcast %cst_111 : f32 to vector<8x128xf32>
    %479 = arith.select %12, %473, %478 : vector<8x128xi1>, vector<8x128xf32>
    %cst_112 = arith.constant dense<0xFF800000> : vector<8xf32>
    %480 = vector.multi_reduction <maximumf>, %479, %cst_112 [1] : vector<8x128xf32> to vector<8xf32>
    %481 = vector.shape_cast %480 : vector<8xf32> to vector<8x1xf32>
    %482 = vector.broadcast %481 : vector<8x1xf32> to vector<8x128xf32>
    %483 = arith.cmpf oeq, %479, %482 : vector<8x128xf32>
    %c128_i32 = arith.constant 128 : i32
    %484 = vector.broadcast %c128_i32 : i32 to vector<8x128xi32>
    %485 = arith.select %483, %10, %484 : vector<8x128xi1>, vector<8x128xi32>
    %cst_113 = arith.constant dense<2147483647> : vector<8xi32>
    %486 = vector.multi_reduction <minsi>, %485, %cst_113 [1] : vector<8x128xi32> to vector<8xi32>
    %487 = vector.shape_cast %486 : vector<8xi32> to vector<8x1xi32>
    %488 = vector.broadcast %487 : vector<8x1xi32> to vector<8x128xi32>
    %489 = arith.cmpi eq, %488, %10 : vector<8x128xi32>
    %490 = arith.extui %489 : vector<8x128xi1> to vector<8x128xi32>
    %491 = arith.sitofp %490 : vector<8x128xi32> to vector<8x128xf32>
    %492 = arith.truncf %491 : vector<8x128xf32> to vector<8x128xbf16>
    %cst_114 = arith.constant dense<0.000000e+00> : vector<8x32xf32>
    %493 = tpu.matmul %492, %8, %cst_114 {dimension_numbers = #tpu.dot_dimension_numbers<[1], [0], [0], [1], [0, 0, 1, 1], [], []>} : vector<8x128xbf16>, vector<128x32xbf16>, vector<8x32xf32> -> vector<8x32xf32>
    %494 = arith.truncf %493 : vector<8x32xf32> to vector<8x32xbf16>
    %c3_i32_115 = arith.constant 3 : i32
    %cst_116 = arith.constant dense<0.000000e+00> : vector<8x128xf32>
    %495 = tpu.matmul %494, %3, %cst_116 {dimension_numbers = #tpu.dot_dimension_numbers<[1], [0], [0], [1], [0, 0, 1, 1], [], []>} : vector<8x32xbf16>, vector<32x128xbf16>, vector<8x128xf32> -> vector<8x128xf32>
    %496 = arith.truncf %469 : vector<8x32xf32> to vector<8x32xbf16>
    %cst_117 = arith.constant dense<0.000000e+00> : vector<8x128xf32>
    %497 = tpu.matmul %496, %4, %cst_117 {dimension_numbers = #tpu.dot_dimension_numbers<[1], [0], [0], [1], [0, 0, 1, 1], [], []>} : vector<8x32xbf16>, vector<32x128xbf16>, vector<8x128xf32> -> vector<8x128xf32>
    %498 = arith.addf %495, %497 : vector<8x128xf32>
    %499 = vector.broadcast %5 : vector<1x128xf32> to vector<8x128xf32>
    %500 = arith.addf %498, %499 : vector<8x128xf32>
    %501 = vector.extract_strided_slice %500 {offsets = [0, 0], sizes = [8, 32], strides = [1, 1]} : vector<8x128xf32> to vector<8x32xf32>
    %502 = arith.negf %501 : vector<8x32xf32>
    %503 = math.exp %502 : vector<8x32xf32>
    %cst_118 = arith.constant 1.000000e+00 : f32
    %504 = vector.broadcast %cst_118 : f32 to vector<8x32xf32>
    %505 = arith.addf %504, %503 : vector<8x32xf32>
    %506 = arith.divf %504, %505 : vector<8x32xf32>
    %507 = vector.extract_strided_slice %500 {offsets = [0, 32], sizes = [8, 32], strides = [1, 1]} : vector<8x128xf32> to vector<8x32xf32>
    %508 = arith.negf %507 : vector<8x32xf32>
    %509 = math.exp %508 : vector<8x32xf32>
    %cst_119 = arith.constant 1.000000e+00 : f32
    %510 = vector.broadcast %cst_119 : f32 to vector<8x32xf32>
    %511 = arith.addf %510, %509 : vector<8x32xf32>
    %512 = arith.divf %510, %511 : vector<8x32xf32>
    %513 = vector.extract_strided_slice %500 {offsets = [0, 64], sizes = [8, 32], strides = [1, 1]} : vector<8x128xf32> to vector<8x32xf32>
    %514 = math.tanh %513 : vector<8x32xf32>
    %515 = vector.extract_strided_slice %500 {offsets = [0, 96], sizes = [8, 32], strides = [1, 1]} : vector<8x128xf32> to vector<8x32xf32>
    %516 = arith.negf %515 : vector<8x32xf32>
    %517 = math.exp %516 : vector<8x32xf32>
    %cst_120 = arith.constant 1.000000e+00 : f32
    %518 = vector.broadcast %cst_120 : f32 to vector<8x32xf32>
    %519 = arith.addf %518, %517 : vector<8x32xf32>
    %520 = arith.divf %518, %519 : vector<8x32xf32>
    %521 = arith.mulf %512, %467 : vector<8x32xf32>
    %522 = arith.mulf %506, %514 : vector<8x32xf32>
    %523 = arith.addf %521, %522 : vector<8x32xf32>
    %524 = math.tanh %523 : vector<8x32xf32>
    %525 = arith.mulf %520, %524 : vector<8x32xf32>
    %526 = arith.truncf %525 : vector<8x32xf32> to vector<8x32xbf16>
    %cst_121 = arith.constant dense<0.000000e+00> : vector<8x128xf32>
    %527 = tpu.matmul %526, %6, %cst_121 {dimension_numbers = #tpu.dot_dimension_numbers<[1], [0], [0], [1], [0, 0, 1, 1], [], []>} : vector<8x32xbf16>, vector<32x128xbf16>, vector<8x128xf32> -> vector<8x128xf32>
    %528 = vector.broadcast %7 : vector<1x128xf32> to vector<8x128xf32>
    %529 = arith.addf %527, %528 : vector<8x128xf32>
    %530 = arith.index_cast %c3_i32_115 : i32 to index
    %c0_122 = arith.constant 0 : index
    %c0_123 = arith.constant 0 : index
    %531 = vector.load %arg13[%530, %c0_122, %c0_123] : memref<7x8x128xf32, #tpu.memory_space<vmem>>, vector<1x8x128xf32>
    %532 = vector.shape_cast %531 : vector<1x8x128xf32> to vector<8x128xf32>
    %533 = vector.shape_cast %529 : vector<8x128xf32> to vector<1x8x128xf32>
    tpu.vector_store %arg13[%530, %c0_122, %c0_123], %533 {strides = array<i32>} : memref<7x8x128xf32, #tpu.memory_space<vmem>>, vector<1x8x128xf32>,
    %cst_124 = arith.constant -1.000000e+30 : f32
    %534 = vector.broadcast %cst_124 : f32 to vector<8x128xf32>
    %535 = arith.select %12, %529, %534 : vector<8x128xi1>, vector<8x128xf32>
    %cst_125 = arith.constant dense<0xFF800000> : vector<8xf32>
    %536 = vector.multi_reduction <maximumf>, %535, %cst_125 [1] : vector<8x128xf32> to vector<8xf32>
    %537 = vector.shape_cast %536 : vector<8xf32> to vector<8x1xf32>
    %538 = vector.broadcast %537 : vector<8x1xf32> to vector<8x128xf32>
    %539 = arith.cmpf oeq, %535, %538 : vector<8x128xf32>
    %c128_i32_126 = arith.constant 128 : i32
    %540 = vector.broadcast %c128_i32_126 : i32 to vector<8x128xi32>
    %541 = arith.select %539, %10, %540 : vector<8x128xi1>, vector<8x128xi32>
    %cst_127 = arith.constant dense<2147483647> : vector<8xi32>
    %542 = vector.multi_reduction <minsi>, %541, %cst_127 [1] : vector<8x128xi32> to vector<8xi32>
    %543 = vector.shape_cast %542 : vector<8xi32> to vector<8x1xi32>
    %544 = vector.broadcast %543 : vector<8x1xi32> to vector<8x128xi32>
    %545 = arith.cmpi eq, %544, %10 : vector<8x128xi32>
    %546 = arith.extui %545 : vector<8x128xi1> to vector<8x128xi32>
    %547 = arith.sitofp %546 : vector<8x128xi32> to vector<8x128xf32>
    %548 = arith.truncf %547 : vector<8x128xf32> to vector<8x128xbf16>
    %cst_128 = arith.constant dense<0.000000e+00> : vector<8x32xf32>
    %549 = tpu.matmul %548, %8, %cst_128 {dimension_numbers = #tpu.dot_dimension_numbers<[1], [0], [0], [1], [0, 0, 1, 1], [], []>} : vector<8x128xbf16>, vector<128x32xbf16>, vector<8x32xf32> -> vector<8x32xf32>
    %550 = arith.truncf %549 : vector<8x32xf32> to vector<8x32xbf16>
    %c4_i32_129 = arith.constant 4 : i32
    %cst_130 = arith.constant dense<0.000000e+00> : vector<8x128xf32>
    %551 = tpu.matmul %550, %3, %cst_130 {dimension_numbers = #tpu.dot_dimension_numbers<[1], [0], [0], [1], [0, 0, 1, 1], [], []>} : vector<8x32xbf16>, vector<32x128xbf16>, vector<8x128xf32> -> vector<8x128xf32>
    %552 = arith.truncf %525 : vector<8x32xf32> to vector<8x32xbf16>
    %cst_131 = arith.constant dense<0.000000e+00> : vector<8x128xf32>
    %553 = tpu.matmul %552, %4, %cst_131 {dimension_numbers = #tpu.dot_dimension_numbers<[1], [0], [0], [1], [0, 0, 1, 1], [], []>} : vector<8x32xbf16>, vector<32x128xbf16>, vector<8x128xf32> -> vector<8x128xf32>
    %554 = arith.addf %551, %553 : vector<8x128xf32>
    %555 = vector.broadcast %5 : vector<1x128xf32> to vector<8x128xf32>
    %556 = arith.addf %554, %555 : vector<8x128xf32>
    %557 = vector.extract_strided_slice %556 {offsets = [0, 0], sizes = [8, 32], strides = [1, 1]} : vector<8x128xf32> to vector<8x32xf32>
    %558 = arith.negf %557 : vector<8x32xf32>
    %559 = math.exp %558 : vector<8x32xf32>
    %cst_132 = arith.constant 1.000000e+00 : f32
    %560 = vector.broadcast %cst_132 : f32 to vector<8x32xf32>
    %561 = arith.addf %560, %559 : vector<8x32xf32>
    %562 = arith.divf %560, %561 : vector<8x32xf32>
    %563 = vector.extract_strided_slice %556 {offsets = [0, 32], sizes = [8, 32], strides = [1, 1]} : vector<8x128xf32> to vector<8x32xf32>
    %564 = arith.negf %563 : vector<8x32xf32>
    %565 = math.exp %564 : vector<8x32xf32>
    %cst_133 = arith.constant 1.000000e+00 : f32
    %566 = vector.broadcast %cst_133 : f32 to vector<8x32xf32>
    %567 = arith.addf %566, %565 : vector<8x32xf32>
    %568 = arith.divf %566, %567 : vector<8x32xf32>
    %569 = vector.extract_strided_slice %556 {offsets = [0, 64], sizes = [8, 32], strides = [1, 1]} : vector<8x128xf32> to vector<8x32xf32>
    %570 = math.tanh %569 : vector<8x32xf32>
    %571 = vector.extract_strided_slice %556 {offsets = [0, 96], sizes = [8, 32], strides = [1, 1]} : vector<8x128xf32> to vector<8x32xf32>
    %572 = arith.negf %571 : vector<8x32xf32>
    %573 = math.exp %572 : vector<8x32xf32>
    %cst_134 = arith.constant 1.000000e+00 : f32
    %574 = vector.broadcast %cst_134 : f32 to vector<8x32xf32>
    %575 = arith.addf %574, %573 : vector<8x32xf32>
    %576 = arith.divf %574, %575 : vector<8x32xf32>
    %577 = arith.mulf %568, %523 : vector<8x32xf32>
    %578 = arith.mulf %562, %570 : vector<8x32xf32>
    %579 = arith.addf %577, %578 : vector<8x32xf32>
    %580 = math.tanh %579 : vector<8x32xf32>
    %581 = arith.mulf %576, %580 : vector<8x32xf32>
    %582 = arith.truncf %581 : vector<8x32xf32> to vector<8x32xbf16>
    %cst_135 = arith.constant dense<0.000000e+00> : vector<8x128xf32>
    %583 = tpu.matmul %582, %6, %cst_135 {dimension_numbers = #tpu.dot_dimension_numbers<[1], [0], [0], [1], [0, 0, 1, 1], [], []>} : vector<8x32xbf16>, vector<32x128xbf16>, vector<8x128xf32> -> vector<8x128xf32>
    %584 = vector.broadcast %7 : vector<1x128xf32> to vector<8x128xf32>
    %585 = arith.addf %583, %584 : vector<8x128xf32>
    %586 = arith.index_cast %c4_i32_129 : i32 to index
    %c0_136 = arith.constant 0 : index
    %c0_137 = arith.constant 0 : index
    %587 = vector.load %arg13[%586, %c0_136, %c0_137] : memref<7x8x128xf32, #tpu.memory_space<vmem>>, vector<1x8x128xf32>
    %588 = vector.shape_cast %587 : vector<1x8x128xf32> to vector<8x128xf32>
    %589 = vector.shape_cast %585 : vector<8x128xf32> to vector<1x8x128xf32>
    tpu.vector_store %arg13[%586, %c0_136, %c0_137], %589 {strides = array<i32>} : memref<7x8x128xf32, #tpu.memory_space<vmem>>, vector<1x8x128xf32>,
    %cst_138 = arith.constant -1.000000e+30 : f32
    %590 = vector.broadcast %cst_138 : f32 to vector<8x128xf32>
    %591 = arith.select %12, %585, %590 : vector<8x128xi1>, vector<8x128xf32>
    %cst_139 = arith.constant dense<0xFF800000> : vector<8xf32>
    %592 = vector.multi_reduction <maximumf>, %591, %cst_139 [1] : vector<8x128xf32> to vector<8xf32>
    %593 = vector.shape_cast %592 : vector<8xf32> to vector<8x1xf32>
    %594 = vector.broadcast %593 : vector<8x1xf32> to vector<8x128xf32>
    %595 = arith.cmpf oeq, %591, %594 : vector<8x128xf32>
    %c128_i32_140 = arith.constant 128 : i32
    %596 = vector.broadcast %c128_i32_140 : i32 to vector<8x128xi32>
    %597 = arith.select %595, %10, %596 : vector<8x128xi1>, vector<8x128xi32>
    %cst_141 = arith.constant dense<2147483647> : vector<8xi32>
    %598 = vector.multi_reduction <minsi>, %597, %cst_141 [1] : vector<8x128xi32> to vector<8xi32>
    %599 = vector.shape_cast %598 : vector<8xi32> to vector<8x1xi32>
    %600 = vector.broadcast %599 : vector<8x1xi32> to vector<8x128xi32>
    %601 = arith.cmpi eq, %600, %10 : vector<8x128xi32>
    %602 = arith.extui %601 : vector<8x128xi1> to vector<8x128xi32>
    %603 = arith.sitofp %602 : vector<8x128xi32> to vector<8x128xf32>
    %604 = arith.truncf %603 : vector<8x128xf32> to vector<8x128xbf16>
    %cst_142 = arith.constant dense<0.000000e+00> : vector<8x32xf32>
    %605 = tpu.matmul %604, %8, %cst_142 {dimension_numbers = #tpu.dot_dimension_numbers<[1], [0], [0], [1], [0, 0, 1, 1], [], []>} : vector<8x128xbf16>, vector<128x32xbf16>, vector<8x32xf32> -> vector<8x32xf32>
    %606 = arith.truncf %605 : vector<8x32xf32> to vector<8x32xbf16>
    %c5_i32_143 = arith.constant 5 : i32
    %cst_144 = arith.constant dense<0.000000e+00> : vector<8x128xf32>
    %607 = tpu.matmul %606, %3, %cst_144 {dimension_numbers = #tpu.dot_dimension_numbers<[1], [0], [0], [1], [0, 0, 1, 1], [], []>} : vector<8x32xbf16>, vector<32x128xbf16>, vector<8x128xf32> -> vector<8x128xf32>
    %608 = arith.truncf %581 : vector<8x32xf32> to vector<8x32xbf16>
    %cst_145 = arith.constant dense<0.000000e+00> : vector<8x128xf32>
    %609 = tpu.matmul %608, %4, %cst_145 {dimension_numbers = #tpu.dot_dimension_numbers<[1], [0], [0], [1], [0, 0, 1, 1], [], []>} : vector<8x32xbf16>, vector<32x128xbf16>, vector<8x128xf32> -> vector<8x128xf32>
    %610 = arith.addf %607, %609 : vector<8x128xf32>
    %611 = vector.broadcast %5 : vector<1x128xf32> to vector<8x128xf32>
    %612 = arith.addf %610, %611 : vector<8x128xf32>
    %613 = vector.extract_strided_slice %612 {offsets = [0, 0], sizes = [8, 32], strides = [1, 1]} : vector<8x128xf32> to vector<8x32xf32>
    %614 = arith.negf %613 : vector<8x32xf32>
    %615 = math.exp %614 : vector<8x32xf32>
    %cst_146 = arith.constant 1.000000e+00 : f32
    %616 = vector.broadcast %cst_146 : f32 to vector<8x32xf32>
    %617 = arith.addf %616, %615 : vector<8x32xf32>
    %618 = arith.divf %616, %617 : vector<8x32xf32>
    %619 = vector.extract_strided_slice %612 {offsets = [0, 32], sizes = [8, 32], strides = [1, 1]} : vector<8x128xf32> to vector<8x32xf32>
    %620 = arith.negf %619 : vector<8x32xf32>
    %621 = math.exp %620 : vector<8x32xf32>
    %cst_147 = arith.constant 1.000000e+00 : f32
    %622 = vector.broadcast %cst_147 : f32 to vector<8x32xf32>
    %623 = arith.addf %622, %621 : vector<8x32xf32>
    %624 = arith.divf %622, %623 : vector<8x32xf32>
    %625 = vector.extract_strided_slice %612 {offsets = [0, 64], sizes = [8, 32], strides = [1, 1]} : vector<8x128xf32> to vector<8x32xf32>
    %626 = math.tanh %625 : vector<8x32xf32>
    %627 = vector.extract_strided_slice %612 {offsets = [0, 96], sizes = [8, 32], strides = [1, 1]} : vector<8x128xf32> to vector<8x32xf32>
    %628 = arith.negf %627 : vector<8x32xf32>
    %629 = math.exp %628 : vector<8x32xf32>
    %cst_148 = arith.constant 1.000000e+00 : f32
    %630 = vector.broadcast %cst_148 : f32 to vector<8x32xf32>
    %631 = arith.addf %630, %629 : vector<8x32xf32>
    %632 = arith.divf %630, %631 : vector<8x32xf32>
    %633 = arith.mulf %624, %579 : vector<8x32xf32>
    %634 = arith.mulf %618, %626 : vector<8x32xf32>
    %635 = arith.addf %633, %634 : vector<8x32xf32>
    %636 = math.tanh %635 : vector<8x32xf32>
    %637 = arith.mulf %632, %636 : vector<8x32xf32>
    %638 = arith.truncf %637 : vector<8x32xf32> to vector<8x32xbf16>
    %cst_149 = arith.constant dense<0.000000e+00> : vector<8x128xf32>
    %639 = tpu.matmul %638, %6, %cst_149 {dimension_numbers = #tpu.dot_dimension_numbers<[1], [0], [0], [1], [0, 0, 1, 1], [], []>} : vector<8x32xbf16>, vector<32x128xbf16>, vector<8x128xf32> -> vector<8x128xf32>
    %640 = vector.broadcast %7 : vector<1x128xf32> to vector<8x128xf32>
    %641 = arith.addf %639, %640 : vector<8x128xf32>
    %642 = arith.index_cast %c5_i32_143 : i32 to index
    %c0_150 = arith.constant 0 : index
    %c0_151 = arith.constant 0 : index
    %643 = vector.load %arg13[%642, %c0_150, %c0_151] : memref<7x8x128xf32, #tpu.memory_space<vmem>>, vector<1x8x128xf32>
    %644 = vector.shape_cast %643 : vector<1x8x128xf32> to vector<8x128xf32>
    %645 = vector.shape_cast %641 : vector<8x128xf32> to vector<1x8x128xf32>
    tpu.vector_store %arg13[%642, %c0_150, %c0_151], %645 {strides = array<i32>} : memref<7x8x128xf32, #tpu.memory_space<vmem>>, vector<1x8x128xf32>,
    %cst_152 = arith.constant -1.000000e+30 : f32
    %646 = vector.broadcast %cst_152 : f32 to vector<8x128xf32>
    %647 = arith.select %12, %641, %646 : vector<8x128xi1>, vector<8x128xf32>
    %cst_153 = arith.constant dense<0xFF800000> : vector<8xf32>
    %648 = vector.multi_reduction <maximumf>, %647, %cst_153 [1] : vector<8x128xf32> to vector<8xf32>
    %649 = vector.shape_cast %648 : vector<8xf32> to vector<8x1xf32>
    %650 = vector.broadcast %649 : vector<8x1xf32> to vector<8x128xf32>
    %651 = arith.cmpf oeq, %647, %650 : vector<8x128xf32>
    %c128_i32_154 = arith.constant 128 : i32
    %652 = vector.broadcast %c128_i32_154 : i32 to vector<8x128xi32>
    %653 = arith.select %651, %10, %652 : vector<8x128xi1>, vector<8x128xi32>
    %cst_155 = arith.constant dense<2147483647> : vector<8xi32>
    %654 = vector.multi_reduction <minsi>, %653, %cst_155 [1] : vector<8x128xi32> to vector<8xi32>
    %655 = vector.shape_cast %654 : vector<8xi32> to vector<8x1xi32>
    %656 = vector.broadcast %655 : vector<8x1xi32> to vector<8x128xi32>
    %657 = arith.cmpi eq, %656, %10 : vector<8x128xi32>
    %658 = arith.extui %657 : vector<8x128xi1> to vector<8x128xi32>
    %659 = arith.sitofp %658 : vector<8x128xi32> to vector<8x128xf32>
    %660 = arith.truncf %659 : vector<8x128xf32> to vector<8x128xbf16>
    %cst_156 = arith.constant dense<0.000000e+00> : vector<8x32xf32>
    %661 = tpu.matmul %660, %8, %cst_156 {dimension_numbers = #tpu.dot_dimension_numbers<[1], [0], [0], [1], [0, 0, 1, 1], [], []>} : vector<8x128xbf16>, vector<128x32xbf16>, vector<8x32xf32> -> vector<8x32xf32>
    %662 = arith.truncf %661 : vector<8x32xf32> to vector<8x32xbf16>
    %c6_i32_157 = arith.constant 6 : i32
    %cst_158 = arith.constant dense<0.000000e+00> : vector<8x128xf32>
    %663 = tpu.matmul %662, %3, %cst_158 {dimension_numbers = #tpu.dot_dimension_numbers<[1], [0], [0], [1], [0, 0, 1, 1], [], []>} : vector<8x32xbf16>, vector<32x128xbf16>, vector<8x128xf32> -> vector<8x128xf32>
    %664 = arith.truncf %637 : vector<8x32xf32> to vector<8x32xbf16>
    %cst_159 = arith.constant dense<0.000000e+00> : vector<8x128xf32>
    %665 = tpu.matmul %664, %4, %cst_159 {dimension_numbers = #tpu.dot_dimension_numbers<[1], [0], [0], [1], [0, 0, 1, 1], [], []>} : vector<8x32xbf16>, vector<32x128xbf16>, vector<8x128xf32> -> vector<8x128xf32>
    %666 = arith.addf %663, %665 : vector<8x128xf32>
    %667 = vector.broadcast %5 : vector<1x128xf32> to vector<8x128xf32>
    %668 = arith.addf %666, %667 : vector<8x128xf32>
    %669 = vector.extract_strided_slice %668 {offsets = [0, 0], sizes = [8, 32], strides = [1, 1]} : vector<8x128xf32> to vector<8x32xf32>
    %670 = arith.negf %669 : vector<8x32xf32>
    %671 = math.exp %670 : vector<8x32xf32>
    %cst_160 = arith.constant 1.000000e+00 : f32
    %672 = vector.broadcast %cst_160 : f32 to vector<8x32xf32>
    %673 = arith.addf %672, %671 : vector<8x32xf32>
    %674 = arith.divf %672, %673 : vector<8x32xf32>
    %675 = vector.extract_strided_slice %668 {offsets = [0, 32], sizes = [8, 32], strides = [1, 1]} : vector<8x128xf32> to vector<8x32xf32>
    %676 = arith.negf %675 : vector<8x32xf32>
    %677 = math.exp %676 : vector<8x32xf32>
    %cst_161 = arith.constant 1.000000e+00 : f32
    %678 = vector.broadcast %cst_161 : f32 to vector<8x32xf32>
    %679 = arith.addf %678, %677 : vector<8x32xf32>
    %680 = arith.divf %678, %679 : vector<8x32xf32>
    %681 = vector.extract_strided_slice %668 {offsets = [0, 64], sizes = [8, 32], strides = [1, 1]} : vector<8x128xf32> to vector<8x32xf32>
    %682 = math.tanh %681 : vector<8x32xf32>
    %683 = vector.extract_strided_slice %668 {offsets = [0, 96], sizes = [8, 32], strides = [1, 1]} : vector<8x128xf32> to vector<8x32xf32>
    %684 = arith.negf %683 : vector<8x32xf32>
    %685 = math.exp %684 : vector<8x32xf32>
    %cst_162 = arith.constant 1.000000e+00 : f32
    %686 = vector.broadcast %cst_162 : f32 to vector<8x32xf32>
    %687 = arith.addf %686, %685 : vector<8x32xf32>
    %688 = arith.divf %686, %687 : vector<8x32xf32>
    %689 = arith.mulf %680, %635 : vector<8x32xf32>
    %690 = arith.mulf %674, %682 : vector<8x32xf32>
    %691 = arith.addf %689, %690 : vector<8x32xf32>
    %692 = math.tanh %691 : vector<8x32xf32>
    %693 = arith.mulf %688, %692 : vector<8x32xf32>
    %694 = arith.truncf %693 : vector<8x32xf32> to vector<8x32xbf16>
    %cst_163 = arith.constant dense<0.000000e+00> : vector<8x128xf32>
    %695 = tpu.matmul %694, %6, %cst_163 {dimension_numbers = #tpu.dot_dimension_numbers<[1], [0], [0], [1], [0, 0, 1, 1], [], []>} : vector<8x32xbf16>, vector<32x128xbf16>, vector<8x128xf32> -> vector<8x128xf32>
    %696 = vector.broadcast %7 : vector<1x128xf32> to vector<8x128xf32>
    %697 = arith.addf %695, %696 : vector<8x128xf32>
    %698 = arith.index_cast %c6_i32_157 : i32 to index
    %c0_164 = arith.constant 0 : index
    %c0_165 = arith.constant 0 : index
    %699 = vector.load %arg13[%698, %c0_164, %c0_165] : memref<7x8x128xf32, #tpu.memory_space<vmem>>, vector<1x8x128xf32>
    %700 = vector.shape_cast %699 : vector<1x8x128xf32> to vector<8x128xf32>
    %701 = vector.shape_cast %697 : vector<8x128xf32> to vector<1x8x128xf32>
    tpu.vector_store %arg13[%698, %c0_164, %c0_165], %701 {strides = array<i32>} : memref<7x8x128xf32, #tpu.memory_space<vmem>>, vector<1x8x128xf32>,
    %cst_166 = arith.constant -1.000000e+30 : f32
    %702 = vector.broadcast %cst_166 : f32 to vector<8x128xf32>
    %703 = arith.select %12, %697, %702 : vector<8x128xi1>, vector<8x128xf32>
    %cst_167 = arith.constant dense<0xFF800000> : vector<8xf32>
    %704 = vector.multi_reduction <maximumf>, %703, %cst_167 [1] : vector<8x128xf32> to vector<8xf32>
    %705 = vector.shape_cast %704 : vector<8xf32> to vector<8x1xf32>
    %706 = vector.broadcast %705 : vector<8x1xf32> to vector<8x128xf32>
    %707 = arith.cmpf oeq, %703, %706 : vector<8x128xf32>
    %c128_i32_168 = arith.constant 128 : i32
    %708 = vector.broadcast %c128_i32_168 : i32 to vector<8x128xi32>
    %709 = arith.select %707, %10, %708 : vector<8x128xi1>, vector<8x128xi32>
    %cst_169 = arith.constant dense<2147483647> : vector<8xi32>
    %710 = vector.multi_reduction <minsi>, %709, %cst_169 [1] : vector<8x128xi32> to vector<8xi32>
    %711 = vector.shape_cast %710 : vector<8xi32> to vector<8x1xi32>
    %712 = vector.broadcast %711 : vector<8x1xi32> to vector<8x128xi32>
    %713 = arith.cmpi eq, %712, %10 : vector<8x128xi32>
    %714 = arith.extui %713 : vector<8x128xi1> to vector<8x128xi32>
    %715 = arith.sitofp %714 : vector<8x128xi32> to vector<8x128xf32>
    %716 = arith.truncf %715 : vector<8x128xf32> to vector<8x128xbf16>
    %cst_170 = arith.constant dense<0.000000e+00> : vector<8x32xf32>
    %717 = tpu.matmul %716, %8, %cst_170 {dimension_numbers = #tpu.dot_dimension_numbers<[1], [0], [0], [1], [0, 0, 1, 1], [], []>} : vector<8x128xbf16>, vector<128x32xbf16>, vector<8x32xf32> -> vector<8x32xf32>
    %718 = arith.truncf %717 : vector<8x32xf32> to vector<8x32xbf16>
    %c5_i32_171 = arith.constant 5 : i32
    return
  }
  func.func @transform_0(%arg0: i32) -> (i32, i32) {
    %c0_i32 = arith.constant 0 : i32
    %c0_i32_0 = arith.constant 0 : i32
    return %arg0, %c0_i32 : i32, i32
  }
  func.func @transform_1(%arg0: i32) -> (i32, i32, i32) {
    %c0_i32 = arith.constant 0 : i32
    %c0_i32_0 = arith.constant 0 : i32
    %c0_i32_1 = arith.constant 0 : i32
    return %c0_i32, %arg0, %c0_i32_0 : i32, i32, i32
  }
  func.func @transform_2(%arg0: i32) -> (i32, i32) {
    %c0_i32 = arith.constant 0 : i32
    %c0_i32_0 = arith.constant 0 : i32
    %c0_i32_1 = arith.constant 0 : i32
    return %c0_i32, %c0_i32_0 : i32, i32
  }
  func.func @transform_3(%arg0: i32) -> (i32, i32) {
    %c0_i32 = arith.constant 0 : i32
    %c0_i32_0 = arith.constant 0 : i32
    %c0_i32_1 = arith.constant 0 : i32
    return %c0_i32, %c0_i32_0 : i32, i32
  }
  func.func @transform_4(%arg0: i32) -> (i32, i32) {
    %c0_i32 = arith.constant 0 : i32
    %c0_i32_0 = arith.constant 0 : i32
    %c0_i32_1 = arith.constant 0 : i32
    return %c0_i32, %c0_i32_0 : i32, i32
  }
  func.func @transform_5(%arg0: i32) -> (i32, i32) {
    %c0_i32 = arith.constant 0 : i32
    %c0_i32_0 = arith.constant 0 : i32
    %c0_i32_1 = arith.constant 0 : i32
    return %c0_i32, %c0_i32_0 : i32, i32
  }
  func.func @transform_6(%arg0: i32) -> (i32, i32) {
    %c0_i32 = arith.constant 0 : i32
    %c0_i32_0 = arith.constant 0 : i32
    %c0_i32_1 = arith.constant 0 : i32
    return %c0_i32, %c0_i32_0 : i32, i32
  }
  func.func @transform_7(%arg0: i32) -> (i32, i32) {
    %c0_i32 = arith.constant 0 : i32
    %c0_i32_0 = arith.constant 0 : i32
    %c0_i32_1 = arith.constant 0 : i32
    return %c0_i32, %c0_i32_0 : i32, i32
  }
  func.func @transform_8(%arg0: i32) -> (i32, i32) {
    %c0_i32 = arith.constant 0 : i32
    %c0_i32_0 = arith.constant 0 : i32
    %c0_i32_1 = arith.constant 0 : i32
    return %c0_i32, %c0_i32_0 : i32, i32
  }
  func.func @transform_9(%arg0: i32) -> (i32, i32) {
    %c0_i32 = arith.constant 0 : i32
    %c0_i32_0 = arith.constant 0 : i32
    %c0_i32_1 = arith.constant 0 : i32
    return %c0_i32, %c0_i32_0 : i32, i32
  }
  func.func @transform_10(%arg0: i32) -> (i32, i32) {
    %c0_i32 = arith.constant 0 : i32
    %c0_i32_0 = arith.constant 0 : i32
    %c0_i32_1 = arith.constant 0 : i32
    return %c0_i32, %c0_i32_0 : i32, i32
  }
  func.func @transform_11(%arg0: i32) -> (i32, i32) {
    %c0_i32 = arith.constant 0 : i32
    %c0_i32_0 = arith.constant 0 : i32
    %c0_i32_1 = arith.constant 0 : i32
    return %c0_i32, %c0_i32_0 : i32, i32
  }
  func.func @transform_12(%arg0: i32) -> (i32, i32, i32) {
    %c0_i32 = arith.constant 0 : i32
    %c0_i32_0 = arith.constant 0 : i32
    %c0_i32_1 = arith.constant 0 : i32
    return %c0_i32, %arg0, %c0_i32_0 : i32, i32, i32
  }
}

module attributes {stable_mosaic.version = 11 : i64} {
  func.func @_autoencoder_kernel(%arg0: i32, %arg1: memref<8x1xi32, #tpu.memory_space<vmem>>, %arg2: memref<8x8x32xbf16, #tpu.memory_space<vmem>>, %arg3: memref<1x32xbf16, #tpu.memory_space<vmem>>, %arg4: memref<128x32xbf16, #tpu.memory_space<vmem>>, %arg5: memref<32x128xbf16, #tpu.memory_space<vmem>>, %arg6: memref<32x128xbf16, #tpu.memory_space<vmem>>, %arg7: memref<1x128xf32, #tpu.memory_space<vmem>>, %arg8: memref<32x128xbf16, #tpu.memory_space<vmem>>, %arg9: memref<32x128xbf16, #tpu.memory_space<vmem>>, %arg10: memref<1x128xf32, #tpu.memory_space<vmem>>, %arg11: memref<32x128xbf16, #tpu.memory_space<vmem>>, %arg12: memref<1x128xf32, #tpu.memory_space<vmem>>, %arg13: memref<7x8x128xf32, #tpu.memory_space<vmem>>) attributes {dimension_semantics = [#tpu.dimension_semantics<parallel>], iteration_bounds = array<i64: 1>, scalar_prefetch = 0 : i64, scratch_operands = 0 : i64, tpu.core_type = #tpu.core_type<tc>, window_params = [{transform_indices = @transform_0, window_bounds = array<i64: 8, 1>}, {transform_indices = @transform_1, window_bounds = array<i64: 8, 8, 32>}, {pipeline_mode = #tpu.pipeline_mode<synchronous>, transform_indices = @transform_2, window_bounds = array<i64: 1, 32>}, {pipeline_mode = #tpu.pipeline_mode<synchronous>, transform_indices = @transform_3, window_bounds = array<i64: 128, 32>}, {pipeline_mode = #tpu.pipeline_mode<synchronous>, transform_indices = @transform_4, window_bounds = array<i64: 32, 128>}, {pipeline_mode = #tpu.pipeline_mode<synchronous>, transform_indices = @transform_5, window_bounds = array<i64: 32, 128>}, {pipeline_mode = #tpu.pipeline_mode<synchronous>, transform_indices = @transform_6, window_bounds = array<i64: 1, 128>}, {pipeline_mode = #tpu.pipeline_mode<synchronous>, transform_indices = @transform_7, window_bounds = array<i64: 32, 128>}, {pipeline_mode = #tpu.pipeline_mode<synchronous>, transform_indices = @transform_8, window_bounds = array<i64: 32, 128>}, {pipeline_mode = #tpu.pipeline_mode<synchronous>, transform_indices = @transform_9, window_bounds = array<i64: 1, 128>}, {pipeline_mode = #tpu.pipeline_mode<synchronous>, transform_indices = @transform_10, window_bounds = array<i64: 32, 128>}, {pipeline_mode = #tpu.pipeline_mode<synchronous>, transform_indices = @transform_11, window_bounds = array<i64: 1, 128>}, {transform_indices = @transform_12, window_bounds = array<i64: 7, 8, 128>}]} {
    %c0 = arith.constant 0 : index
    %c0_0 = arith.constant 0 : index
    %0 = vector.load %arg5[%c0, %c0_0] : memref<32x128xbf16, #tpu.memory_space<vmem>>, vector<32x128xbf16>
    %c0_1 = arith.constant 0 : index
    %c0_2 = arith.constant 0 : index
    %1 = vector.load %arg6[%c0_1, %c0_2] : memref<32x128xbf16, #tpu.memory_space<vmem>>, vector<32x128xbf16>
    %c0_3 = arith.constant 0 : index
    %c0_4 = arith.constant 0 : index
    %2 = vector.load %arg7[%c0_3, %c0_4] : memref<1x128xf32, #tpu.memory_space<vmem>>, vector<1x128xf32>
    %c0_5 = arith.constant 0 : index
    %c0_6 = arith.constant 0 : index
    %3 = vector.load %arg8[%c0_5, %c0_6] : memref<32x128xbf16, #tpu.memory_space<vmem>>, vector<32x128xbf16>
    %c0_7 = arith.constant 0 : index
    %c0_8 = arith.constant 0 : index
    %4 = vector.load %arg9[%c0_7, %c0_8] : memref<32x128xbf16, #tpu.memory_space<vmem>>, vector<32x128xbf16>
    %c0_9 = arith.constant 0 : index
    %c0_10 = arith.constant 0 : index
    %5 = vector.load %arg10[%c0_9, %c0_10] : memref<1x128xf32, #tpu.memory_space<vmem>>, vector<1x128xf32>
    %c0_11 = arith.constant 0 : index
    %c0_12 = arith.constant 0 : index
    %6 = vector.load %arg11[%c0_11, %c0_12] : memref<32x128xbf16, #tpu.memory_space<vmem>>, vector<32x128xbf16>
    %c0_13 = arith.constant 0 : index
    %c0_14 = arith.constant 0 : index
    %7 = vector.load %arg12[%c0_13, %c0_14] : memref<1x128xf32, #tpu.memory_space<vmem>>, vector<1x128xf32>
    %c0_15 = arith.constant 0 : index
    %c0_16 = arith.constant 0 : index
    %8 = vector.load %arg4[%c0_15, %c0_16] : memref<128x32xbf16, #tpu.memory_space<vmem>>, vector<128x32xbf16>
    %c0_17 = arith.constant 0 : index
    %c0_18 = arith.constant 0 : index
    %9 = vector.load %arg1[%c0_17, %c0_18] : memref<8x1xi32, #tpu.memory_space<vmem>>, vector<8x1xi32>
    %10 = tpu.iota {dimensions = array<i32: 1>} : vector<8x128xi32>
    %c32_i32 = arith.constant 32 : i32
    %11 = vector.broadcast %c32_i32 : i32 to vector<8x128xi32>
    %12 = arith.cmpi slt, %10, %11 : vector<8x128xi32>
    %cst = arith.constant 0.000000e+00 : f32
    %13 = vector.broadcast %cst : f32 to vector<8x32xf32>
    %cst_19 = arith.constant 0.000000e+00 : f32
    %14 = vector.broadcast %cst_19 : f32 to vector<8x32xf32>
    %c0_i32 = arith.constant 0 : i32
    %15 = arith.index_cast %c0_i32 : i32 to index
    %c0_20 = arith.constant 0 : index
    %c0_21 = arith.constant 0 : index
    %16 = vector.load %arg2[%15, %c0_20, %c0_21] : memref<8x8x32xbf16, #tpu.memory_space<vmem>>, vector<1x8x32xbf16>
    %17 = vector.shape_cast %16 : vector<1x8x32xbf16> to vector<8x32xbf16>
    %cst_22 = arith.constant dense<0.000000e+00> : vector<8x128xf32>
    %18 = tpu.matmul %17, %0, %cst_22 {dimension_numbers = #tpu.dot_dimension_numbers<[1], [0], [0], [1], [0, 0, 1, 1], [], []>} : vector<8x32xbf16>, vector<32x128xbf16>, vector<8x128xf32> -> vector<8x128xf32>
    %19 = arith.truncf %13 : vector<8x32xf32> to vector<8x32xbf16>
    %cst_23 = arith.constant dense<0.000000e+00> : vector<8x128xf32>
    %20 = tpu.matmul %19, %1, %cst_23 {dimension_numbers = #tpu.dot_dimension_numbers<[1], [0], [0], [1], [0, 0, 1, 1], [], []>} : vector<8x32xbf16>, vector<32x128xbf16>, vector<8x128xf32> -> vector<8x128xf32>
    %21 = arith.addf %18, %20 : vector<8x128xf32>
    %22 = vector.broadcast %2 : vector<1x128xf32> to vector<8x128xf32>
    %23 = arith.addf %21, %22 : vector<8x128xf32>
    %24 = vector.extract_strided_slice %23 {offsets = [0, 0], sizes = [8, 32], strides = [1, 1]} : vector<8x128xf32> to vector<8x32xf32>
    %25 = arith.negf %24 : vector<8x32xf32>
    %26 = math.exp %25 : vector<8x32xf32>
    %cst_24 = arith.constant 1.000000e+00 : f32
    %27 = vector.broadcast %cst_24 : f32 to vector<8x32xf32>
    %28 = arith.addf %27, %26 : vector<8x32xf32>
    %29 = arith.divf %27, %28 : vector<8x32xf32>
    %30 = vector.extract_strided_slice %23 {offsets = [0, 32], sizes = [8, 32], strides = [1, 1]} : vector<8x128xf32> to vector<8x32xf32>
    %31 = arith.negf %30 : vector<8x32xf32>
    %32 = math.exp %31 : vector<8x32xf32>
    %cst_25 = arith.constant 1.000000e+00 : f32
    %33 = vector.broadcast %cst_25 : f32 to vector<8x32xf32>
    %34 = arith.addf %33, %32 : vector<8x32xf32>
    %35 = arith.divf %33, %34 : vector<8x32xf32>
    %36 = vector.extract_strided_slice %23 {offsets = [0, 64], sizes = [8, 32], strides = [1, 1]} : vector<8x128xf32> to vector<8x32xf32>
    %37 = math.tanh %36 : vector<8x32xf32>
    %38 = vector.extract_strided_slice %23 {offsets = [0, 96], sizes = [8, 32], strides = [1, 1]} : vector<8x128xf32> to vector<8x32xf32>
    %39 = arith.negf %38 : vector<8x32xf32>
    %40 = math.exp %39 : vector<8x32xf32>
    %cst_26 = arith.constant 1.000000e+00 : f32
    %41 = vector.broadcast %cst_26 : f32 to vector<8x32xf32>
    %42 = arith.addf %41, %40 : vector<8x32xf32>
    %43 = arith.divf %41, %42 : vector<8x32xf32>
    %44 = arith.mulf %35, %14 : vector<8x32xf32>
    %45 = arith.mulf %29, %37 : vector<8x32xf32>
    %46 = arith.addf %44, %45 : vector<8x32xf32>
    %47 = math.tanh %46 : vector<8x32xf32>
    %48 = arith.mulf %43, %47 : vector<8x32xf32>
    %49 = vector.broadcast %c0_i32 : i32 to vector<8x1xi32>
    %50 = arith.cmpi slt, %49, %9 : vector<8x1xi32>
    %51 = vector.shape_cast %50 : vector<8x1xi1> to vector<8x1xi1>
    %52 = vector.broadcast %51 : vector<8x1xi1> to vector<8x32xi1>
    %53 = arith.select %52, %48, %13 : vector<8x32xi1>, vector<8x32xf32>
    %54 = vector.shape_cast %50 : vector<8x1xi1> to vector<8x1xi1>
    %55 = vector.broadcast %54 : vector<8x1xi1> to vector<8x32xi1>
    %56 = arith.select %55, %46, %14 : vector<8x32xi1>, vector<8x32xf32>
    %c1_i32 = arith.constant 1 : i32
    %57 = arith.index_cast %c1_i32 : i32 to index
    %c0_27 = arith.constant 0 : index
    %c0_28 = arith.constant 0 : index
    %58 = vector.load %arg2[%57, %c0_27, %c0_28] : memref<8x8x32xbf16, #tpu.memory_space<vmem>>, vector<1x8x32xbf16>
    %59 = vector.shape_cast %58 : vector<1x8x32xbf16> to vector<8x32xbf16>
    %cst_29 = arith.constant dense<0.000000e+00> : vector<8x128xf32>
    %60 = tpu.matmul %59, %0, %cst_29 {dimension_numbers = #tpu.dot_dimension_numbers<[1], [0], [0], [1], [0, 0, 1, 1], [], []>} : vector<8x32xbf16>, vector<32x128xbf16>, vector<8x128xf32> -> vector<8x128xf32>
    %61 = arith.truncf %53 : vector<8x32xf32> to vector<8x32xbf16>
    %cst_30 = arith.constant dense<0.000000e+00> : vector<8x128xf32>
    %62 = tpu.matmul %61, %1, %cst_30 {dimension_numbers = #tpu.dot_dimension_numbers<[1], [0], [0], [1], [0, 0, 1, 1], [], []>} : vector<8x32xbf16>, vector<32x128xbf16>, vector<8x128xf32> -> vector<8x128xf32>
    %63 = arith.addf %60, %62 : vector<8x128xf32>
    %64 = vector.broadcast %2 : vector<1x128xf32> to vector<8x128xf32>
    %65 = arith.addf %63, %64 : vector<8x128xf32>
    %66 = vector.extract_strided_slice %65 {offsets = [0, 0], sizes = [8, 32], strides = [1, 1]} : vector<8x128xf32> to vector<8x32xf32>
    %67 = arith.negf %66 : vector<8x32xf32>
    %68 = math.exp %67 : vector<8x32xf32>
    %cst_31 = arith.constant 1.000000e+00 : f32
    %69 = vector.broadcast %cst_31 : f32 to vector<8x32xf32>
    %70 = arith.addf %69, %68 : vector<8x32xf32>
    %71 = arith.divf %69, %70 : vector<8x32xf32>
    %72 = vector.extract_strided_slice %65 {offsets = [0, 32], sizes = [8, 32], strides = [1, 1]} : vector<8x128xf32> to vector<8x32xf32>
    %73 = arith.negf %72 : vector<8x32xf32>
    %74 = math.exp %73 : vector<8x32xf32>
    %cst_32 = arith.constant 1.000000e+00 : f32
    %75 = vector.broadcast %cst_32 : f32 to vector<8x32xf32>
    %76 = arith.addf %75, %74 : vector<8x32xf32>
    %77 = arith.divf %75, %76 : vector<8x32xf32>
    %78 = vector.extract_strided_slice %65 {offsets = [0, 64], sizes = [8, 32], strides = [1, 1]} : vector<8x128xf32> to vector<8x32xf32>
    %79 = math.tanh %78 : vector<8x32xf32>
    %80 = vector.extract_strided_slice %65 {offsets = [0, 96], sizes = [8, 32], strides = [1, 1]} : vector<8x128xf32> to vector<8x32xf32>
    %81 = arith.negf %80 : vector<8x32xf32>
    %82 = math.exp %81 : vector<8x32xf32>
    %cst_33 = arith.constant 1.000000e+00 : f32
    %83 = vector.broadcast %cst_33 : f32 to vector<8x32xf32>
    %84 = arith.addf %83, %82 : vector<8x32xf32>
    %85 = arith.divf %83, %84 : vector<8x32xf32>
    %86 = arith.mulf %77, %56 : vector<8x32xf32>
    %87 = arith.mulf %71, %79 : vector<8x32xf32>
    %88 = arith.addf %86, %87 : vector<8x32xf32>
    %89 = math.tanh %88 : vector<8x32xf32>
    %90 = arith.mulf %85, %89 : vector<8x32xf32>
    %91 = vector.broadcast %c1_i32 : i32 to vector<8x1xi32>
    %92 = arith.cmpi slt, %91, %9 : vector<8x1xi32>
    %93 = vector.shape_cast %92 : vector<8x1xi1> to vector<8x1xi1>
    %94 = vector.broadcast %93 : vector<8x1xi1> to vector<8x32xi1>
    %95 = arith.select %94, %90, %53 : vector<8x32xi1>, vector<8x32xf32>
    %96 = vector.shape_cast %92 : vector<8x1xi1> to vector<8x1xi1>
    %97 = vector.broadcast %96 : vector<8x1xi1> to vector<8x32xi1>
    %98 = arith.select %97, %88, %56 : vector<8x32xi1>, vector<8x32xf32>
    %c2_i32 = arith.constant 2 : i32
    %99 = arith.index_cast %c2_i32 : i32 to index
    %c0_34 = arith.constant 0 : index
    %c0_35 = arith.constant 0 : index
    %100 = vector.load %arg2[%99, %c0_34, %c0_35] : memref<8x8x32xbf16, #tpu.memory_space<vmem>>, vector<1x8x32xbf16>
    %101 = vector.shape_cast %100 : vector<1x8x32xbf16> to vector<8x32xbf16>
    %cst_36 = arith.constant dense<0.000000e+00> : vector<8x128xf32>
    %102 = tpu.matmul %101, %0, %cst_36 {dimension_numbers = #tpu.dot_dimension_numbers<[1], [0], [0], [1], [0, 0, 1, 1], [], []>} : vector<8x32xbf16>, vector<32x128xbf16>, vector<8x128xf32> -> vector<8x128xf32>
    %103 = arith.truncf %95 : vector<8x32xf32> to vector<8x32xbf16>
    %cst_37 = arith.constant dense<0.000000e+00> : vector<8x128xf32>
    %104 = tpu.matmul %103, %1, %cst_37 {dimension_numbers = #tpu.dot_dimension_numbers<[1], [0], [0], [1], [0, 0, 1, 1], [], []>} : vector<8x32xbf16>, vector<32x128xbf16>, vector<8x128xf32> -> vector<8x128xf32>
    %105 = arith.addf %102, %104 : vector<8x128xf32>
    %106 = vector.broadcast %2 : vector<1x128xf32> to vector<8x128xf32>
    %107 = arith.addf %105, %106 : vector<8x128xf32>
    %108 = vector.extract_strided_slice %107 {offsets = [0, 0], sizes = [8, 32], strides = [1, 1]} : vector<8x128xf32> to vector<8x32xf32>
    %109 = arith.negf %108 : vector<8x32xf32>
    %110 = math.exp %109 : vector<8x32xf32>
    %cst_38 = arith.constant 1.000000e+00 : f32
    %111 = vector.broadcast %cst_38 : f32 to vector<8x32xf32>
    %112 = arith.addf %111, %110 : vector<8x32xf32>
    %113 = arith.divf %111, %112 : vector<8x32xf32>
    %114 = vector.extract_strided_slice %107 {offsets = [0, 32], sizes = [8, 32], strides = [1, 1]} : vector<8x128xf32> to vector<8x32xf32>
    %115 = arith.negf %114 : vector<8x32xf32>
    %116 = math.exp %115 : vector<8x32xf32>
    %cst_39 = arith.constant 1.000000e+00 : f32
    %117 = vector.broadcast %cst_39 : f32 to vector<8x32xf32>
    %118 = arith.addf %117, %116 : vector<8x32xf32>
    %119 = arith.divf %117, %118 : vector<8x32xf32>
    %120 = vector.extract_strided_slice %107 {offsets = [0, 64], sizes = [8, 32], strides = [1, 1]} : vector<8x128xf32> to vector<8x32xf32>
    %121 = math.tanh %120 : vector<8x32xf32>
    %122 = vector.extract_strided_slice %107 {offsets = [0, 96], sizes = [8, 32], strides = [1, 1]} : vector<8x128xf32> to vector<8x32xf32>
    %123 = arith.negf %122 : vector<8x32xf32>
    %124 = math.exp %123 : vector<8x32xf32>
    %cst_40 = arith.constant 1.000000e+00 : f32
    %125 = vector.broadcast %cst_40 : f32 to vector<8x32xf32>
    %126 = arith.addf %125, %124 : vector<8x32xf32>
    %127 = arith.divf %125, %126 : vector<8x32xf32>
    %128 = arith.mulf %119, %98 : vector<8x32xf32>
    %129 = arith.mulf %113, %121 : vector<8x32xf32>
    %130 = arith.addf %128, %129 : vector<8x32xf32>
    %131 = math.tanh %130 : vector<8x32xf32>
    %132 = arith.mulf %127, %131 : vector<8x32xf32>
    %133 = vector.broadcast %c2_i32 : i32 to vector<8x1xi32>
    %134 = arith.cmpi slt, %133, %9 : vector<8x1xi32>
    %135 = vector.shape_cast %134 : vector<8x1xi1> to vector<8x1xi1>
    %136 = vector.broadcast %135 : vector<8x1xi1> to vector<8x32xi1>
    %137 = arith.select %136, %132, %95 : vector<8x32xi1>, vector<8x32xf32>
    %138 = vector.shape_cast %134 : vector<8x1xi1> to vector<8x1xi1>
    %139 = vector.broadcast %138 : vector<8x1xi1> to vector<8x32xi1>
    %140 = arith.select %139, %130, %98 : vector<8x32xi1>, vector<8x32xf32>
    %c3_i32 = arith.constant 3 : i32
    %141 = arith.index_cast %c3_i32 : i32 to index
    %c0_41 = arith.constant 0 : index
    %c0_42 = arith.constant 0 : index
    %142 = vector.load %arg2[%141, %c0_41, %c0_42] : memref<8x8x32xbf16, #tpu.memory_space<vmem>>, vector<1x8x32xbf16>
    %143 = vector.shape_cast %142 : vector<1x8x32xbf16> to vector<8x32xbf16>
    %cst_43 = arith.constant dense<0.000000e+00> : vector<8x128xf32>
    %144 = tpu.matmul %143, %0, %cst_43 {dimension_numbers = #tpu.dot_dimension_numbers<[1], [0], [0], [1], [0, 0, 1, 1], [], []>} : vector<8x32xbf16>, vector<32x128xbf16>, vector<8x128xf32> -> vector<8x128xf32>
    %145 = arith.truncf %137 : vector<8x32xf32> to vector<8x32xbf16>
    %cst_44 = arith.constant dense<0.000000e+00> : vector<8x128xf32>
    %146 = tpu.matmul %145, %1, %cst_44 {dimension_numbers = #tpu.dot_dimension_numbers<[1], [0], [0], [1], [0, 0, 1, 1], [], []>} : vector<8x32xbf16>, vector<32x128xbf16>, vector<8x128xf32> -> vector<8x128xf32>
    %147 = arith.addf %144, %146 : vector<8x128xf32>
    %148 = vector.broadcast %2 : vector<1x128xf32> to vector<8x128xf32>
    %149 = arith.addf %147, %148 : vector<8x128xf32>
    %150 = vector.extract_strided_slice %149 {offsets = [0, 0], sizes = [8, 32], strides = [1, 1]} : vector<8x128xf32> to vector<8x32xf32>
    %151 = arith.negf %150 : vector<8x32xf32>
    %152 = math.exp %151 : vector<8x32xf32>
    %cst_45 = arith.constant 1.000000e+00 : f32
    %153 = vector.broadcast %cst_45 : f32 to vector<8x32xf32>
    %154 = arith.addf %153, %152 : vector<8x32xf32>
    %155 = arith.divf %153, %154 : vector<8x32xf32>
    %156 = vector.extract_strided_slice %149 {offsets = [0, 32], sizes = [8, 32], strides = [1, 1]} : vector<8x128xf32> to vector<8x32xf32>
    %157 = arith.negf %156 : vector<8x32xf32>
    %158 = math.exp %157 : vector<8x32xf32>
    %cst_46 = arith.constant 1.000000e+00 : f32
    %159 = vector.broadcast %cst_46 : f32 to vector<8x32xf32>
    %160 = arith.addf %159, %158 : vector<8x32xf32>
    %161 = arith.divf %159, %160 : vector<8x32xf32>
    %162 = vector.extract_strided_slice %149 {offsets = [0, 64], sizes = [8, 32], strides = [1, 1]} : vector<8x128xf32> to vector<8x32xf32>
    %163 = math.tanh %162 : vector<8x32xf32>
    %164 = vector.extract_strided_slice %149 {offsets = [0, 96], sizes = [8, 32], strides = [1, 1]} : vector<8x128xf32> to vector<8x32xf32>
    %165 = arith.negf %164 : vector<8x32xf32>
    %166 = math.exp %165 : vector<8x32xf32>
    %cst_47 = arith.constant 1.000000e+00 : f32
    %167 = vector.broadcast %cst_47 : f32 to vector<8x32xf32>
    %168 = arith.addf %167, %166 : vector<8x32xf32>
    %169 = arith.divf %167, %168 : vector<8x32xf32>
    %170 = arith.mulf %161, %140 : vector<8x32xf32>
    %171 = arith.mulf %155, %163 : vector<8x32xf32>
    %172 = arith.addf %170, %171 : vector<8x32xf32>
    %173 = math.tanh %172 : vector<8x32xf32>
    %174 = arith.mulf %169, %173 : vector<8x32xf32>
    %175 = vector.broadcast %c3_i32 : i32 to vector<8x1xi32>
    %176 = arith.cmpi slt, %175, %9 : vector<8x1xi32>
    %177 = vector.shape_cast %176 : vector<8x1xi1> to vector<8x1xi1>
    %178 = vector.broadcast %177 : vector<8x1xi1> to vector<8x32xi1>
    %179 = arith.select %178, %174, %137 : vector<8x32xi1>, vector<8x32xf32>
    %180 = vector.shape_cast %176 : vector<8x1xi1> to vector<8x1xi1>
    %181 = vector.broadcast %180 : vector<8x1xi1> to vector<8x32xi1>
    %182 = arith.select %181, %172, %140 : vector<8x32xi1>, vector<8x32xf32>
    %c4_i32 = arith.constant 4 : i32
    %183 = arith.index_cast %c4_i32 : i32 to index
    %c0_48 = arith.constant 0 : index
    %c0_49 = arith.constant 0 : index
    %184 = vector.load %arg2[%183, %c0_48, %c0_49] : memref<8x8x32xbf16, #tpu.memory_space<vmem>>, vector<1x8x32xbf16>
    %185 = vector.shape_cast %184 : vector<1x8x32xbf16> to vector<8x32xbf16>
    %cst_50 = arith.constant dense<0.000000e+00> : vector<8x128xf32>
    %186 = tpu.matmul %185, %0, %cst_50 {dimension_numbers = #tpu.dot_dimension_numbers<[1], [0], [0], [1], [0, 0, 1, 1], [], []>} : vector<8x32xbf16>, vector<32x128xbf16>, vector<8x128xf32> -> vector<8x128xf32>
    %187 = arith.truncf %179 : vector<8x32xf32> to vector<8x32xbf16>
    %cst_51 = arith.constant dense<0.000000e+00> : vector<8x128xf32>
    %188 = tpu.matmul %187, %1, %cst_51 {dimension_numbers = #tpu.dot_dimension_numbers<[1], [0], [0], [1], [0, 0, 1, 1], [], []>} : vector<8x32xbf16>, vector<32x128xbf16>, vector<8x128xf32> -> vector<8x128xf32>
    %189 = arith.addf %186, %188 : vector<8x128xf32>
    %190 = vector.broadcast %2 : vector<1x128xf32> to vector<8x128xf32>
    %191 = arith.addf %189, %190 : vector<8x128xf32>
    %192 = vector.extract_strided_slice %191 {offsets = [0, 0], sizes = [8, 32], strides = [1, 1]} : vector<8x128xf32> to vector<8x32xf32>
    %193 = arith.negf %192 : vector<8x32xf32>
    %194 = math.exp %193 : vector<8x32xf32>
    %cst_52 = arith.constant 1.000000e+00 : f32
    %195 = vector.broadcast %cst_52 : f32 to vector<8x32xf32>
    %196 = arith.addf %195, %194 : vector<8x32xf32>
    %197 = arith.divf %195, %196 : vector<8x32xf32>
    %198 = vector.extract_strided_slice %191 {offsets = [0, 32], sizes = [8, 32], strides = [1, 1]} : vector<8x128xf32> to vector<8x32xf32>
    %199 = arith.negf %198 : vector<8x32xf32>
    %200 = math.exp %199 : vector<8x32xf32>
    %cst_53 = arith.constant 1.000000e+00 : f32
    %201 = vector.broadcast %cst_53 : f32 to vector<8x32xf32>
    %202 = arith.addf %201, %200 : vector<8x32xf32>
    %203 = arith.divf %201, %202 : vector<8x32xf32>
    %204 = vector.extract_strided_slice %191 {offsets = [0, 64], sizes = [8, 32], strides = [1, 1]} : vector<8x128xf32> to vector<8x32xf32>
    %205 = math.tanh %204 : vector<8x32xf32>
    %206 = vector.extract_strided_slice %191 {offsets = [0, 96], sizes = [8, 32], strides = [1, 1]} : vector<8x128xf32> to vector<8x32xf32>
    %207 = arith.negf %206 : vector<8x32xf32>
    %208 = math.exp %207 : vector<8x32xf32>
    %cst_54 = arith.constant 1.000000e+00 : f32
    %209 = vector.broadcast %cst_54 : f32 to vector<8x32xf32>
    %210 = arith.addf %209, %208 : vector<8x32xf32>
    %211 = arith.divf %209, %210 : vector<8x32xf32>
    %212 = arith.mulf %203, %182 : vector<8x32xf32>
    %213 = arith.mulf %197, %205 : vector<8x32xf32>
    %214 = arith.addf %212, %213 : vector<8x32xf32>
    %215 = math.tanh %214 : vector<8x32xf32>
    %216 = arith.mulf %211, %215 : vector<8x32xf32>
    %217 = vector.broadcast %c4_i32 : i32 to vector<8x1xi32>
    %218 = arith.cmpi slt, %217, %9 : vector<8x1xi32>
    %219 = vector.shape_cast %218 : vector<8x1xi1> to vector<8x1xi1>
    %220 = vector.broadcast %219 : vector<8x1xi1> to vector<8x32xi1>
    %221 = arith.select %220, %216, %179 : vector<8x32xi1>, vector<8x32xf32>
    %222 = vector.shape_cast %218 : vector<8x1xi1> to vector<8x1xi1>
    %223 = vector.broadcast %222 : vector<8x1xi1> to vector<8x32xi1>
    %224 = arith.select %223, %214, %182 : vector<8x32xi1>, vector<8x32xf32>
    %c5_i32 = arith.constant 5 : i32
    %225 = arith.index_cast %c5_i32 : i32 to index
    %c0_55 = arith.constant 0 : index
    %c0_56 = arith.constant 0 : index
    %226 = vector.load %arg2[%225, %c0_55, %c0_56] : memref<8x8x32xbf16, #tpu.memory_space<vmem>>, vector<1x8x32xbf16>
    %227 = vector.shape_cast %226 : vector<1x8x32xbf16> to vector<8x32xbf16>
    %cst_57 = arith.constant dense<0.000000e+00> : vector<8x128xf32>
    %228 = tpu.matmul %227, %0, %cst_57 {dimension_numbers = #tpu.dot_dimension_numbers<[1], [0], [0], [1], [0, 0, 1, 1], [], []>} : vector<8x32xbf16>, vector<32x128xbf16>, vector<8x128xf32> -> vector<8x128xf32>
    %229 = arith.truncf %221 : vector<8x32xf32> to vector<8x32xbf16>
    %cst_58 = arith.constant dense<0.000000e+00> : vector<8x128xf32>
    %230 = tpu.matmul %229, %1, %cst_58 {dimension_numbers = #tpu.dot_dimension_numbers<[1], [0], [0], [1], [0, 0, 1, 1], [], []>} : vector<8x32xbf16>, vector<32x128xbf16>, vector<8x128xf32> -> vector<8x128xf32>
    %231 = arith.addf %228, %230 : vector<8x128xf32>
    %232 = vector.broadcast %2 : vector<1x128xf32> to vector<8x128xf32>
    %233 = arith.addf %231, %232 : vector<8x128xf32>
    %234 = vector.extract_strided_slice %233 {offsets = [0, 0], sizes = [8, 32], strides = [1, 1]} : vector<8x128xf32> to vector<8x32xf32>
    %235 = arith.negf %234 : vector<8x32xf32>
    %236 = math.exp %235 : vector<8x32xf32>
    %cst_59 = arith.constant 1.000000e+00 : f32
    %237 = vector.broadcast %cst_59 : f32 to vector<8x32xf32>
    %238 = arith.addf %237, %236 : vector<8x32xf32>
    %239 = arith.divf %237, %238 : vector<8x32xf32>
    %240 = vector.extract_strided_slice %233 {offsets = [0, 32], sizes = [8, 32], strides = [1, 1]} : vector<8x128xf32> to vector<8x32xf32>
    %241 = arith.negf %240 : vector<8x32xf32>
    %242 = math.exp %241 : vector<8x32xf32>
    %cst_60 = arith.constant 1.000000e+00 : f32
    %243 = vector.broadcast %cst_60 : f32 to vector<8x32xf32>
    %244 = arith.addf %243, %242 : vector<8x32xf32>
    %245 = arith.divf %243, %244 : vector<8x32xf32>
    %246 = vector.extract_strided_slice %233 {offsets = [0, 64], sizes = [8, 32], strides = [1, 1]} : vector<8x128xf32> to vector<8x32xf32>
    %247 = math.tanh %246 : vector<8x32xf32>
    %248 = vector.extract_strided_slice %233 {offsets = [0, 96], sizes = [8, 32], strides = [1, 1]} : vector<8x128xf32> to vector<8x32xf32>
    %249 = arith.negf %248 : vector<8x32xf32>
    %250 = math.exp %249 : vector<8x32xf32>
    %cst_61 = arith.constant 1.000000e+00 : f32
    %251 = vector.broadcast %cst_61 : f32 to vector<8x32xf32>
    %252 = arith.addf %251, %250 : vector<8x32xf32>
    %253 = arith.divf %251, %252 : vector<8x32xf32>
    %254 = arith.mulf %245, %224 : vector<8x32xf32>
    %255 = arith.mulf %239, %247 : vector<8x32xf32>
    %256 = arith.addf %254, %255 : vector<8x32xf32>
    %257 = math.tanh %256 : vector<8x32xf32>
    %258 = arith.mulf %253, %257 : vector<8x32xf32>
    %259 = vector.broadcast %c5_i32 : i32 to vector<8x1xi32>
    %260 = arith.cmpi slt, %259, %9 : vector<8x1xi32>
    %261 = vector.shape_cast %260 : vector<8x1xi1> to vector<8x1xi1>
    %262 = vector.broadcast %261 : vector<8x1xi1> to vector<8x32xi1>
    %263 = arith.select %262, %258, %221 : vector<8x32xi1>, vector<8x32xf32>
    %264 = vector.shape_cast %260 : vector<8x1xi1> to vector<8x1xi1>
    %265 = vector.broadcast %264 : vector<8x1xi1> to vector<8x32xi1>
    %266 = arith.select %265, %256, %224 : vector<8x32xi1>, vector<8x32xf32>
    %c6_i32 = arith.constant 6 : i32
    %267 = arith.index_cast %c6_i32 : i32 to index
    %c0_62 = arith.constant 0 : index
    %c0_63 = arith.constant 0 : index
    %268 = vector.load %arg2[%267, %c0_62, %c0_63] : memref<8x8x32xbf16, #tpu.memory_space<vmem>>, vector<1x8x32xbf16>
    %269 = vector.shape_cast %268 : vector<1x8x32xbf16> to vector<8x32xbf16>
    %cst_64 = arith.constant dense<0.000000e+00> : vector<8x128xf32>
    %270 = tpu.matmul %269, %0, %cst_64 {dimension_numbers = #tpu.dot_dimension_numbers<[1], [0], [0], [1], [0, 0, 1, 1], [], []>} : vector<8x32xbf16>, vector<32x128xbf16>, vector<8x128xf32> -> vector<8x128xf32>
    %271 = arith.truncf %263 : vector<8x32xf32> to vector<8x32xbf16>
    %cst_65 = arith.constant dense<0.000000e+00> : vector<8x128xf32>
    %272 = tpu.matmul %271, %1, %cst_65 {dimension_numbers = #tpu.dot_dimension_numbers<[1], [0], [0], [1], [0, 0, 1, 1], [], []>} : vector<8x32xbf16>, vector<32x128xbf16>, vector<8x128xf32> -> vector<8x128xf32>
    %273 = arith.addf %270, %272 : vector<8x128xf32>
    %274 = vector.broadcast %2 : vector<1x128xf32> to vector<8x128xf32>
    %275 = arith.addf %273, %274 : vector<8x128xf32>
    %276 = vector.extract_strided_slice %275 {offsets = [0, 0], sizes = [8, 32], strides = [1, 1]} : vector<8x128xf32> to vector<8x32xf32>
    %277 = arith.negf %276 : vector<8x32xf32>
    %278 = math.exp %277 : vector<8x32xf32>
    %cst_66 = arith.constant 1.000000e+00 : f32
    %279 = vector.broadcast %cst_66 : f32 to vector<8x32xf32>
    %280 = arith.addf %279, %278 : vector<8x32xf32>
    %281 = arith.divf %279, %280 : vector<8x32xf32>
    %282 = vector.extract_strided_slice %275 {offsets = [0, 32], sizes = [8, 32], strides = [1, 1]} : vector<8x128xf32> to vector<8x32xf32>
    %283 = arith.negf %282 : vector<8x32xf32>
    %284 = math.exp %283 : vector<8x32xf32>
    %cst_67 = arith.constant 1.000000e+00 : f32
    %285 = vector.broadcast %cst_67 : f32 to vector<8x32xf32>
    %286 = arith.addf %285, %284 : vector<8x32xf32>
    %287 = arith.divf %285, %286 : vector<8x32xf32>
    %288 = vector.extract_strided_slice %275 {offsets = [0, 64], sizes = [8, 32], strides = [1, 1]} : vector<8x128xf32> to vector<8x32xf32>
    %289 = math.tanh %288 : vector<8x32xf32>
    %290 = vector.extract_strided_slice %275 {offsets = [0, 96], sizes = [8, 32], strides = [1, 1]} : vector<8x128xf32> to vector<8x32xf32>
    %291 = arith.negf %290 : vector<8x32xf32>
    %292 = math.exp %291 : vector<8x32xf32>
    %cst_68 = arith.constant 1.000000e+00 : f32
    %293 = vector.broadcast %cst_68 : f32 to vector<8x32xf32>
    %294 = arith.addf %293, %292 : vector<8x32xf32>
    %295 = arith.divf %293, %294 : vector<8x32xf32>
    %296 = arith.mulf %287, %266 : vector<8x32xf32>
    %297 = arith.mulf %281, %289 : vector<8x32xf32>
    %298 = arith.addf %296, %297 : vector<8x32xf32>
    %299 = math.tanh %298 : vector<8x32xf32>
    %300 = arith.mulf %295, %299 : vector<8x32xf32>
    %301 = vector.broadcast %c6_i32 : i32 to vector<8x1xi32>
    %302 = arith.cmpi slt, %301, %9 : vector<8x1xi32>
    %303 = vector.shape_cast %302 : vector<8x1xi1> to vector<8x1xi1>
    %304 = vector.broadcast %303 : vector<8x1xi1> to vector<8x32xi1>
    %305 = arith.select %304, %300, %263 : vector<8x32xi1>, vector<8x32xf32>
    %306 = vector.shape_cast %302 : vector<8x1xi1> to vector<8x1xi1>
    %307 = vector.broadcast %306 : vector<8x1xi1> to vector<8x32xi1>
    %308 = arith.select %307, %298, %266 : vector<8x32xi1>, vector<8x32xf32>
    %c7_i32 = arith.constant 7 : i32
    %309 = arith.index_cast %c7_i32 : i32 to index
    %c0_69 = arith.constant 0 : index
    %c0_70 = arith.constant 0 : index
    %310 = vector.load %arg2[%309, %c0_69, %c0_70] : memref<8x8x32xbf16, #tpu.memory_space<vmem>>, vector<1x8x32xbf16>
    %311 = vector.shape_cast %310 : vector<1x8x32xbf16> to vector<8x32xbf16>
    %cst_71 = arith.constant dense<0.000000e+00> : vector<8x128xf32>
    %312 = tpu.matmul %311, %0, %cst_71 {dimension_numbers = #tpu.dot_dimension_numbers<[1], [0], [0], [1], [0, 0, 1, 1], [], []>} : vector<8x32xbf16>, vector<32x128xbf16>, vector<8x128xf32> -> vector<8x128xf32>
    %313 = arith.truncf %305 : vector<8x32xf32> to vector<8x32xbf16>
    %cst_72 = arith.constant dense<0.000000e+00> : vector<8x128xf32>
    %314 = tpu.matmul %313, %1, %cst_72 {dimension_numbers = #tpu.dot_dimension_numbers<[1], [0], [0], [1], [0, 0, 1, 1], [], []>} : vector<8x32xbf16>, vector<32x128xbf16>, vector<8x128xf32> -> vector<8x128xf32>
    %315 = arith.addf %312, %314 : vector<8x128xf32>
    %316 = vector.broadcast %2 : vector<1x128xf32> to vector<8x128xf32>
    %317 = arith.addf %315, %316 : vector<8x128xf32>
    %318 = vector.extract_strided_slice %317 {offsets = [0, 0], sizes = [8, 32], strides = [1, 1]} : vector<8x128xf32> to vector<8x32xf32>
    %319 = arith.negf %318 : vector<8x32xf32>
    %320 = math.exp %319 : vector<8x32xf32>
    %cst_73 = arith.constant 1.000000e+00 : f32
    %321 = vector.broadcast %cst_73 : f32 to vector<8x32xf32>
    %322 = arith.addf %321, %320 : vector<8x32xf32>
    %323 = arith.divf %321, %322 : vector<8x32xf32>
    %324 = vector.extract_strided_slice %317 {offsets = [0, 32], sizes = [8, 32], strides = [1, 1]} : vector<8x128xf32> to vector<8x32xf32>
    %325 = arith.negf %324 : vector<8x32xf32>
    %326 = math.exp %325 : vector<8x32xf32>
    %cst_74 = arith.constant 1.000000e+00 : f32
    %327 = vector.broadcast %cst_74 : f32 to vector<8x32xf32>
    %328 = arith.addf %327, %326 : vector<8x32xf32>
    %329 = arith.divf %327, %328 : vector<8x32xf32>
    %330 = vector.extract_strided_slice %317 {offsets = [0, 64], sizes = [8, 32], strides = [1, 1]} : vector<8x128xf32> to vector<8x32xf32>
    %331 = math.tanh %330 : vector<8x32xf32>
    %332 = vector.extract_strided_slice %317 {offsets = [0, 96], sizes = [8, 32], strides = [1, 1]} : vector<8x128xf32> to vector<8x32xf32>
    %333 = arith.negf %332 : vector<8x32xf32>
    %334 = math.exp %333 : vector<8x32xf32>
    %cst_75 = arith.constant 1.000000e+00 : f32
    %335 = vector.broadcast %cst_75 : f32 to vector<8x32xf32>
    %336 = arith.addf %335, %334 : vector<8x32xf32>
    %337 = arith.divf %335, %336 : vector<8x32xf32>
    %338 = arith.mulf %329, %308 : vector<8x32xf32>
    %339 = arith.mulf %323, %331 : vector<8x32xf32>
    %340 = arith.addf %338, %339 : vector<8x32xf32>
    %341 = math.tanh %340 : vector<8x32xf32>
    %342 = arith.mulf %337, %341 : vector<8x32xf32>
    %343 = vector.broadcast %c7_i32 : i32 to vector<8x1xi32>
    %344 = arith.cmpi slt, %343, %9 : vector<8x1xi32>
    %345 = vector.shape_cast %344 : vector<8x1xi1> to vector<8x1xi1>
    %346 = vector.broadcast %345 : vector<8x1xi1> to vector<8x32xi1>
    %347 = arith.select %346, %342, %305 : vector<8x32xi1>, vector<8x32xf32>
    %348 = vector.shape_cast %344 : vector<8x1xi1> to vector<8x1xi1>
    %349 = vector.broadcast %348 : vector<8x1xi1> to vector<8x32xi1>
    %350 = arith.select %349, %340, %308 : vector<8x32xi1>, vector<8x32xf32>
    %c8_i32 = arith.constant 8 : i32
    %c0_76 = arith.constant 0 : index
    %c0_77 = arith.constant 0 : index
    %351 = vector.load %arg3[%c0_76, %c0_77] : memref<1x32xbf16, #tpu.memory_space<vmem>>, vector<1x32xbf16>
    %352 = vector.shape_cast %351 : vector<1x32xbf16> to vector<1x32xbf16>
    %353 = vector.broadcast %352 : vector<1x32xbf16> to vector<8x32xbf16>
    %cst_78 = arith.constant 0.000000e+00 : f32
    %354 = vector.broadcast %cst_78 : f32 to vector<8x32xf32>
    %c0_i32_79 = arith.constant 0 : i32
    %cst_80 = arith.constant dense<0.000000e+00> : vector<8x128xf32>
    %355 = tpu.matmul %353, %3, %cst_80 {dimension_numbers = #tpu.dot_dimension_numbers<[1], [0], [0], [1], [0, 0, 1, 1], [], []>} : vector<8x32xbf16>, vector<32x128xbf16>, vector<8x128xf32> -> vector<8x128xf32>
    %356 = arith.truncf %347 : vector<8x32xf32> to vector<8x32xbf16>
    %cst_81 = arith.constant dense<0.000000e+00> : vector<8x128xf32>
    %357 = tpu.matmul %356, %4, %cst_81 {dimension_numbers = #tpu.dot_dimension_numbers<[1], [0], [0], [1], [0, 0, 1, 1], [], []>} : vector<8x32xbf16>, vector<32x128xbf16>, vector<8x128xf32> -> vector<8x128xf32>
    %358 = arith.addf %355, %357 : vector<8x128xf32>
    %359 = vector.broadcast %5 : vector<1x128xf32> to vector<8x128xf32>
    %360 = arith.addf %358, %359 : vector<8x128xf32>
    %361 = vector.extract_strided_slice %360 {offsets = [0, 0], sizes = [8, 32], strides = [1, 1]} : vector<8x128xf32> to vector<8x32xf32>
    %362 = arith.negf %361 : vector<8x32xf32>
    %363 = math.exp %362 : vector<8x32xf32>
    %cst_82 = arith.constant 1.000000e+00 : f32
    %364 = vector.broadcast %cst_82 : f32 to vector<8x32xf32>
    %365 = arith.addf %364, %363 : vector<8x32xf32>
    %366 = arith.divf %364, %365 : vector<8x32xf32>
    %367 = vector.extract_strided_slice %360 {offsets = [0, 32], sizes = [8, 32], strides = [1, 1]} : vector<8x128xf32> to vector<8x32xf32>
    %368 = arith.negf %367 : vector<8x32xf32>
    %369 = math.exp %368 : vector<8x32xf32>
    %cst_83 = arith.constant 1.000000e+00 : f32
    %370 = vector.broadcast %cst_83 : f32 to vector<8x32xf32>
    %371 = arith.addf %370, %369 : vector<8x32xf32>
    %372 = arith.divf %370, %371 : vector<8x32xf32>
    %373 = vector.extract_strided_slice %360 {offsets = [0, 64], sizes = [8, 32], strides = [1, 1]} : vector<8x128xf32> to vector<8x32xf32>
    %374 = math.tanh %373 : vector<8x32xf32>
    %375 = vector.extract_strided_slice %360 {offsets = [0, 96], sizes = [8, 32], strides = [1, 1]} : vector<8x128xf32> to vector<8x32xf32>
    %376 = arith.negf %375 : vector<8x32xf32>
    %377 = math.exp %376 : vector<8x32xf32>
    %cst_84 = arith.constant 1.000000e+00 : f32
    %378 = vector.broadcast %cst_84 : f32 to vector<8x32xf32>
    %379 = arith.addf %378, %377 : vector<8x32xf32>
    %380 = arith.divf %378, %379 : vector<8x32xf32>
    %381 = arith.mulf %372, %354 : vector<8x32xf32>
    %382 = arith.mulf %366, %374 : vector<8x32xf32>
    %383 = arith.addf %381, %382 : vector<8x32xf32>
    %384 = math.tanh %383 : vector<8x32xf32>
    %385 = arith.mulf %380, %384 : vector<8x32xf32>
    %386 = arith.truncf %385 : vector<8x32xf32> to vector<8x32xbf16>
    %cst_85 = arith.constant dense<0.000000e+00> : vector<8x128xf32>
    %387 = tpu.matmul %386, %6, %cst_85 {dimension_numbers = #tpu.dot_dimension_numbers<[1], [0], [0], [1], [0, 0, 1, 1], [], []>} : vector<8x32xbf16>, vector<32x128xbf16>, vector<8x128xf32> -> vector<8x128xf32>
    %388 = vector.broadcast %7 : vector<1x128xf32> to vector<8x128xf32>
    %389 = arith.addf %387, %388 : vector<8x128xf32>
    %390 = arith.index_cast %c0_i32_79 : i32 to index
    %c0_86 = arith.constant 0 : index
    %c0_87 = arith.constant 0 : index
    %391 = vector.load %arg13[%390, %c0_86, %c0_87] : memref<7x8x128xf32, #tpu.memory_space<vmem>>, vector<1x8x128xf32>
    %392 = vector.shape_cast %391 : vector<1x8x128xf32> to vector<8x128xf32>
    %393 = vector.shape_cast %389 : vector<8x128xf32> to vector<1x8x128xf32>
    tpu.vector_store %arg13[%390, %c0_86, %c0_87], %393 {strides = array<i32>} : memref<7x8x128xf32, #tpu.memory_space<vmem>>, vector<1x8x128xf32>,
    %394 = arith.index_cast %c0_i32_79 : i32 to index
    %c0_88 = arith.constant 0 : index
    %c0_89 = arith.constant 0 : index
    %395 = vector.load %arg2[%394, %c0_88, %c0_89] : memref<8x8x32xbf16, #tpu.memory_space<vmem>>, vector<1x8x32xbf16>
    %396 = vector.shape_cast %395 : vector<1x8x32xbf16> to vector<8x32xbf16>
    %c1_i32_90 = arith.constant 1 : i32
    %cst_91 = arith.constant dense<0.000000e+00> : vector<8x128xf32>
    %397 = tpu.matmul %396, %3, %cst_91 {dimension_numbers = #tpu.dot_dimension_numbers<[1], [0], [0], [1], [0, 0, 1, 1], [], []>} : vector<8x32xbf16>, vector<32x128xbf16>, vector<8x128xf32> -> vector<8x128xf32>
    %398 = arith.truncf %385 : vector<8x32xf32> to vector<8x32xbf16>
    %cst_92 = arith.constant dense<0.000000e+00> : vector<8x128xf32>
    %399 = tpu.matmul %398, %4, %cst_92 {dimension_numbers = #tpu.dot_dimension_numbers<[1], [0], [0], [1], [0, 0, 1, 1], [], []>} : vector<8x32xbf16>, vector<32x128xbf16>, vector<8x128xf32> -> vector<8x128xf32>
    %400 = arith.addf %397, %399 : vector<8x128xf32>
    %401 = vector.broadcast %5 : vector<1x128xf32> to vector<8x128xf32>
    %402 = arith.addf %400, %401 : vector<8x128xf32>
    %403 = vector.extract_strided_slice %402 {offsets = [0, 0], sizes = [8, 32], strides = [1, 1]} : vector<8x128xf32> to vector<8x32xf32>
    %404 = arith.negf %403 : vector<8x32xf32>
    %405 = math.exp %404 : vector<8x32xf32>
    %cst_93 = arith.constant 1.000000e+00 : f32
    %406 = vector.broadcast %cst_93 : f32 to vector<8x32xf32>
    %407 = arith.addf %406, %405 : vector<8x32xf32>
    %408 = arith.divf %406, %407 : vector<8x32xf32>
    %409 = vector.extract_strided_slice %402 {offsets = [0, 32], sizes = [8, 32], strides = [1, 1]} : vector<8x128xf32> to vector<8x32xf32>
    %410 = arith.negf %409 : vector<8x32xf32>
    %411 = math.exp %410 : vector<8x32xf32>
    %cst_94 = arith.constant 1.000000e+00 : f32
    %412 = vector.broadcast %cst_94 : f32 to vector<8x32xf32>
    %413 = arith.addf %412, %411 : vector<8x32xf32>
    %414 = arith.divf %412, %413 : vector<8x32xf32>
    %415 = vector.extract_strided_slice %402 {offsets = [0, 64], sizes = [8, 32], strides = [1, 1]} : vector<8x128xf32> to vector<8x32xf32>
    %416 = math.tanh %415 : vector<8x32xf32>
    %417 = vector.extract_strided_slice %402 {offsets = [0, 96], sizes = [8, 32], strides = [1, 1]} : vector<8x128xf32> to vector<8x32xf32>
    %418 = arith.negf %417 : vector<8x32xf32>
    %419 = math.exp %418 : vector<8x32xf32>
    %cst_95 = arith.constant 1.000000e+00 : f32
    %420 = vector.broadcast %cst_95 : f32 to vector<8x32xf32>
    %421 = arith.addf %420, %419 : vector<8x32xf32>
    %422 = arith.divf %420, %421 : vector<8x32xf32>
    %423 = arith.mulf %414, %383 : vector<8x32xf32>
    %424 = arith.mulf %408, %416 : vector<8x32xf32>
    %425 = arith.addf %423, %424 : vector<8x32xf32>
    %426 = math.tanh %425 : vector<8x32xf32>
    %427 = arith.mulf %422, %426 : vector<8x32xf32>
    %428 = arith.truncf %427 : vector<8x32xf32> to vector<8x32xbf16>
    %cst_96 = arith.constant dense<0.000000e+00> : vector<8x128xf32>
    %429 = tpu.matmul %428, %6, %cst_96 {dimension_numbers = #tpu.dot_dimension_numbers<[1], [0], [0], [1], [0, 0, 1, 1], [], []>} : vector<8x32xbf16>, vector<32x128xbf16>, vector<8x128xf32> -> vector<8x128xf32>
    %430 = vector.broadcast %7 : vector<1x128xf32> to vector<8x128xf32>
    %431 = arith.addf %429, %430 : vector<8x128xf32>
    %432 = arith.index_cast %c1_i32_90 : i32 to index
    %c0_97 = arith.constant 0 : index
    %c0_98 = arith.constant 0 : index
    %433 = vector.load %arg13[%432, %c0_97, %c0_98] : memref<7x8x128xf32, #tpu.memory_space<vmem>>, vector<1x8x128xf32>
    %434 = vector.shape_cast %433 : vector<1x8x128xf32> to vector<8x128xf32>
    %435 = vector.shape_cast %431 : vector<8x128xf32> to vector<1x8x128xf32>
    tpu.vector_store %arg13[%432, %c0_97, %c0_98], %435 {strides = array<i32>} : memref<7x8x128xf32, #tpu.memory_space<vmem>>, vector<1x8x128xf32>,
    %436 = arith.index_cast %c1_i32_90 : i32 to index
    %c0_99 = arith.constant 0 : index
    %c0_100 = arith.constant 0 : index
    %437 = vector.load %arg2[%436, %c0_99, %c0_100] : memref<8x8x32xbf16, #tpu.memory_space<vmem>>, vector<1x8x32xbf16>
    %438 = vector.shape_cast %437 : vector<1x8x32xbf16> to vector<8x32xbf16>
    %c2_i32_101 = arith.constant 2 : i32
    %c2_i32_102 = arith.constant 2 : i32
    %cst_103 = arith.constant dense<0.000000e+00> : vector<8x128xf32>
    %439 = tpu.matmul %438, %3, %cst_103 {dimension_numbers = #tpu.dot_dimension_numbers<[1], [0], [0], [1], [0, 0, 1, 1], [], []>} : vector<8x32xbf16>, vector<32x128xbf16>, vector<8x128xf32> -> vector<8x128xf32>
    %440 = arith.truncf %427 : vector<8x32xf32> to vector<8x32xbf16>
    %cst_104 = arith.constant dense<0.000000e+00> : vector<8x128xf32>
    %441 = tpu.matmul %440, %4, %cst_104 {dimension_numbers = #tpu.dot_dimension_numbers<[1], [0], [0], [1], [0, 0, 1, 1], [], []>} : vector<8x32xbf16>, vector<32x128xbf16>, vector<8x128xf32> -> vector<8x128xf32>
    %442 = arith.addf %439, %441 : vector<8x128xf32>
    %443 = vector.broadcast %5 : vector<1x128xf32> to vector<8x128xf32>
    %444 = arith.addf %442, %443 : vector<8x128xf32>
    %445 = vector.extract_strided_slice %444 {offsets = [0, 0], sizes = [8, 32], strides = [1, 1]} : vector<8x128xf32> to vector<8x32xf32>
    %446 = arith.negf %445 : vector<8x32xf32>
    %447 = math.exp %446 : vector<8x32xf32>
    %cst_105 = arith.constant 1.000000e+00 : f32
    %448 = vector.broadcast %cst_105 : f32 to vector<8x32xf32>
    %449 = arith.addf %448, %447 : vector<8x32xf32>
    %450 = arith.divf %448, %449 : vector<8x32xf32>
    %451 = vector.extract_strided_slice %444 {offsets = [0, 32], sizes = [8, 32], strides = [1, 1]} : vector<8x128xf32> to vector<8x32xf32>
    %452 = arith.negf %451 : vector<8x32xf32>
    %453 = math.exp %452 : vector<8x32xf32>
    %cst_106 = arith.constant 1.000000e+00 : f32
    %454 = vector.broadcast %cst_106 : f32 to vector<8x32xf32>
    %455 = arith.addf %454, %453 : vector<8x32xf32>
    %456 = arith.divf %454, %455 : vector<8x32xf32>
    %457 = vector.extract_strided_slice %444 {offsets = [0, 64], sizes = [8, 32], strides = [1, 1]} : vector<8x128xf32> to vector<8x32xf32>
    %458 = math.tanh %457 : vector<8x32xf32>
    %459 = vector.extract_strided_slice %444 {offsets = [0, 96], sizes = [8, 32], strides = [1, 1]} : vector<8x128xf32> to vector<8x32xf32>
    %460 = arith.negf %459 : vector<8x32xf32>
    %461 = math.exp %460 : vector<8x32xf32>
    %cst_107 = arith.constant 1.000000e+00 : f32
    %462 = vector.broadcast %cst_107 : f32 to vector<8x32xf32>
    %463 = arith.addf %462, %461 : vector<8x32xf32>
    %464 = arith.divf %462, %463 : vector<8x32xf32>
    %465 = arith.mulf %456, %425 : vector<8x32xf32>
    %466 = arith.mulf %450, %458 : vector<8x32xf32>
    %467 = arith.addf %465, %466 : vector<8x32xf32>
    %468 = math.tanh %467 : vector<8x32xf32>
    %469 = arith.mulf %464, %468 : vector<8x32xf32>
    %470 = arith.truncf %469 : vector<8x32xf32> to vector<8x32xbf16>
    %cst_108 = arith.constant dense<0.000000e+00> : vector<8x128xf32>
    %471 = tpu.matmul %470, %6, %cst_108 {dimension_numbers = #tpu.dot_dimension_numbers<[1], [0], [0], [1], [0, 0, 1, 1], [], []>} : vector<8x32xbf16>, vector<32x128xbf16>, vector<8x128xf32> -> vector<8x128xf32>
    %472 = vector.broadcast %7 : vector<1x128xf32> to vector<8x128xf32>
    %473 = arith.addf %471, %472 : vector<8x128xf32>
    %474 = arith.index_cast %c2_i32_102 : i32 to index
    %c0_109 = arith.constant 0 : index
    %c0_110 = arith.constant 0 : index
    %475 = vector.load %arg13[%474, %c0_109, %c0_110] : memref<7x8x128xf32, #tpu.memory_space<vmem>>, vector<1x8x128xf32>
    %476 = vector.shape_cast %475 : vector<1x8x128xf32> to vector<8x128xf32>
    %477 = vector.shape_cast %473 : vector<8x128xf32> to vector<1x8x128xf32>
    tpu.vector_store %arg13[%474, %c0_109, %c0_110], %477 {strides = array<i32>} : memref<7x8x128xf32, #tpu.memory_space<vmem>>, vector<1x8x128xf32>,
    %cst_111 = arith.constant -1.000000e+30 : f32
    %478 = vector.broadcast %cst_111 : f32 to vector<8x128xf32>
    %479 = arith.select %12, %473, %478 : vector<8x128xi1>, vector<8x128xf32>
    %cst_112 = arith.constant dense<0xFF800000> : vector<8xf32>
    %480 = vector.multi_reduction <maximumf>, %479, %cst_112 [1] : vector<8x128xf32> to vector<8xf32>
    %481 = vector.shape_cast %480 : vector<8xf32> to vector<8x1xf32>
    %482 = vector.broadcast %481 : vector<8x1xf32> to vector<8x128xf32>
    %483 = arith.cmpf oeq, %479, %482 : vector<8x128xf32>
    %c128_i32 = arith.constant 128 : i32
    %484 = vector.broadcast %c128_i32 : i32 to vector<8x128xi32>
    %485 = arith.select %483, %10, %484 : vector<8x128xi1>, vector<8x128xi32>
    %cst_113 = arith.constant dense<2147483647> : vector<8xi32>
    %486 = vector.multi_reduction <minsi>, %485, %cst_113 [1] : vector<8x128xi32> to vector<8xi32>
    %487 = vector.shape_cast %486 : vector<8xi32> to vector<8x1xi32>
    %488 = vector.broadcast %487 : vector<8x1xi32> to vector<8x128xi32>
    %489 = arith.cmpi eq, %488, %10 : vector<8x128xi32>
    %490 = arith.extui %489 : vector<8x128xi1> to vector<8x128xi32>
    %491 = arith.sitofp %490 : vector<8x128xi32> to vector<8x128xf32>
    %492 = arith.truncf %491 : vector<8x128xf32> to vector<8x128xbf16>
    %cst_114 = arith.constant dense<0.000000e+00> : vector<8x32xf32>
    %493 = tpu.matmul %492, %8, %cst_114 {dimension_numbers = #tpu.dot_dimension_numbers<[1], [0], [0], [1], [0, 0, 1, 1], [], []>} : vector<8x128xbf16>, vector<128x32xbf16>, vector<8x32xf32> -> vector<8x32xf32>
    %494 = arith.truncf %493 : vector<8x32xf32> to vector<8x32xbf16>
    %c3_i32_115 = arith.constant 3 : i32
    %cst_116 = arith.constant dense<0.000000e+00> : vector<8x128xf32>
    %495 = tpu.matmul %494, %3, %cst_116 {dimension_numbers = #tpu.dot_dimension_numbers<[1], [0], [0], [1], [0, 0, 1, 1], [], []>} : vector<8x32xbf16>, vector<32x128xbf16>, vector<8x128xf32> -> vector<8x128xf32>
    %496 = arith.truncf %469 : vector<8x32xf32> to vector<8x32xbf16>
    %cst_117 = arith.constant dense<0.000000e+00> : vector<8x128xf32>
    %497 = tpu.matmul %496, %4, %cst_117 {dimension_numbers = #tpu.dot_dimension_numbers<[1], [0], [0], [1], [0, 0, 1, 1], [], []>} : vector<8x32xbf16>, vector<32x128xbf16>, vector<8x128xf32> -> vector<8x128xf32>
    %498 = arith.addf %495, %497 : vector<8x128xf32>
    %499 = vector.broadcast %5 : vector<1x128xf32> to vector<8x128xf32>
    %500 = arith.addf %498, %499 : vector<8x128xf32>
    %501 = vector.extract_strided_slice %500 {offsets = [0, 0], sizes = [8, 32], strides = [1, 1]} : vector<8x128xf32> to vector<8x32xf32>
    %502 = arith.negf %501 : vector<8x32xf32>
    %503 = math.exp %502 : vector<8x32xf32>
    %cst_118 = arith.constant 1.000000e+00 : f32
    %504 = vector.broadcast %cst_118 : f32 to vector<8x32xf32>
    %505 = arith.addf %504, %503 : vector<8x32xf32>
    %506 = arith.divf %504, %505 : vector<8x32xf32>
    %507 = vector.extract_strided_slice %500 {offsets = [0, 32], sizes = [8, 32], strides = [1, 1]} : vector<8x128xf32> to vector<8x32xf32>
    %508 = arith.negf %507 : vector<8x32xf32>
    %509 = math.exp %508 : vector<8x32xf32>
    %cst_119 = arith.constant 1.000000e+00 : f32
    %510 = vector.broadcast %cst_119 : f32 to vector<8x32xf32>
    %511 = arith.addf %510, %509 : vector<8x32xf32>
    %512 = arith.divf %510, %511 : vector<8x32xf32>
    %513 = vector.extract_strided_slice %500 {offsets = [0, 64], sizes = [8, 32], strides = [1, 1]} : vector<8x128xf32> to vector<8x32xf32>
    %514 = math.tanh %513 : vector<8x32xf32>
    %515 = vector.extract_strided_slice %500 {offsets = [0, 96], sizes = [8, 32], strides = [1, 1]} : vector<8x128xf32> to vector<8x32xf32>
    %516 = arith.negf %515 : vector<8x32xf32>
    %517 = math.exp %516 : vector<8x32xf32>
    %cst_120 = arith.constant 1.000000e+00 : f32
    %518 = vector.broadcast %cst_120 : f32 to vector<8x32xf32>
    %519 = arith.addf %518, %517 : vector<8x32xf32>
    %520 = arith.divf %518, %519 : vector<8x32xf32>
    %521 = arith.mulf %512, %467 : vector<8x32xf32>
    %522 = arith.mulf %506, %514 : vector<8x32xf32>
    %523 = arith.addf %521, %522 : vector<8x32xf32>
    %524 = math.tanh %523 : vector<8x32xf32>
    %525 = arith.mulf %520, %524 : vector<8x32xf32>
    %526 = arith.truncf %525 : vector<8x32xf32> to vector<8x32xbf16>
    %cst_121 = arith.constant dense<0.000000e+00> : vector<8x128xf32>
    %527 = tpu.matmul %526, %6, %cst_121 {dimension_numbers = #tpu.dot_dimension_numbers<[1], [0], [0], [1], [0, 0, 1, 1], [], []>} : vector<8x32xbf16>, vector<32x128xbf16>, vector<8x128xf32> -> vector<8x128xf32>
    %528 = vector.broadcast %7 : vector<1x128xf32> to vector<8x128xf32>
    %529 = arith.addf %527, %528 : vector<8x128xf32>
    %530 = arith.index_cast %c3_i32_115 : i32 to index
    %c0_122 = arith.constant 0 : index
    %c0_123 = arith.constant 0 : index
    %531 = vector.load %arg13[%530, %c0_122, %c0_123] : memref<7x8x128xf32, #tpu.memory_space<vmem>>, vector<1x8x128xf32>
    %532 = vector.shape_cast %531 : vector<1x8x128xf32> to vector<8x128xf32>
    %533 = vector.shape_cast %529 : vector<8x128xf32> to vector<1x8x128xf32>
    tpu.vector_store %arg13[%530, %c0_122, %c0_123], %533 {strides = array<i32>} : memref<7x8x128xf32, #tpu.memory_space<vmem>>, vector<1x8x128xf32>,
    %cst_124 = arith.constant -1.000000e+30 : f32
    %534 = vector.broadcast %cst_124 : f32 to vector<8x128xf32>
    %535 = arith.select %12, %529, %534 : vector<8x128xi1>, vector<8x128xf32>
    %cst_125 = arith.constant dense<0xFF800000> : vector<8xf32>
    %536 = vector.multi_reduction <maximumf>, %535, %cst_125 [1] : vector<8x128xf32> to vector<8xf32>
    %537 = vector.shape_cast %536 : vector<8xf32> to vector<8x1xf32>
    %538 = vector.broadcast %537 : vector<8x1xf32> to vector<8x128xf32>
    %539 = arith.cmpf oeq, %535, %538 : vector<8x128xf32>
    %c128_i32_126 = arith.constant 128 : i32
    %540 = vector.broadcast %c128_i32_126 : i32 to vector<8x128xi32>
    %541 = arith.select %539, %10, %540 : vector<8x128xi1>, vector<8x128xi32>
    %cst_127 = arith.constant dense<2147483647> : vector<8xi32>
    %542 = vector.multi_reduction <minsi>, %541, %cst_127 [1] : vector<8x128xi32> to vector<8xi32>
    %543 = vector.shape_cast %542 : vector<8xi32> to vector<8x1xi32>
    %544 = vector.broadcast %543 : vector<8x1xi32> to vector<8x128xi32>
    %545 = arith.cmpi eq, %544, %10 : vector<8x128xi32>
    %546 = arith.extui %545 : vector<8x128xi1> to vector<8x128xi32>
    %547 = arith.sitofp %546 : vector<8x128xi32> to vector<8x128xf32>
    %548 = arith.truncf %547 : vector<8x128xf32> to vector<8x128xbf16>
    %cst_128 = arith.constant dense<0.000000e+00> : vector<8x32xf32>
    %549 = tpu.matmul %548, %8, %cst_128 {dimension_numbers = #tpu.dot_dimension_numbers<[1], [0], [0], [1], [0, 0, 1, 1], [], []>} : vector<8x128xbf16>, vector<128x32xbf16>, vector<8x32xf32> -> vector<8x32xf32>
    %550 = arith.truncf %549 : vector<8x32xf32> to vector<8x32xbf16>
    %c4_i32_129 = arith.constant 4 : i32
    %cst_130 = arith.constant dense<0.000000e+00> : vector<8x128xf32>
    %551 = tpu.matmul %550, %3, %cst_130 {dimension_numbers = #tpu.dot_dimension_numbers<[1], [0], [0], [1], [0, 0, 1, 1], [], []>} : vector<8x32xbf16>, vector<32x128xbf16>, vector<8x128xf32> -> vector<8x128xf32>
    %552 = arith.truncf %525 : vector<8x32xf32> to vector<8x32xbf16>
    %cst_131 = arith.constant dense<0.000000e+00> : vector<8x128xf32>
    %553 = tpu.matmul %552, %4, %cst_131 {dimension_numbers = #tpu.dot_dimension_numbers<[1], [0], [0], [1], [0, 0, 1, 1], [], []>} : vector<8x32xbf16>, vector<32x128xbf16>, vector<8x128xf32> -> vector<8x128xf32>
    %554 = arith.addf %551, %553 : vector<8x128xf32>
    %555 = vector.broadcast %5 : vector<1x128xf32> to vector<8x128xf32>
    %556 = arith.addf %554, %555 : vector<8x128xf32>
    %557 = vector.extract_strided_slice %556 {offsets = [0, 0], sizes = [8, 32], strides = [1, 1]} : vector<8x128xf32> to vector<8x32xf32>
    %558 = arith.negf %557 : vector<8x32xf32>
    %559 = math.exp %558 : vector<8x32xf32>
    %cst_132 = arith.constant 1.000000e+00 : f32
    %560 = vector.broadcast %cst_132 : f32 to vector<8x32xf32>
    %561 = arith.addf %560, %559 : vector<8x32xf32>
    %562 = arith.divf %560, %561 : vector<8x32xf32>
    %563 = vector.extract_strided_slice %556 {offsets = [0, 32], sizes = [8, 32], strides = [1, 1]} : vector<8x128xf32> to vector<8x32xf32>
    %564 = arith.negf %563 : vector<8x32xf32>
    %565 = math.exp %564 : vector<8x32xf32>
    %cst_133 = arith.constant 1.000000e+00 : f32
    %566 = vector.broadcast %cst_133 : f32 to vector<8x32xf32>
    %567 = arith.addf %566, %565 : vector<8x32xf32>
    %568 = arith.divf %566, %567 : vector<8x32xf32>
    %569 = vector.extract_strided_slice %556 {offsets = [0, 64], sizes = [8, 32], strides = [1, 1]} : vector<8x128xf32> to vector<8x32xf32>
    %570 = math.tanh %569 : vector<8x32xf32>
    %571 = vector.extract_strided_slice %556 {offsets = [0, 96], sizes = [8, 32], strides = [1, 1]} : vector<8x128xf32> to vector<8x32xf32>
    %572 = arith.negf %571 : vector<8x32xf32>
    %573 = math.exp %572 : vector<8x32xf32>
    %cst_134 = arith.constant 1.000000e+00 : f32
    %574 = vector.broadcast %cst_134 : f32 to vector<8x32xf32>
    %575 = arith.addf %574, %573 : vector<8x32xf32>
    %576 = arith.divf %574, %575 : vector<8x32xf32>
    %577 = arith.mulf %568, %523 : vector<8x32xf32>
    %578 = arith.mulf %562, %570 : vector<8x32xf32>
    %579 = arith.addf %577, %578 : vector<8x32xf32>
    %580 = math.tanh %579 : vector<8x32xf32>
    %581 = arith.mulf %576, %580 : vector<8x32xf32>
    %582 = arith.truncf %581 : vector<8x32xf32> to vector<8x32xbf16>
    %cst_135 = arith.constant dense<0.000000e+00> : vector<8x128xf32>
    %583 = tpu.matmul %582, %6, %cst_135 {dimension_numbers = #tpu.dot_dimension_numbers<[1], [0], [0], [1], [0, 0, 1, 1], [], []>} : vector<8x32xbf16>, vector<32x128xbf16>, vector<8x128xf32> -> vector<8x128xf32>
    %584 = vector.broadcast %7 : vector<1x128xf32> to vector<8x128xf32>
    %585 = arith.addf %583, %584 : vector<8x128xf32>
    %586 = arith.index_cast %c4_i32_129 : i32 to index
    %c0_136 = arith.constant 0 : index
    %c0_137 = arith.constant 0 : index
    %587 = vector.load %arg13[%586, %c0_136, %c0_137] : memref<7x8x128xf32, #tpu.memory_space<vmem>>, vector<1x8x128xf32>
    %588 = vector.shape_cast %587 : vector<1x8x128xf32> to vector<8x128xf32>
    %589 = vector.shape_cast %585 : vector<8x128xf32> to vector<1x8x128xf32>
    tpu.vector_store %arg13[%586, %c0_136, %c0_137], %589 {strides = array<i32>} : memref<7x8x128xf32, #tpu.memory_space<vmem>>, vector<1x8x128xf32>,
    %cst_138 = arith.constant -1.000000e+30 : f32
    %590 = vector.broadcast %cst_138 : f32 to vector<8x128xf32>
    %591 = arith.select %12, %585, %590 : vector<8x128xi1>, vector<8x128xf32>
    %cst_139 = arith.constant dense<0xFF800000> : vector<8xf32>
    %592 = vector.multi_reduction <maximumf>, %591, %cst_139 [1] : vector<8x128xf32> to vector<8xf32>
    %593 = vector.shape_cast %592 : vector<8xf32> to vector<8x1xf32>
    %594 = vector.broadcast %593 : vector<8x1xf32> to vector<8x128xf32>
    %595 = arith.cmpf oeq, %591, %594 : vector<8x128xf32>
    %c128_i32_140 = arith.constant 128 : i32
    %596 = vector.broadcast %c128_i32_140 : i32 to vector<8x128xi32>
    %597 = arith.select %595, %10, %596 : vector<8x128xi1>, vector<8x128xi32>
    %cst_141 = arith.constant dense<2147483647> : vector<8xi32>
    %598 = vector.multi_reduction <minsi>, %597, %cst_141 [1] : vector<8x128xi32> to vector<8xi32>
    %599 = vector.shape_cast %598 : vector<8xi32> to vector<8x1xi32>
    %600 = vector.broadcast %599 : vector<8x1xi32> to vector<8x128xi32>
    %601 = arith.cmpi eq, %600, %10 : vector<8x128xi32>
    %602 = arith.extui %601 : vector<8x128xi1> to vector<8x128xi32>
    %603 = arith.sitofp %602 : vector<8x128xi32> to vector<8x128xf32>
    %604 = arith.truncf %603 : vector<8x128xf32> to vector<8x128xbf16>
    %cst_142 = arith.constant dense<0.000000e+00> : vector<8x32xf32>
    %605 = tpu.matmul %604, %8, %cst_142 {dimension_numbers = #tpu.dot_dimension_numbers<[1], [0], [0], [1], [0, 0, 1, 1], [], []>} : vector<8x128xbf16>, vector<128x32xbf16>, vector<8x32xf32> -> vector<8x32xf32>
    %606 = arith.truncf %605 : vector<8x32xf32> to vector<8x32xbf16>
    %c5_i32_143 = arith.constant 5 : i32
    %cst_144 = arith.constant dense<0.000000e+00> : vector<8x128xf32>
    %607 = tpu.matmul %606, %3, %cst_144 {dimension_numbers = #tpu.dot_dimension_numbers<[1], [0], [0], [1], [0, 0, 1, 1], [], []>} : vector<8x32xbf16>, vector<32x128xbf16>, vector<8x128xf32> -> vector<8x128xf32>
    %608 = arith.truncf %581 : vector<8x32xf32> to vector<8x32xbf16>
    %cst_145 = arith.constant dense<0.000000e+00> : vector<8x128xf32>
    %609 = tpu.matmul %608, %4, %cst_145 {dimension_numbers = #tpu.dot_dimension_numbers<[1], [0], [0], [1], [0, 0, 1, 1], [], []>} : vector<8x32xbf16>, vector<32x128xbf16>, vector<8x128xf32> -> vector<8x128xf32>
    %610 = arith.addf %607, %609 : vector<8x128xf32>
    %611 = vector.broadcast %5 : vector<1x128xf32> to vector<8x128xf32>
    %612 = arith.addf %610, %611 : vector<8x128xf32>
    %613 = vector.extract_strided_slice %612 {offsets = [0, 0], sizes = [8, 32], strides = [1, 1]} : vector<8x128xf32> to vector<8x32xf32>
    %614 = arith.negf %613 : vector<8x32xf32>
    %615 = math.exp %614 : vector<8x32xf32>
    %cst_146 = arith.constant 1.000000e+00 : f32
    %616 = vector.broadcast %cst_146 : f32 to vector<8x32xf32>
    %617 = arith.addf %616, %615 : vector<8x32xf32>
    %618 = arith.divf %616, %617 : vector<8x32xf32>
    %619 = vector.extract_strided_slice %612 {offsets = [0, 32], sizes = [8, 32], strides = [1, 1]} : vector<8x128xf32> to vector<8x32xf32>
    %620 = arith.negf %619 : vector<8x32xf32>
    %621 = math.exp %620 : vector<8x32xf32>
    %cst_147 = arith.constant 1.000000e+00 : f32
    %622 = vector.broadcast %cst_147 : f32 to vector<8x32xf32>
    %623 = arith.addf %622, %621 : vector<8x32xf32>
    %624 = arith.divf %622, %623 : vector<8x32xf32>
    %625 = vector.extract_strided_slice %612 {offsets = [0, 64], sizes = [8, 32], strides = [1, 1]} : vector<8x128xf32> to vector<8x32xf32>
    %626 = math.tanh %625 : vector<8x32xf32>
    %627 = vector.extract_strided_slice %612 {offsets = [0, 96], sizes = [8, 32], strides = [1, 1]} : vector<8x128xf32> to vector<8x32xf32>
    %628 = arith.negf %627 : vector<8x32xf32>
    %629 = math.exp %628 : vector<8x32xf32>
    %cst_148 = arith.constant 1.000000e+00 : f32
    %630 = vector.broadcast %cst_148 : f32 to vector<8x32xf32>
    %631 = arith.addf %630, %629 : vector<8x32xf32>
    %632 = arith.divf %630, %631 : vector<8x32xf32>
    %633 = arith.mulf %624, %579 : vector<8x32xf32>
    %634 = arith.mulf %618, %626 : vector<8x32xf32>
    %635 = arith.addf %633, %634 : vector<8x32xf32>
    %636 = math.tanh %635 : vector<8x32xf32>
    %637 = arith.mulf %632, %636 : vector<8x32xf32>
    %638 = arith.truncf %637 : vector<8x32xf32> to vector<8x32xbf16>
    %cst_149 = arith.constant dense<0.000000e+00> : vector<8x128xf32>
    %639 = tpu.matmul %638, %6, %cst_149 {dimension_numbers = #tpu.dot_dimension_numbers<[1], [0], [0], [1], [0, 0, 1, 1], [], []>} : vector<8x32xbf16>, vector<32x128xbf16>, vector<8x128xf32> -> vector<8x128xf32>
    %640 = vector.broadcast %7 : vector<1x128xf32> to vector<8x128xf32>
    %641 = arith.addf %639, %640 : vector<8x128xf32>
    %642 = arith.index_cast %c5_i32_143 : i32 to index
    %c0_150 = arith.constant 0 : index
    %c0_151 = arith.constant 0 : index
    %643 = vector.load %arg13[%642, %c0_150, %c0_151] : memref<7x8x128xf32, #tpu.memory_space<vmem>>, vector<1x8x128xf32>
    %644 = vector.shape_cast %643 : vector<1x8x128xf32> to vector<8x128xf32>
    %645 = vector.shape_cast %641 : vector<8x128xf32> to vector<1x8x128xf32>
    tpu.vector_store %arg13[%642, %c0_150, %c0_151], %645 {strides = array<i32>} : memref<7x8x128xf32, #tpu.memory_space<vmem>>, vector<1x8x128xf32>,
    %cst_152 = arith.constant -1.000000e+30 : f32
    %646 = vector.broadcast %cst_152 : f32 to vector<8x128xf32>
    %647 = arith.select %12, %641, %646 : vector<8x128xi1>, vector<8x128xf32>
    %cst_153 = arith.constant dense<0xFF800000> : vector<8xf32>
    %648 = vector.multi_reduction <maximumf>, %647, %cst_153 [1] : vector<8x128xf32> to vector<8xf32>
    %649 = vector.shape_cast %648 : vector<8xf32> to vector<8x1xf32>
    %650 = vector.broadcast %649 : vector<8x1xf32> to vector<8x128xf32>
    %651 = arith.cmpf oeq, %647, %650 : vector<8x128xf32>
    %c128_i32_154 = arith.constant 128 : i32
    %652 = vector.broadcast %c128_i32_154 : i32 to vector<8x128xi32>
    %653 = arith.select %651, %10, %652 : vector<8x128xi1>, vector<8x128xi32>
    %cst_155 = arith.constant dense<2147483647> : vector<8xi32>
    %654 = vector.multi_reduction <minsi>, %653, %cst_155 [1] : vector<8x128xi32> to vector<8xi32>
    %655 = vector.shape_cast %654 : vector<8xi32> to vector<8x1xi32>
    %656 = vector.broadcast %655 : vector<8x1xi32> to vector<8x128xi32>
    %657 = arith.cmpi eq, %656, %10 : vector<8x128xi32>
    %658 = arith.extui %657 : vector<8x128xi1> to vector<8x128xi32>
    %659 = arith.sitofp %658 : vector<8x128xi32> to vector<8x128xf32>
    %660 = arith.truncf %659 : vector<8x128xf32> to vector<8x128xbf16>
    %cst_156 = arith.constant dense<0.000000e+00> : vector<8x32xf32>
    %661 = tpu.matmul %660, %8, %cst_156 {dimension_numbers = #tpu.dot_dimension_numbers<[1], [0], [0], [1], [0, 0, 1, 1], [], []>} : vector<8x128xbf16>, vector<128x32xbf16>, vector<8x32xf32> -> vector<8x32xf32>
    %662 = arith.truncf %661 : vector<8x32xf32> to vector<8x32xbf16>
    %c6_i32_157 = arith.constant 6 : i32
    %cst_158 = arith.constant dense<0.000000e+00> : vector<8x128xf32>
    %663 = tpu.matmul %662, %3, %cst_158 {dimension_numbers = #tpu.dot_dimension_numbers<[1], [0], [0], [1], [0, 0, 1, 1], [], []>} : vector<8x32xbf16>, vector<32x128xbf16>, vector<8x128xf32> -> vector<8x128xf32>
    %664 = arith.truncf %637 : vector<8x32xf32> to vector<8x32xbf16>
    %cst_159 = arith.constant dense<0.000000e+00> : vector<8x128xf32>
    %665 = tpu.matmul %664, %4, %cst_159 {dimension_numbers = #tpu.dot_dimension_numbers<[1], [0], [0], [1], [0, 0, 1, 1], [], []>} : vector<8x32xbf16>, vector<32x128xbf16>, vector<8x128xf32> -> vector<8x128xf32>
    %666 = arith.addf %663, %665 : vector<8x128xf32>
    %667 = vector.broadcast %5 : vector<1x128xf32> to vector<8x128xf32>
    %668 = arith.addf %666, %667 : vector<8x128xf32>
    %669 = vector.extract_strided_slice %668 {offsets = [0, 0], sizes = [8, 32], strides = [1, 1]} : vector<8x128xf32> to vector<8x32xf32>
    %670 = arith.negf %669 : vector<8x32xf32>
    %671 = math.exp %670 : vector<8x32xf32>
    %cst_160 = arith.constant 1.000000e+00 : f32
    %672 = vector.broadcast %cst_160 : f32 to vector<8x32xf32>
    %673 = arith.addf %672, %671 : vector<8x32xf32>
    %674 = arith.divf %672, %673 : vector<8x32xf32>
    %675 = vector.extract_strided_slice %668 {offsets = [0, 32], sizes = [8, 32], strides = [1, 1]} : vector<8x128xf32> to vector<8x32xf32>
    %676 = arith.negf %675 : vector<8x32xf32>
    %677 = math.exp %676 : vector<8x32xf32>
    %cst_161 = arith.constant 1.000000e+00 : f32
    %678 = vector.broadcast %cst_161 : f32 to vector<8x32xf32>
    %679 = arith.addf %678, %677 : vector<8x32xf32>
    %680 = arith.divf %678, %679 : vector<8x32xf32>
    %681 = vector.extract_strided_slice %668 {offsets = [0, 64], sizes = [8, 32], strides = [1, 1]} : vector<8x128xf32> to vector<8x32xf32>
    %682 = math.tanh %681 : vector<8x32xf32>
    %683 = vector.extract_strided_slice %668 {offsets = [0, 96], sizes = [8, 32], strides = [1, 1]} : vector<8x128xf32> to vector<8x32xf32>
    %684 = arith.negf %683 : vector<8x32xf32>
    %685 = math.exp %684 : vector<8x32xf32>
    %cst_162 = arith.constant 1.000000e+00 : f32
    %686 = vector.broadcast %cst_162 : f32 to vector<8x32xf32>
    %687 = arith.addf %686, %685 : vector<8x32xf32>
    %688 = arith.divf %686, %687 : vector<8x32xf32>
    %689 = arith.mulf %680, %635 : vector<8x32xf32>
    %690 = arith.mulf %674, %682 : vector<8x32xf32>
    %691 = arith.addf %689, %690 : vector<8x32xf32>
    %692 = math.tanh %691 : vector<8x32xf32>
    %693 = arith.mulf %688, %692 : vector<8x32xf32>
    %694 = arith.truncf %693 : vector<8x32xf32> to vector<8x32xbf16>
    %cst_163 = arith.constant dense<0.000000e+00> : vector<8x128xf32>
    %695 = tpu.matmul %694, %6, %cst_163 {dimension_numbers = #tpu.dot_dimension_numbers<[1], [0], [0], [1], [0, 0, 1, 1], [], []>} : vector<8x32xbf16>, vector<32x128xbf16>, vector<8x128xf32> -> vector<8x128xf32>
    %696 = vector.broadcast %7 : vector<1x128xf32> to vector<8x128xf32>
    %697 = arith.addf %695, %696 : vector<8x128xf32>
    %698 = arith.index_cast %c6_i32_157 : i32 to index
    %c0_164 = arith.constant 0 : index
    %c0_165 = arith.constant 0 : index
    %699 = vector.load %arg13[%698, %c0_164, %c0_165] : memref<7x8x128xf32, #tpu.memory_space<vmem>>, vector<1x8x128xf32>
    %700 = vector.shape_cast %699 : vector<1x8x128xf32> to vector<8x128xf32>
    %701 = vector.shape_cast %697 : vector<8x128xf32> to vector<1x8x128xf32>
    tpu.vector_store %arg13[%698, %c0_164, %c0_165], %701 {strides = array<i32>} : memref<7x8x128xf32, #tpu.memory_space<vmem>>, vector<1x8x128xf32>,
    %cst_166 = arith.constant -1.000000e+30 : f32
    %702 = vector.broadcast %cst_166 : f32 to vector<8x128xf32>
    %703 = arith.select %12, %697, %702 : vector<8x128xi1>, vector<8x128xf32>
    %cst_167 = arith.constant dense<0xFF800000> : vector<8xf32>
    %704 = vector.multi_reduction <maximumf>, %703, %cst_167 [1] : vector<8x128xf32> to vector<8xf32>
    %705 = vector.shape_cast %704 : vector<8xf32> to vector<8x1xf32>
    %706 = vector.broadcast %705 : vector<8x1xf32> to vector<8x128xf32>
    %707 = arith.cmpf oeq, %703, %706 : vector<8x128xf32>
    %c128_i32_168 = arith.constant 128 : i32
    %708 = vector.broadcast %c128_i32_168 : i32 to vector<8x128xi32>
    %709 = arith.select %707, %10, %708 : vector<8x128xi1>, vector<8x128xi32>
    %cst_169 = arith.constant dense<2147483647> : vector<8xi32>
    %710 = vector.multi_reduction <minsi>, %709, %cst_169 [1] : vector<8x128xi32> to vector<8xi32>
    %711 = vector.shape_cast %710 : vector<8xi32> to vector<8x1xi32>
    %712 = vector.broadcast %711 : vector<8x1xi32> to vector<8x128xi32>
    %713 = arith.cmpi eq, %712, %10 : vector<8x128xi32>
    %714 = arith.extui %713 : vector<8x128xi1> to vector<8x128xi32>
    %715 = arith.sitofp %714 : vector<8x128xi32> to vector<8x128xf32>
    %716 = arith.truncf %715 : vector<8x128xf32> to vector<8x128xbf16>
    %cst_170 = arith.constant dense<0.000000e+00> : vector<8x32xf32>
    %717 = tpu.matmul %716, %8, %cst_170 {dimension_numbers = #tpu.dot_dimension_numbers<[1], [0], [0], [1], [0, 0, 1, 1], [], []>} : vector<8x128xbf16>, vector<128x32xbf16>, vector<8x32xf32> -> vector<8x32xf32>
    %718 = arith.truncf %717 : vector<8x32xf32> to vector<8x32xbf16>
    %c5_i32_171 = arith.constant 5 : i32
    return
  }
  func.func @transform_0(%arg0: i32) -> (i32, i32) {
    %c0_i32 = arith.constant 0 : i32
    %c0_i32_0 = arith.constant 0 : i32
    return %arg0, %c0_i32 : i32, i32
  }
  func.func @transform_1(%arg0: i32) -> (i32, i32, i32) {
    %c0_i32 = arith.constant 0 : i32
    %c0_i32_0 = arith.constant 0 : i32
    %c0_i32_1 = arith.constant 0 : i32
    return %c0_i32, %arg0, %c0_i32_0 : i32, i32, i32
  }
  func.func @transform_2(%arg0: i32) -> (i32, i32) {
    %c0_i32 = arith.constant 0 : i32
    %c0_i32_0 = arith.constant 0 : i32
    %c0_i32_1 = arith.constant 0 : i32
    return %c0_i32, %c0_i32_0 : i32, i32
  }
  func.func @transform_3(%arg0: i32) -> (i32, i32) {
    %c0_i32 = arith.constant 0 : i32
    %c0_i32_0 = arith.constant 0 : i32
    %c0_i32_1 = arith.constant 0 : i32
    return %c0_i32, %c0_i32_0 : i32, i32
  }
  func.func @transform_4(%arg0: i32) -> (i32, i32) {
    %c0_i32 = arith.constant 0 : i32
    %c0_i32_0 = arith.constant 0 : i32
    %c0_i32_1 = arith.constant 0 : i32
    return %c0_i32, %c0_i32_0 : i32, i32
  }
  func.func @transform_5(%arg0: i32) -> (i32, i32) {
    %c0_i32 = arith.constant 0 : i32
    %c0_i32_0 = arith.constant 0 : i32
    %c0_i32_1 = arith.constant 0 : i32
    return %c0_i32, %c0_i32_0 : i32, i32
  }
  func.func @transform_6(%arg0: i32) -> (i32, i32) {
    %c0_i32 = arith.constant 0 : i32
    %c0_i32_0 = arith.constant 0 : i32
    %c0_i32_1 = arith.constant 0 : i32
    return %c0_i32, %c0_i32_0 : i32, i32
  }
  func.func @transform_7(%arg0: i32) -> (i32, i32) {
    %c0_i32 = arith.constant 0 : i32
    %c0_i32_0 = arith.constant 0 : i32
    %c0_i32_1 = arith.constant 0 : i32
    return %c0_i32, %c0_i32_0 : i32, i32
  }
  func.func @transform_8(%arg0: i32) -> (i32, i32) {
    %c0_i32 = arith.constant 0 : i32
    %c0_i32_0 = arith.constant 0 : i32
    %c0_i32_1 = arith.constant 0 : i32
    return %c0_i32, %c0_i32_0 : i32, i32
  }
  func.func @transform_9(%arg0: i32) -> (i32, i32) {
    %c0_i32 = arith.constant 0 : i32
    %c0_i32_0 = arith.constant 0 : i32
    %c0_i32_1 = arith.constant 0 : i32
    return %c0_i32, %c0_i32_0 : i32, i32
  }
  func.func @transform_10(%arg0: i32) -> (i32, i32) {
    %c0_i32 = arith.constant 0 : i32
    %c0_i32_0 = arith.constant 0 : i32
    %c0_i32_1 = arith.constant 0 : i32
    return %c0_i32, %c0_i32_0 : i32, i32
  }
  func.func @transform_11(%arg0: i32) -> (i32, i32) {
    %c0_i32 = arith.constant 0 : i32
    %c0_i32_0 = arith.constant 0 : i32
    %c0_i32_1 = arith.constant 0 : i32
    return %c0_i32, %c0_i32_0 : i32, i32
  }
  func.func @transform_12(%arg0: i32) -> (i32, i32, i32) {
    %c0_i32 = arith.constant 0 : i32
    %c0_i32_0 = arith.constant 0 : i32
    %c0_i32_1 = arith.constant 0 : i32
    return %c0_i32, %arg0, %c0_i32_0 : i32, i32, i32
  }
}

</mosaic_0001>

<bundles_post_ra>
// kernel: tpu_custom_call.1
= control target key start
LH: loop header
LB: loop body
LE: loop exit
PB: predicated region body
PF: predicated region fallthrough
CT: control target
= control target key end

     0   :  { %17 = vsyncpa [#allocation3], 0  ;;  %s2690_s0 = inlined_call_operand.vmem [shape: s32[8,1], index: 0, kind: input, shape index: {}]   ;;  %s2691_s1 = inlined_call_operand.vmem [shape: bf16[8,8,32], index: 1, kind: input, shape index: {}]   ;;  %s2692_s2 = inlined_call_operand.hbm [shape: bf16[1,32], index: 2, kind: input, shape index: {}]   ;;  %s2693_s3 = inlined_call_operand.vmem [shape: bf16[128,32], index: 3, kind: input, shape index: {}]   ;;  %s2694_s4 = inlined_call_operand.vmem [shape: bf16[32,128], index: 4, kind: input, shape index: {}]   ;;  %s2695_s5 = inlined_call_operand.vmem [shape: bf16[32,128], index: 5, kind: input, shape index: {}]   ;;  %s2696_s6 = inlined_call_operand.hbm [shape: f32[1,128], index: 6, kind: input, shape index: {}]   ;;  %s2697_s7 = inlined_call_operand.vmem [shape: bf16[32,128], index: 7, kind: input, shape index: {}]   ;;  %s2698_s8 = inlined_call_operand.vmem [shape: bf16[32,128], index: 8, kind: input, shape index: {}]   ;;  %s2699_s9 = inlined_call_operand.hbm [shape: f32[1,128], index: 9, kind: input, shape index: {}]   ;;  %s2700_s10 = inlined_call_operand.hbm [shape: bf16[32,128], index: 10, kind: input, shape index: {}]   ;;  %s2701_s11 = inlined_call_operand.vmem [shape: f32[1,128], index: 11, kind: input, shape index: {}]   ;;  %s2702_s12 = inlined_call_operand.hbm [shape: f32[7,8,128], index: 12, kind: output, shape index: {}]  }
   0x1   :  { %18 = vsyncpa [#allocation6], 0 }
   0x2   :  { %19 = vsyncpa [#allocation9], 0  ;;  %s47_s23 = sshll.u32 %s2696_s6, 4  ;;  %s48_s23 = int_to_ptr.hbm [resolvable:$true] %s47_s23 }
   0x3   :  { %20 = vsyncpa [#allocation4], 0  ;;  %s2159_s24 = smov [#allocation5]   ;;  %s30_s28 = sshll.u32 %s2692_s2, 4  ;;  %s31_s28 = int_to_ptr.hbm [resolvable:$true] %s30_s28 }
   0x4   :  { %s49_s25 = sshll.u32 %s2159_s24, 4  ;;  %s2160_s29 = smov [#allocation2]   ;;  %s50_s25 = int_to_ptr.vmem [resolvable:$true] %s49_s25 }
   0x5   :  { %52 = dma.hbm_to_vmem [thread:$0]  %s48_s23, 16, %s50_s25, [#allocation6]  }
   0x6   :  { %s32_s30 = sshll.u32 %s2160_s29, 4  ;;  %s62_s15 = sshll.u32 %s2699_s9, 4  ;;  %s33_s30 = int_to_ptr.vmem [resolvable:$true] %s32_s30  ;;  %s63_s15 = int_to_ptr.hbm [resolvable:$true] %s62_s15 }
   0x7   :  { %35 = dma.hbm_to_vmem [thread:$0]  %s31_s28, 16, %s33_s30, [#allocation3]  }
   0x8   :  { %s72_s17 = sshll.u32 %s2700_s10, 4  ;;  %s2161_s18 = smov [#allocation7]   ;;  %s73_s17 = int_to_ptr.hbm [resolvable:$true] %s72_s17 }
   0x9   :  { %s64_s19 = sshll.u32 %s2161_s18, 4  ;;  %s2162_s2 = smov [#allocation8]   ;;  %s65_s19 = int_to_ptr.vmem [resolvable:$true] %s64_s19 }
   0xa   :  { %67 = dma.hbm_to_vmem [thread:$0]  %s63_s15, 16, %s65_s19, [#allocation6]  }
   0xb   :  { %s74_s20 = sshll.u32 %s2162_s2, 4  ;;  %s2163_s21 = smov 64   ;;  %s75_s20 = int_to_ptr.vmem [resolvable:$true] %s74_s20 }
   0xc   :  { %s2164_s22 = smov 4  }
   0xd   :  { %80 = dma.hbm_to_vmem [thread:$0]  %s73_s17, 256, %s75_s20, [#allocation9], %s2163_s21, %s2163_s21, %s2164_s22  }
   0xe   :  { %2151 = dma.done.wait [#allocation3], 16  }
   0xf   :  { %2152 = vsyncadd [#allocation3], 4294967280 }
  0x10   :  { %2153 = dma.done.wait [#allocation6], 32  }
  0x11   :  { %2154 = vsyncadd [#allocation6], 4294967264 }
  0x12   :  { %2155 = dma.done.wait [#allocation9], 256  }
  0x13   :  { %2156 = vsyncadd [#allocation9], 4294967040  ;;  %v2165_v0 = vmov 0   ;;  %v2256_v1 = vld [vmem:[%s2695_s5 + $0x8] sm:$0xff]  ;;  %v2266_v3 = vld [vmem:[%s2695_s5] sm:$0xff]  ;;  %vm156_vm0 = vcmask 261120  }
  0x14   :  { %1905 = vset.pattern.permute.xlu1 %v2165_v0  ;;  %1906 = vset.pattern.permute.xlu2 %v2165_v0  ;;  %v2261_v2 = vld [vmem:[%s2694_s4 + $0x8] sm:$0xff]  ;;  %v2273_v4 = vld [vmem:[%s2694_s4] sm:$0xff]  ;;  %s2166_s4 = smov 32   ;;  %s1717_s5 = sshll.u32 %s2702_s12, 4  ;;  %s1718_s5 = int_to_ptr.hbm [resolvable:$true] %s1717_s5 }
  0x15   :  { %1907 = vset.pattern.permute.xlu0 %v2165_v0  ;;  %166 = vmatpush.bf16.msra.mxu0 %v2256_v1  ;;  %v143_v5 = vld [vmem:[%s2691_s1] sm:$0xf]  ;;  %v1750_v35 = vld [vmem:[%s2691_s1 + $0x4] sm:$0xf]  ;;  %s2170_s30 = smov 8  }
  0x16   :  { %194 = vmatpush.bf16.msra.mxu1 %v2261_v2  ;;  %281 = vmatpush.bf16.msra.mxu3 %v2261_v2  ;;  %v2298_v6 = vld [vmem:[#allocation5] ss:$0 sm:$0xff] }
  0x17   :  { %265 = vmatpush.bf16.msra.mxu2 %v2256_v1  ;;  %v2306_v33 = vld [vmem:[%s2690_s0] sm:$0xff] }
  0x18   :  { %vm242_vm5 = vcmp.gt.s32.totalorder %v2306_v33, 0  ;;  %vm326_vm7 = vcmp.gt.s32.totalorder %v2306_v33, 1  ;;  %vm410_vm13 = vcmp.gt.s32.totalorder %v2306_v33, 2 }
  0x19   :  { %167 = vmatpush.bf16.msra.mxu0 %v2266_v3  ;;  %v243_v34 = vsel %vm242_vm5, 1, %v2165_v0  ;;  %v327_v52 = vsel %vm326_vm7, 1, %v2165_v0  ;;  %vm578_vm5 = vcmp.gt.s32.totalorder %v2306_v33, 4 }
  0x1a   :  { %195 = vmatpush.bf16.msra.mxu1 %v2273_v4  ;;  %282 = vmatpush.bf16.msra.mxu3 %v2273_v4 }
  0x1b   :  { %266 = vmatpush.bf16.msra.mxu2 %v2266_v3 }
  0x1c   :  { %168 = vmatmul.bf16.vlgmr.msra.gmra.mxu0 %v2165_v0 }
  0x1d   :  { %349 = vmatpush.bf16.msrb.mxu0 %v2256_v1  ;;  %1748 = vmatmul.msk.bf16.vlgmr.msra.gmra.mxu1 %vm156_vm0, %v143_v5 }
  0x1e   :  { %365 = vmatpush.bf16.msrb.mxu1 %v2261_v2  ;;  %449 = vmatpush.bf16.msrb.mxu3 %v2261_v2 }
  0x1f   :  { %433 = vmatpush.bf16.msrb.mxu2 %v2256_v1  ;;  %1752 = vmatmul.msk.bf16.vlgmr.msra.gmra.mxu3 %vm156_vm0, %v1750_v35 }
  0x21   :  { %350 = vmatpush.bf16.msrb.mxu0 %v2266_v3 }
  0x22   :  { %366 = vmatpush.bf16.msrb.mxu1 %v2273_v4  ;;  %450 = vmatpush.bf16.msrb.mxu3 %v2273_v4 }
  0x23   :  { %434 = vmatpush.bf16.msrb.mxu2 %v2266_v3 }
  0x25   :  { %517 = vmatpush.bf16.msra.mxu0 %v2256_v1 }
  0x26   :  { %533 = vmatpush.bf16.msra.mxu1 %v2261_v2  ;;  %617 = vmatpush.bf16.msra.mxu3 %v2261_v2 }
  0x29   :  { %518 = vmatpush.bf16.msra.mxu0 %v2266_v3 }
  0x2a   :  { %534 = vmatpush.bf16.msra.mxu1 %v2273_v4  ;;  %618 = vmatpush.bf16.msra.mxu3 %v2273_v4 }
  0x99   :  { %v169_v7 = vpop.f32.mrf.mxu0 }
  0x9a   :  { %v197_v8 = vpop.f32.mrf.mxu1 }
  0x9b   :  { %v198_v9 = vadd.f32 %v197_v8, %v169_v7 }
  0x9d   :  { %v204_v10 = vadd.f32 %v2298_v6, %v198_v9 }
  0x9f   :  { %1911 = vtanh.f32 %v204_v10  ;;  %v1749_v14 = vmul.f32 -1.442695, %v204_v10 }
  0xa1   :  { %v171_v11 = vpop.f32.mrf.mxu0  ;;  %1913 = vpow2.f32 %v1749_v14 }
  0xa2   :  { %v199_v12 = vpop.f32.mrf.mxu1  ;;  %v284_v42 = vpop.f32.mrf.mxu3 }
  0xa3   :  { %v1754_v12 = vld [vmem:[%s2691_s1 + $0x8] sm:$0xf] }
  0xa4   :  { %1756 = vmatmul.msk.bf16.vlgmr.msrb.gmra.mxu1 %vm156_vm0, %v1754_v12 }
  0xa5   :  { %v1912_v13 = vpop.eup %1911  ;;  %701 = vmatpush.bf16.msrb.mxu1 %v2261_v2 }
  0xa6   :  { %227 = vrot.lane.b32.xlu0 %v1912_v13, %s2163_s21 }
  0xa7   :  { %v1914_v15 = vpop.eup %1913 }
  0xa8   :  { %v208_v16 = vadd.f32 1.0, %v1914_v15 }
  0xa9   :  { %702 = vmatpush.bf16.msrb.mxu1 %v2273_v4 }
  0xaa   :  { %1915 = vrcp.f32 %v208_v16  ;;  %v220_v22 = vand.u32 2147483648, %v208_v16  ;;  %vm214_vm2 = vweird.f32 %v208_v16  ;;  %v218_v23 = vand.u32 2147483647, %v208_v16  ;;  %v286_v43 = vpop.f32.mrf.mxu3 }
  0xac   :  { %v221_v25 = vor.u32 1.1754944e-38, %v220_v22  ;;  %vm219_vm4 = vcmp.eq.f32.partialorder %v218_v23, 8.507059e+37 }
  0xb0   :  { %v1916_v17 = vpop.eup %1915 }
  0xb1   :  { %v210_v18 = vmul.f32 %v1916_v17, %v208_v16  ;;  %vm215_vm1 = vweird.f32 %v1916_v17 }
  0xb2   :  { %vm216_vm3 = vmor %vm214_vm2, %vm215_vm1 }
  0xb3   :  { %v211_v19 = vsub.f32 1.0, %v210_v18 }
  0xb5   :  { %v212_v20 = vmul.f32 %v1916_v17, %v211_v19 }
  0xb7   :  { %v213_v21 = vadd.f32 %v1916_v17, %v212_v20 }
  0xb9   :  { %v217_v24 = vsel %vm216_vm3, %v1916_v17, %v213_v21 }
  0xba   :  { %v222_v27 = vsel %vm219_vm4, %v221_v25, %v217_v24  ;;  %vm494_vm4 = vcmp.gt.s32.totalorder %v2306_v33, 3 }
  0xbb   :  { %v225_v29 = vmul.f32 0.0, %v222_v27 }
 0x118   :  { %v228_v26 = vpop.permute.xlu0 %227 }
 0x119   :  { %v230_v28 = vmul.f32 %v228_v26, %v222_v27  ;;  %v411_v26 = vsel %vm410_vm13, 1, %v2165_v0 }
 0x11b   :  { %232 = vrot.lane.b32.xlu0 %v230_v28, %s2166_s4 }
 0x121   :  { %v368_v18 = vpop.f32.mrf.mxu1 }
 0x129   :  { %v370_v19 = vpop.f32.mrf.mxu1 }
 0x18d   :  { %v233_v30 = vpop.permute.xlu0 %232 }
 0x18e   :  { %v235_v31 = vadd.f32 %v233_v30, %v225_v29 }
 0x190   :  { %1917 = vtanh.f32 %v235_v31 }
 0x196   :  { %v1918_v32 = vpop.eup %1917 }
 0x197   :  { %238 = vrot.lane.b32.xlu1 %v1918_v32, %s2163_s21 }
 0x19f   :  { %245 = vperm.xlu1 %1905, %v243_v34  }
 0x209   :  { %v239_v36 = vpop.permute.xlu1 %238 }
 0x20a   :  { %v241_v37 = vmul.f32 %v239_v36, %v222_v27 }
 0x211   :  { %v246_v38 = vpop.permute.xlu1 %245 }
 0x212   :  { %vm247_vm6 = vcmp.eq.s32.totalorder %v246_v38, 1 }
 0x213   :  { %v248_v39 = vsel %vm247_vm6, %v241_v37, 0.0  ;;  %v249_v7 = vsel %vm247_vm6, %v235_v31, 0.0 }
 0x214   :  { %v252_v40 = vpack.c.bf16 %v248_v39, %v248_v39 }
 0x216   :  { %254 = vrot.lane.b32.xlu2 %v252_v40, %s2166_s4 }
 0x270   :  { %v255_v41 = vpop.permute.xlu2 %254 }
 0x271   :  { %1751 = vmatmul.msk.bf16.vlgmr.msra.gmra.mxu2 %vm156_vm0, %v255_v41 }
 0x272   :  { %601 = vmatpush.bf16.msra.mxu2 %v2256_v1 }
 0x276   :  { %602 = vmatpush.bf16.msra.mxu2 %v2266_v3 }
 0x2f4   :  { %v268_v44 = vpop.f32.mrf.mxu2 }
 0x2f5   :  { %v285_v45 = vadd.f32 %v284_v42, %v268_v44 }
 0x2f7   :  { %v288_v46 = vadd.f32 %v2298_v6, %v285_v45 }
 0x2f9   :  { %1919 = vtanh.f32 %v288_v46  ;;  %v1753_v49 = vmul.f32 -1.442695, %v288_v46 }
 0x2fb   :  { %1921 = vpow2.f32 %v1753_v49 }
 0x2fc   :  { %v270_v47 = vpop.f32.mrf.mxu2 }
 0x2ff   :  { %v1920_v48 = vpop.eup %1919 }
 0x300   :  { %311 = vrot.lane.b32.xlu2 %v1920_v48, %s2163_s21  ;;  %v1758_v48 = vld [vmem:[%s2691_s1 + $0xc] sm:$0xf] }
 0x301   :  { %v1922_v50 = vpop.eup %1921  ;;  %1760 = vmatmul.msk.bf16.vlgmr.msrb.gmra.mxu3 %vm156_vm0, %v1758_v48 }
 0x302   :  { %v292_v51 = vadd.f32 1.0, %v1922_v50  ;;  %785 = vmatpush.bf16.msrb.mxu3 %v2261_v2 }
 0x304   :  { %1923 = vrcp.f32 %v292_v51  ;;  %v304_v58 = vand.u32 2147483648, %v292_v51  ;;  %vm298_vm9 = vweird.f32 %v292_v51  ;;  %v302_v59 = vand.u32 2147483647, %v292_v51 }
 0x306   :  { %v305_v61 = vor.u32 1.1754944e-38, %v304_v58  ;;  %vm303_vm11 = vcmp.eq.f32.partialorder %v302_v59, 8.507059e+37  ;;  %786 = vmatpush.bf16.msrb.mxu3 %v2273_v4 }
 0x308   :  { %329 = vperm.xlu2 %1906, %v327_v52  }
 0x30a   :  { %v1924_v53 = vpop.eup %1923 }
 0x30b   :  { %v294_v54 = vmul.f32 %v1924_v53, %v292_v51  ;;  %vm299_vm8 = vweird.f32 %v1924_v53 }
 0x30c   :  { %vm300_vm10 = vmor %vm298_vm9, %vm299_vm8 }
 0x30d   :  { %v295_v55 = vsub.f32 1.0, %v294_v54 }
 0x30f   :  { %v296_v56 = vmul.f32 %v1924_v53, %v295_v55 }
 0x311   :  { %v297_v57 = vadd.f32 %v1924_v53, %v296_v56 }
 0x313   :  { %v301_v60 = vsel %vm300_vm10, %v1924_v53, %v297_v57 }
 0x314   :  { %v306_v63 = vsel %vm303_vm11, %v305_v61, %v301_v60 }
 0x315   :  { %v309_v8 = vmul.f32 %v306_v63, %v249_v7 }
 0x35a   :  { %v312_v62 = vpop.permute.xlu2 %311 }
 0x35b   :  { %v314_v5 = vmul.f32 %v312_v62, %v306_v63 }
 0x35d   :  { %316 = vrot.lane.b32.xlu0 %v314_v5, %s2166_s4 }
 0x362   :  { %v330_v13 = vpop.permute.xlu2 %329 }
 0x363   :  { %vm331_vm12 = vcmp.eq.s32.totalorder %v330_v13, 1 }
 0x384   :  { %v452_v55 = vpop.f32.mrf.mxu3 }
 0x38c   :  { %v454_v2 = vpop.f32.mrf.mxu3 }
 0x3cf   :  { %v317_v9 = vpop.permute.xlu0 %316 }
 0x3d0   :  { %v319_v10 = vadd.f32 %v317_v9, %v309_v8 }
 0x3d2   :  { %1925 = vtanh.f32 %v319_v10  ;;  %v333_v43 = vsel %vm331_vm12, %v319_v10, %v249_v7 }
 0x3d8   :  { %v1926_v11 = vpop.eup %1925 }
 0x3d9   :  { %322 = vrot.lane.b32.xlu1 %v1926_v11, %s2163_s21 }
 0x44b   :  { %v323_v14 = vpop.permute.xlu1 %322 }
 0x44c   :  { %v325_v15 = vmul.f32 %v323_v14, %v306_v63 }
 0x44e   :  { %v332_v16 = vsel %vm331_vm12, %v325_v15, %v248_v39 }
 0x44f   :  { %v336_v17 = vpack.c.bf16 %v332_v16, %v332_v16 }
 0x451   :  { %338 = vrot.lane.b32.xlu0 %v336_v17, %s2166_s4 }
 0x4c3   :  { %v339_v20 = vpop.permute.xlu0 %338 }
 0x4c4   :  { %1755 = vmatmul.msk.bf16.vlgmr.msrb.gmra.mxu0 %vm156_vm0, %v339_v20 }
 0x4c5   :  { %685 = vmatpush.bf16.msrb.mxu0 %v2256_v1 }
 0x4c9   :  { %686 = vmatpush.bf16.msrb.mxu0 %v2266_v3 }
 0x541   :  { %v352_v21 = vpop.f32.mrf.mxu0 }
 0x542   :  { %v369_v22 = vadd.f32 %v368_v18, %v352_v21 }
 0x544   :  { %v372_v23 = vadd.f32 %v2298_v6, %v369_v22  ;;  %v1762_v22 = vld [vmem:[%s2691_s1 + $0x10] sm:$0xf] }
 0x545   :  { %1764 = vmatmul.msk.bf16.vlgmr.msra.gmra.mxu1 %vm156_vm0, %v1762_v22 }
 0x546   :  { %1927 = vtanh.f32 %v372_v23  ;;  %v1757_v27 = vmul.f32 -1.442695, %v372_v23 }
 0x548   :  { %1929 = vpow2.f32 %v1757_v27 }
 0x549   :  { %v354_v24 = vpop.f32.mrf.mxu0 }
 0x54c   :  { %v1928_v25 = vpop.eup %1927 }
 0x54d   :  { %395 = vrot.lane.b32.xlu1 %v1928_v25, %s2163_s21 }
 0x54e   :  { %v1930_v28 = vpop.eup %1929 }
 0x54f   :  { %v376_v29 = vadd.f32 1.0, %v1930_v28 }
 0x551   :  { %1931 = vrcp.f32 %v376_v29  ;;  %v388_v36 = vand.u32 2147483648, %v376_v29  ;;  %vm382_vm15 = vweird.f32 %v376_v29  ;;  %v386_v37 = vand.u32 2147483647, %v376_v29 }
 0x553   :  { %v389_v39 = vor.u32 1.1754944e-38, %v388_v36  ;;  %vm387_vm2 = vcmp.eq.f32.partialorder %v386_v37, 8.507059e+37 }
 0x555   :  { %413 = vperm.xlu1 %1905, %v411_v26  }
 0x557   :  { %v1932_v30 = vpop.eup %1931 }
 0x558   :  { %v378_v31 = vmul.f32 %v1932_v30, %v376_v29  ;;  %vm383_vm14 = vweird.f32 %v1932_v30 }
 0x559   :  { %vm384_vm1 = vmor %vm382_vm15, %vm383_vm14 }
 0x55a   :  { %v379_v32 = vsub.f32 1.0, %v378_v31 }
 0x55c   :  { %v380_v34 = vmul.f32 %v1932_v30, %v379_v32 }
 0x55e   :  { %v381_v35 = vadd.f32 %v1932_v30, %v380_v34 }
 0x560   :  { %v385_v38 = vsel %vm384_vm1, %v1932_v30, %v381_v35  ;;  %vm662_vm1 = vcmp.gt.s32.totalorder %v2306_v33, 5 }
 0x561   :  { %v390_v41 = vsel %vm387_vm2, %v389_v39, %v385_v38 }
 0x562   :  { %v393_v44 = vmul.f32 %v390_v41, %v333_v43 }
 0x5bf   :  { %v396_v40 = vpop.permute.xlu1 %395 }
 0x5c0   :  { %v398_v42 = vmul.f32 %v396_v40, %v390_v41 }
 0x5c2   :  { %400 = vrot.lane.b32.xlu2 %v398_v42, %s2166_s4  ;;  %v536_v28 = vpop.f32.mrf.mxu1 }
 0x5c7   :  { %v414_v49 = vpop.permute.xlu1 %413 }
 0x5c8   :  { %vm415_vm3 = vcmp.eq.s32.totalorder %v414_v49, 1 }
 0x5ca   :  { %v538_v29 = vpop.f32.mrf.mxu1 }
 0x61c   :  { %v401_v45 = vpop.permute.xlu2 %400 }
 0x61d   :  { %v403_v46 = vadd.f32 %v401_v45, %v393_v44 }
 0x61f   :  { %1933 = vtanh.f32 %v403_v46  ;;  %v417_v17 = vsel %vm415_vm3, %v403_v46, %v333_v43 }
 0x625   :  { %v1934_v47 = vpop.eup %1933 }
 0x626   :  { %406 = vrot.lane.b32.xlu0 %v1934_v47, %s2163_s21 }
 0x698   :  { %v407_v50 = vpop.permute.xlu0 %406 }
 0x699   :  { %v409_v51 = vmul.f32 %v407_v50, %v390_v41 }
 0x69b   :  { %v416_v52 = vsel %vm415_vm3, %v409_v51, %v332_v16 }
 0x69c   :  { %v420_v53 = vpack.c.bf16 %v416_v52, %v416_v52 }
 0x69e   :  { %422 = vrot.lane.b32.xlu2 %v420_v53, %s2166_s4 }
 0x6f8   :  { %v423_v54 = vpop.permute.xlu2 %422 }
 0x6f9   :  { %1759 = vmatmul.msk.bf16.vlgmr.msrb.gmra.mxu2 %vm156_vm0, %v423_v54 }
 0x6fa   :  { %769 = vmatpush.bf16.msrb.mxu2 %v2256_v1  ;;  %v495_v1 = vsel %vm494_vm4, 1, %v2165_v0 }
 0x6fe   :  { %770 = vmatpush.bf16.msrb.mxu2 %v2266_v3  ;;  %v579_v3 = vsel %vm578_vm5, 1, %v2165_v0 }
 0x77c   :  { %v436_v56 = vpop.f32.mrf.mxu2 }
 0x77d   :  { %v453_v4 = vadd.f32 %v452_v55, %v436_v56  ;;  %v1766_v56 = vld [vmem:[%s2691_s1 + $0x14] sm:$0xf] }
 0x77e   :  { %1768 = vmatmul.msk.bf16.vlgmr.msra.gmra.mxu3 %vm156_vm0, %v1766_v56 }
 0x77f   :  { %v456_v57 = vadd.f32 %v2298_v6, %v453_v4 }
 0x781   :  { %1935 = vtanh.f32 %v456_v57  ;;  %v1761_v60 = vmul.f32 -1.442695, %v456_v57 }
 0x783   :  { %1937 = vpow2.f32 %v1761_v60 }
 0x784   :  { %v438_v58 = vpop.f32.mrf.mxu2 }
 0x787   :  { %v1936_v59 = vpop.eup %1935 }
 0x788   :  { %479 = vrot.lane.b32.xlu0 %v1936_v59, %s2163_s21 }
 0x789   :  { %v1938_v61 = vpop.eup %1937 }
 0x78a   :  { %v460_v62 = vadd.f32 1.0, %v1938_v61 }
 0x78c   :  { %1939 = vrcp.f32 %v460_v62  ;;  %v472_v10 = vand.u32 2147483648, %v460_v62  ;;  %vm466_vm7 = vweird.f32 %v460_v62  ;;  %v470_v11 = vand.u32 2147483647, %v460_v62 }
 0x78e   :  { %v473_v13 = vor.u32 1.1754944e-38, %v472_v10  ;;  %vm471_vm9 = vcmp.eq.f32.partialorder %v470_v11, 8.507059e+37 }
 0x790   :  { %497 = vperm.xlu0 %1907, %v495_v1  }
 0x792   :  { %v1940_v63 = vpop.eup %1939 }
 0x793   :  { %v462_v5 = vmul.f32 %v1940_v63, %v460_v62  ;;  %vm467_vm6 = vweird.f32 %v1940_v63 }
 0x794   :  { %vm468_vm8 = vmor %vm466_vm7, %vm467_vm6  ;;  %vm746_vm7 = vcmp.gt.s32.totalorder %v2306_v33, 6 }
 0x795   :  { %v463_v7 = vsub.f32 1.0, %v462_v5 }
 0x797   :  { %v464_v8 = vmul.f32 %v1940_v63, %v463_v7 }
 0x798   :  { %581 = vperm.xlu0 %1907, %v579_v3  }
 0x799   :  { %v465_v9 = vadd.f32 %v1940_v63, %v464_v8 }
 0x79b   :  { %v469_v12 = vsel %vm468_vm8, %v1940_v63, %v465_v9  ;;  %v663_v9 = vsel %vm662_vm1, 1, %v2165_v0 }
 0x79c   :  { %v474_v15 = vsel %vm471_vm9, %v473_v13, %v469_v12 }
 0x79d   :  { %v477_v18 = vmul.f32 %v474_v15, %v417_v17 }
 0x7fa   :  { %v480_v14 = vpop.permute.xlu0 %479 }
 0x7fb   :  { %v482_v16 = vmul.f32 %v480_v14, %v474_v15 }
 0x7fd   :  { %484 = vrot.lane.b32.xlu1 %v482_v16, %s2166_s4 }
 0x801   :  { %v620_v61 = vpop.f32.mrf.mxu3 }
 0x802   :  { %v498_v23 = vpop.permute.xlu0 %497 }
 0x803   :  { %vm499_vm10 = vcmp.eq.s32.totalorder %v498_v23, 1 }
 0x809   :  { %v622_v62 = vpop.f32.mrf.mxu3 }
 0x80a   :  { %v582_v4 = vpop.permute.xlu0 %581 }
 0x80b   :  { %vm583_vm15 = vcmp.eq.s32.totalorder %v582_v4, 1 }
 0x86f   :  { %v485_v19 = vpop.permute.xlu1 %484 }
 0x870   :  { %v487_v20 = vadd.f32 %v485_v19, %v477_v18 }
 0x872   :  { %1941 = vtanh.f32 %v487_v20 }
 0x878   :  { %v1942_v21 = vpop.eup %1941 }
 0x879   :  { %490 = vrot.lane.b32.xlu2 %v1942_v21, %s2163_s21 }
 0x8d3   :  { %v491_v24 = vpop.permute.xlu2 %490 }
 0x8d4   :  { %v493_v25 = vmul.f32 %v491_v24, %v474_v15 }
 0x8d6   :  { %v500_v26 = vsel %vm499_vm10, %v493_v25, %v416_v52  ;;  %v501_v52 = vsel %vm499_vm10, %v487_v20, %v417_v17 }
 0x8d7   :  { %v504_v27 = vpack.c.bf16 %v500_v26, %v500_v26 }
 0x8d9   :  { %506 = vrot.lane.b32.xlu1 %v504_v27, %s2166_s4 }
 0x94b   :  { %v507_v30 = vpop.permute.xlu1 %506 }
 0x94c   :  { %1763 = vmatmul.msk.bf16.vlgmr.msra.gmra.mxu0 %vm156_vm0, %v507_v30  ;;  %v1770_v30 = vld [vmem:[%s2691_s1 + $0x18] sm:$0xf] }
 0x94d   :  { %1772 = vmatmul.msk.bf16.vlgmr.msrb.gmra.mxu1 %vm156_vm0, %v1770_v30 }
 0x9c9   :  { %v520_v31 = vpop.f32.mrf.mxu0 }
 0x9ca   :  { %v537_v32 = vadd.f32 %v536_v28, %v520_v31 }
 0x9cc   :  { %v540_v34 = vadd.f32 %v2298_v6, %v537_v32 }
 0x9ce   :  { %1943 = vtanh.f32 %v540_v34  ;;  %v1765_v37 = vmul.f32 -1.442695, %v540_v34 }
 0x9d0   :  { %1945 = vpow2.f32 %v1765_v37  ;;  %v704_v37 = vpop.f32.mrf.mxu1 }
 0x9d1   :  { %v522_v35 = vpop.f32.mrf.mxu0 }
 0x9d4   :  { %v1944_v36 = vpop.eup %1943 }
 0x9d5   :  { %563 = vrot.lane.b32.xlu2 %v1944_v36, %s2163_s21 }
 0x9d6   :  { %v1946_v38 = vpop.eup %1945 }
 0x9d7   :  { %v544_v39 = vadd.f32 1.0, %v1946_v38 }
 0x9d8   :  { %v706_v38 = vpop.f32.mrf.mxu1 }
 0x9d9   :  { %1947 = vrcp.f32 %v544_v39  ;;  %v556_v45 = vand.u32 2147483648, %v544_v39  ;;  %vm550_vm12 = vweird.f32 %v544_v39  ;;  %v554_v46 = vand.u32 2147483647, %v544_v39  ;;  %v2433_v38 = vld [vmem:[%s2697_s7 + $0x8] sm:$0xff] }
 0x9da   :  { %895 = vmatpush.bf16.msra.mxu1 %v2433_v38 }
 0x9db   :  { %v557_v48 = vor.u32 1.1754944e-38, %v556_v45  ;;  %vm555_vm14 = vcmp.eq.f32.partialorder %v554_v46, 8.507059e+37  ;;  %v747_v45 = vsel %vm746_vm7, 1, %v2165_v0 }
 0x9df   :  { %v1948_v40 = vpop.eup %1947 }
 0x9e0   :  { %v546_v41 = vmul.f32 %v1948_v40, %v544_v39  ;;  %vm551_vm11 = vweird.f32 %v1948_v40 }
 0x9e1   :  { %vm552_vm13 = vmor %vm550_vm12, %vm551_vm11 }
 0x9e2   :  { %v547_v42 = vsub.f32 1.0, %v546_v41 }
 0x9e4   :  { %v548_v43 = vmul.f32 %v1948_v40, %v547_v42 }
 0x9e6   :  { %v549_v44 = vadd.f32 %v1948_v40, %v548_v43 }
 0x9e8   :  { %v553_v47 = vsel %vm552_vm13, %v1948_v40, %v549_v44  ;;  %vm830_vm13 = vcmp.gt.s32.totalorder %v2306_v33, 7 }
 0x9e9   :  { %v558_v50 = vsel %vm555_vm14, %v557_v48, %v553_v47 }
 0x9ea   :  { %v561_v53 = vmul.f32 %v558_v50, %v501_v52 }
 0xa2f   :  { %v564_v49 = vpop.permute.xlu2 %563 }
 0xa30   :  { %v566_v51 = vmul.f32 %v564_v49, %v558_v50 }
 0xa32   :  { %568 = vrot.lane.b32.xlu1 %v566_v51, %s2166_s4 }
 0xaa4   :  { %v569_v54 = vpop.permute.xlu1 %568 }
 0xaa5   :  { %v571_v55 = vadd.f32 %v569_v54, %v561_v53 }
 0xaa7   :  { %1949 = vtanh.f32 %v571_v55  ;;  %v585_v25 = vsel %vm583_vm15, %v571_v55, %v501_v52 }
 0xaad   :  { %v1950_v2 = vpop.eup %1949 }
 0xaae   :  { %574 = vrot.lane.b32.xlu2 %v1950_v2, %s2163_s21 }
 0xb08   :  { %v575_v57 = vpop.permute.xlu2 %574 }
 0xb09   :  { %v577_v58 = vmul.f32 %v575_v57, %v558_v50 }
 0xb0b   :  { %v584_v59 = vsel %vm583_vm15, %v577_v58, %v500_v26 }
 0xb0c   :  { %v588_v60 = vpack.c.bf16 %v584_v59, %v584_v59 }
 0xb0e   :  { %590 = vrot.lane.b32.xlu1 %v588_v60, %s2166_s4 }
 0xb80   :  { %v591_v1 = vpop.permute.xlu1 %590 }
 0xb81   :  { %1767 = vmatmul.msk.bf16.vlgmr.msra.gmra.mxu2 %vm156_vm0, %v591_v1 }
 0xc04   :  { %v604_v3 = vpop.f32.mrf.mxu2 }
 0xc05   :  { %v621_v63 = vadd.f32 %v620_v61, %v604_v3  ;;  %v1774_v3 = vld [vmem:[%s2691_s1 + $0x1c] sm:$0xf] }
 0xc06   :  { %1776 = vmatmul.msk.bf16.vlgmr.msrb.gmra.mxu3 %vm156_vm0, %v1774_v3 }
 0xc07   :  { %v624_v5 = vadd.f32 %v2298_v6, %v621_v63 }
 0xc09   :  { %1951 = vtanh.f32 %v624_v5  ;;  %v1769_v10 = vmul.f32 -1.442695, %v624_v5 }
 0xc0b   :  { %1953 = vpow2.f32 %v1769_v10 }
 0xc0c   :  { %v606_v7 = vpop.f32.mrf.mxu2 }
 0xc0f   :  { %v1952_v8 = vpop.eup %1951 }
 0xc10   :  { %647 = vrot.lane.b32.xlu2 %v1952_v8, %s2163_s21 }
 0xc11   :  { %v1954_v11 = vpop.eup %1953 }
 0xc12   :  { %v628_v12 = vadd.f32 1.0, %v1954_v11 }
 0xc14   :  { %1955 = vrcp.f32 %v628_v12  ;;  %v640_v18 = vand.u32 2147483648, %v628_v12  ;;  %vm634_vm3 = vweird.f32 %v628_v12  ;;  %v638_v19 = vand.u32 2147483647, %v628_v12 }
 0xc16   :  { %v641_v21 = vor.u32 1.1754944e-38, %v640_v18  ;;  %vm639_vm5 = vcmp.eq.f32.partialorder %v638_v19, 8.507059e+37  ;;  %v831_v18 = vsel %vm830_vm13, 1, %v2165_v0 }
 0xc18   :  { %665 = vperm.xlu2 %1906, %v663_v9  }
 0xc1a   :  { %v1956_v13 = vpop.eup %1955 }
 0xc1b   :  { %v630_v14 = vmul.f32 %v1956_v13, %v628_v12  ;;  %vm635_vm2 = vweird.f32 %v1956_v13 }
 0xc1c   :  { %vm636_vm4 = vmor %vm634_vm3, %vm635_vm2 }
 0xc1d   :  { %v631_v15 = vsub.f32 1.0, %v630_v14 }
 0xc1f   :  { %v632_v16 = vmul.f32 %v1956_v13, %v631_v15 }
 0xc21   :  { %v633_v17 = vadd.f32 %v1956_v13, %v632_v16 }
 0xc23   :  { %v637_v20 = vsel %vm636_vm4, %v1956_v13, %v633_v17 }
 0xc24   :  { %v642_v23 = vsel %vm639_vm5, %v641_v21, %v637_v20 }
 0xc25   :  { %v645_v26 = vmul.f32 %v642_v23, %v585_v25 }
 0xc6a   :  { %v648_v22 = vpop.permute.xlu2 %647 }
 0xc6b   :  { %v650_v24 = vmul.f32 %v648_v22, %v642_v23 }
 0xc6d   :  { %652 = vrot.lane.b32.xlu0 %v650_v24, %s2166_s4 }
 0xc72   :  { %v666_v31 = vpop.permute.xlu2 %665 }
 0xc73   :  { %vm667_vm6 = vcmp.eq.s32.totalorder %v666_v31, 1 }
 0xc89   :  { %v788_v11 = vpop.f32.mrf.mxu3 }
 0xc91   :  { %v790_v12 = vpop.f32.mrf.mxu3 }
 0xcdf   :  { %v653_v27 = vpop.permute.xlu0 %652 }
 0xce0   :  { %v655_v28 = vadd.f32 %v653_v27, %v645_v26 }
 0xce2   :  { %1957 = vtanh.f32 %v655_v28 }
 0xce8   :  { %v1958_v29 = vpop.eup %1957 }
 0xce9   :  { %658 = vrot.lane.b32.xlu1 %v1958_v29, %s2163_s21 }
 0xd5b   :  { %v659_v32 = vpop.permute.xlu1 %658 }
 0xd5c   :  { %v661_v34 = vmul.f32 %v659_v32, %v642_v23 }
 0xd5e   :  { %v668_v35 = vsel %vm667_vm6, %v661_v34, %v584_v59  ;;  %v669_v59 = vsel %vm667_vm6, %v655_v28, %v585_v25 }
 0xd5f   :  { %v672_v36 = vpack.c.bf16 %v668_v35, %v668_v35 }
 0xd61   :  { %674 = vrot.lane.b32.xlu0 %v672_v36, %s2166_s4 }
 0xdd3   :  { %v675_v39 = vpop.permute.xlu0 %674 }
 0xdd4   :  { %1771 = vmatmul.msk.bf16.vlgmr.msrb.gmra.mxu0 %vm156_vm0, %v675_v39  ;;  %v837_v39 = vld [vmem:[#allocation2] sm:$0x1] }
 0xe51   :  { %v688_v40 = vpop.f32.mrf.mxu0 }
 0xe52   :  { %v705_v41 = vadd.f32 %v704_v37, %v688_v40  ;;  %v2428_v37 = vld [vmem:[%s2698_s8 + $0x8] sm:$0xff]  ;;  %v2440_v40 = vld [vmem:[%s2697_s7] sm:$0xff] }
 0xe53   :  { %867 = vmatpush.bf16.msra.mxu0 %v2428_v37  ;;  %986 = vmatpush.bf16.msra.mxu3 %v2428_v37 }
 0xe54   :  { %v708_v42 = vadd.f32 %v2298_v6, %v705_v41  ;;  %v2445_v41 = vld [vmem:[%s2698_s8] sm:$0xff]  ;;  %896 = vmatpush.bf16.msra.mxu1 %v2440_v40 }
 0xe56   :  { %1959 = vtanh.f32 %v708_v42  ;;  %v1773_v46 = vmul.f32 -1.442695, %v708_v42  ;;  %v839_v42 = vpack.i.b16 %v837_v39, %v837_v39 }
 0xe57   :  { %868 = vmatpush.bf16.msra.mxu0 %v2445_v41  ;;  %987 = vmatpush.bf16.msra.mxu3 %v2445_v41 }
 0xe58   :  { %1961 = vpow2.f32 %v1773_v46 }
 0xe59   :  { %v690_v43 = vpop.f32.mrf.mxu0 }
 0xe5a   :  { %v841_v43 = vperm.slane %v839_v42, 0 }
 0xe5b   :  { %1002 = vmatpush.bf16.msrb.mxu0 %v2433_v38  ;;  %1092 = vmatpush.bf16.msrb.mxu3 %v2433_v38 }
 0xe5c   :  { %v1960_v44 = vpop.eup %1959  ;;  %1795 = vmatmul.msk.bf16.vlgmr.msra.gmra.mxu1 %vm156_vm0, %v841_v43 }
 0xe5d   :  { %731 = vrot.lane.b32.xlu1 %v1960_v44, %s2163_s21 }
 0xe5e   :  { %v1962_v47 = vpop.eup %1961 }
 0xe5f   :  { %v712_v48 = vadd.f32 1.0, %v1962_v47  ;;  %1003 = vmatpush.bf16.msrb.mxu0 %v2440_v40  ;;  %1093 = vmatpush.bf16.msrb.mxu3 %v2440_v40 }
 0xe61   :  { %1963 = vrcp.f32 %v712_v48  ;;  %v724_v54 = vand.u32 2147483648, %v712_v48  ;;  %vm718_vm9 = vweird.f32 %v712_v48  ;;  %v722_v55 = vand.u32 2147483647, %v712_v48 }
 0xe63   :  { %v725_v56 = vor.u32 1.1754944e-38, %v724_v54  ;;  %vm723_vm11 = vcmp.eq.f32.partialorder %v722_v55, 8.507059e+37 }
 0xe65   :  { %749 = vperm.xlu1 %1905, %v747_v45  }
 0xe67   :  { %v1964_v49 = vpop.eup %1963 }
 0xe68   :  { %v714_v50 = vmul.f32 %v1964_v49, %v712_v48  ;;  %vm719_vm8 = vweird.f32 %v1964_v49 }
 0xe69   :  { %vm720_vm10 = vmor %vm718_vm9, %vm719_vm8 }
 0xe6a   :  { %v715_v51 = vsub.f32 1.0, %v714_v50 }
 0xe6c   :  { %v716_v52 = vmul.f32 %v1964_v49, %v715_v51 }
 0xe6e   :  { %v717_v53 = vadd.f32 %v1964_v49, %v716_v52  ;;  %v2459_v52 = vld [vmem:[#allocation7] ss:$0 sm:$0xff] }
 0xe70   :  { %v721_v2 = vsel %vm720_vm10, %v1964_v49, %v717_v53 }
 0xe71   :  { %v726_v57 = vsel %vm723_vm11, %v725_v56, %v721_v2 }
 0xe72   :  { %v729_v60 = vmul.f32 %v726_v57, %v669_v59 }
 0xecf   :  { %v732_v4 = vpop.permute.xlu1 %731 }
 0xed0   :  { %v734_v58 = vmul.f32 %v732_v4, %v726_v57 }
 0xed2   :  { %736 = vrot.lane.b32.xlu2 %v734_v58, %s2166_s4 }
 0xed7   :  { %v750_v63 = vpop.permute.xlu1 %749 }
 0xed8   :  { %vm751_vm12 = vcmp.eq.s32.totalorder %v750_v63, 1 }
 0xed9   :  { %v898_v49 = vpop.f32.mrf.mxu1 }
 0xee1   :  { %v900_v50 = vpop.f32.mrf.mxu1 }
 0xf2c   :  { %v737_v61 = vpop.permute.xlu2 %736 }
 0xf2d   :  { %v739_v62 = vadd.f32 %v737_v61, %v729_v60 }
 0xf2f   :  { %1965 = vtanh.f32 %v739_v62  ;;  %v753_v31 = vsel %vm751_vm12, %v739_v62, %v669_v59 }
 0xf35   :  { %v1966_v1 = vpop.eup %1965 }
 0xf36   :  { %742 = vrot.lane.b32.xlu0 %v1966_v1, %s2163_s21 }
 0xfa8   :  { %v743_v5 = vpop.permute.xlu0 %742 }
 0xfa9   :  { %v745_v7 = vmul.f32 %v743_v5, %v726_v57 }
 0xfab   :  { %v2412_v8 = vsel %vm751_vm12, %v745_v7, %v668_v35 }
 0xfac   :  { %v756_v9 = vpack.c.bf16 %v2412_v8, %v2412_v8 }
 0xfae   :  { %758 = vrot.lane.b32.xlu2 %v756_v9, %s2166_s4 }
0x1008   :  { %v759_v10 = vpop.permute.xlu2 %758 }
0x1009   :  { %1775 = vmatmul.msk.bf16.vlgmr.msrb.gmra.mxu2 %vm156_vm0, %v759_v10 }
0x108c   :  { %v772_v13 = vpop.f32.mrf.mxu2 }
0x108d   :  { %v789_v14 = vadd.f32 %v788_v11, %v772_v13 }
0x108f   :  { %v792_v15 = vadd.f32 %v2298_v6, %v789_v14 }
0x1091   :  { %1967 = vtanh.f32 %v792_v15  ;;  %v1777_v19 = vmul.f32 -1.442695, %v792_v15  ;;  %v2468_v15 = vld [vmem:[#allocation8 + $0x8] sm:$0xff] }
0x1092   :  { %971 = vmatpush.bf16.msra.mxu2 %v2468_v15  ;;  %1060 = vmatpush.bf16.msrb.mxu1 %v2468_v15 }
0x1093   :  { %1969 = vpow2.f32 %v1777_v19 }
0x1094   :  { %v774_v16 = vpop.f32.mrf.mxu2 }
0x1095   :  { %v979_v16 = vld [vmem:[%s2691_s1] sm:$0xf] }
0x1097   :  { %v1968_v17 = vpop.eup %1967 }
0x1098   :  { %815 = vrot.lane.b32.xlu0 %v1968_v17, %s2163_s21  ;;  %v2475_v17 = vld [vmem:[#allocation8] sm:$0xff] }
0x1099   :  { %v1970_v20 = vpop.eup %1969  ;;  %972 = vmatpush.bf16.msra.mxu2 %v2475_v17  ;;  %1061 = vmatpush.bf16.msrb.mxu1 %v2475_v17 }
0x109a   :  { %v796_v21 = vadd.f32 1.0, %v1970_v20 }
0x109c   :  { %1971 = vrcp.f32 %v796_v21  ;;  %v808_v26 = vand.u32 2147483648, %v796_v21  ;;  %vm802_vm15 = vweird.f32 %v796_v21  ;;  %v806_v27 = vand.u32 2147483647, %v796_v21 }
0x109d   :  { %1076 = vmatpush.bf16.msrb.mxu2 %v2428_v37 }
0x109e   :  { %v809_v33 = vor.u32 1.1754944e-38, %v808_v26  ;;  %vm807_vm2 = vcmp.eq.f32.partialorder %v806_v27, 8.507059e+37 }
0x10a0   :  { %833 = vperm.xlu0 %1907, %v831_v18  }
0x10a1   :  { %1077 = vmatpush.bf16.msrb.mxu2 %v2445_v41 }
0x10a2   :  { %v1972_v22 = vpop.eup %1971 }
0x10a3   :  { %v798_v23 = vmul.f32 %v1972_v22, %v796_v21  ;;  %vm803_vm14 = vweird.f32 %v1972_v22 }
0x10a4   :  { %vm804_vm1 = vmor %vm802_vm15, %vm803_vm14 }
0x10a5   :  { %v799_v24 = vsub.f32 1.0, %v798_v23 }
0x10a7   :  { %v800_v25 = vmul.f32 %v1972_v22, %v799_v24  ;;  %v2496_v24 = vld [vmem:[%s2701_s11] ss:$0 sm:$0xff] }
0x10a9   :  { %v801_v6 = vadd.f32 %v1972_v22, %v800_v25 }
0x10ab   :  { %v805_v28 = vsel %vm804_vm1, %v1972_v22, %v801_v6 }
0x10ac   :  { %v810_v29 = vsel %vm807_vm2, %v809_v33, %v805_v28 }
0x10ad   :  { %v813_v32 = vmul.f32 %v810_v29, %v753_v31 }
0x110a   :  { %v816_v0 = vpop.permute.xlu0 %815 }
0x110b   :  { %v818_v30 = vmul.f32 %v816_v0, %v810_v29 }
0x110d   :  { %820 = vrot.lane.b32.xlu1 %v818_v30, %s2166_s4 }
0x1112   :  { %v834_v44 = vpop.permute.xlu0 %833 }
0x1113   :  { %vm835_vm3 = vcmp.eq.s32.totalorder %v834_v44, 1 }
0x117f   :  { %v821_v34 = vpop.permute.xlu1 %820 }
0x1180   :  { %v823_v35 = vadd.f32 %v821_v34, %v813_v32 }
0x1182   :  { %1973 = vtanh.f32 %v823_v35 }
0x1188   :  { %v1974_v36 = vpop.eup %1973 }
0x1189   :  { %826 = vrot.lane.b32.xlu2 %v1974_v36, %s2163_s21 }
0x11e3   :  { %v827_v45 = vpop.permute.xlu2 %826 }
0x11e4   :  { %v829_v46 = vmul.f32 %v827_v45, %v810_v29 }
0x11e6   :  { %v836_v47 = vsel %vm835_vm3, %v829_v46, %v2412_v8 }
0x11e7   :  { %v842_v48 = vpack.c.bf16 %v836_v47, %v836_v47 }
0x11e9   :  { %844 = vrot.lane.b32.xlu1 %v842_v48, %s2166_s4 }
0x125b   :  { %v845_v51 = vpop.permute.xlu1 %844 }
0x125c   :  { %1786 = vmatmul.msk.bf16.vlgmr.msra.gmra.mxu0 %vm156_vm0, %v845_v51 }
0x125d   :  { %1150 = vmatpush.bf16.msra.mxu0 %v2468_v15 }
0x1261   :  { %1151 = vmatpush.bf16.msra.mxu0 %v2475_v17 }
0x126c   :  { %1807 = vmatmul.msk.bf16.vlgmr.msrb.gmra.mxu0 %vm156_vm0, %v979_v16 }
0x126d   :  { %1324 = vmatpush.bf16.msrb.mxu0 %v2468_v15 }
0x1271   :  { %1325 = vmatpush.bf16.msrb.mxu0 %v2475_v17 }
0x12d9   :  { %v870_v53 = vpop.f32.mrf.mxu0 }
0x12da   :  { %v899_v54 = vadd.f32 %v898_v49, %v870_v53 }
0x12dc   :  { %v905_v55 = vadd.f32 %v2459_v52, %v899_v54 }
0x12de   :  { %1975 = vtanh.f32 %v905_v55  ;;  %v1796_v4 = vmul.f32 -1.442695, %v905_v55  ;;  %v1810_v55 = vld [vmem:[%s2691_s1 + $0x4] sm:$0xf] }
0x12e0   :  { %1977 = vpow2.f32 %v1796_v4 }
0x12e1   :  { %v872_v2 = vpop.f32.mrf.mxu0 }
0x12e4   :  { %v1976_v56 = vpop.eup %1975 }
0x12e5   :  { %928 = vrot.lane.b32.xlu2 %v1976_v56, %s2163_s21 }
0x12e6   :  { %v1978_v57 = vpop.eup %1977 }
0x12e7   :  { %v909_v58 = vadd.f32 1.0, %v1978_v57 }
0x12e9   :  { %1979 = vrcp.f32 %v909_v58  ;;  %v921_v3 = vand.u32 2147483648, %v909_v58  ;;  %vm915_vm5 = vweird.f32 %v909_v58  ;;  %v919_v63 = vand.u32 2147483647, %v909_v58  ;;  %v1005_v22 = vpop.f32.mrf.mxu0 }
0x12eb   :  { %v922_v7 = vor.u32 1.1754944e-38, %v921_v3  ;;  %vm920_vm7 = vcmp.eq.f32.partialorder %v919_v63, 8.507059e+37 }
0x12ef   :  { %v1980_v59 = vpop.eup %1979 }
0x12f0   :  { %v911_v60 = vmul.f32 %v1980_v59, %v909_v58  ;;  %vm916_vm4 = vweird.f32 %v1980_v59 }
0x12f1   :  { %vm917_vm6 = vmor %vm915_vm5, %vm916_vm4  ;;  %v1007_v23 = vpop.f32.mrf.mxu0 }
0x12f2   :  { %v912_v61 = vsub.f32 1.0, %v911_v60 }
0x12f4   :  { %v913_v62 = vmul.f32 %v1980_v59, %v912_v61 }
0x12f6   :  { %v914_v1 = vadd.f32 %v1980_v59, %v913_v62 }
0x12f8   :  { %v918_v5 = vsel %vm917_vm6, %v1980_v59, %v914_v1 }
0x12f9   :  { %v923_v9 = vsel %vm920_vm7, %v922_v7, %v918_v5 }
0x12fa   :  { %v926_v11 = vmul.f32 0.0, %v923_v9 }
0x133f   :  { %v929_v8 = vpop.permute.xlu2 %928 }
0x1340   :  { %v931_v10 = vmul.f32 %v929_v8, %v923_v9 }
0x1342   :  { %933 = vrot.lane.b32.xlu0 %v931_v10, %s2166_s4 }
0x13b4   :  { %v934_v12 = vpop.permute.xlu0 %933 }
0x13b5   :  { %v2464_v13 = vadd.f32 %v934_v12, %v926_v11 }
0x13b7   :  { %1981 = vtanh.f32 %v2464_v13 }
0x13bd   :  { %v1982_v14 = vpop.eup %1981 }
0x13be   :  { %939 = vrot.lane.b32.xlu1 %v1982_v14, %s2163_s21 }
0x1430   :  { %v940_v18 = vpop.permute.xlu1 %939 }
0x1431   :  { %v942_v19 = vmul.f32 %v940_v18, %v923_v9 }
0x1433   :  { %v943_v20 = vpack.c.bf16 %v942_v19, %v942_v19 }
0x1435   :  { %948 = vrot.lane.b32.xlu2 %v943_v20, %s2166_s4 }
0x148f   :  { %v949_v21 = vpop.permute.xlu2 %948 }
0x1490   :  { %1805 = vmatmul.msk.bf16.vlgmr.msra.gmra.mxu2 %vm156_vm0, %v949_v21  ;;  %1806 = vmatmul.msk.bf16.vlgmr.msra.gmra.mxu3 %vm156_vm0, %v949_v21 }
0x1491   :  { %1250 = vmatpush.bf16.msra.mxu2 %v2428_v37  ;;  %1266 = vmatpush.bf16.msra.mxu3 %v2433_v38 }
0x1495   :  { %1251 = vmatpush.bf16.msra.mxu2 %v2445_v41  ;;  %1267 = vmatpush.bf16.msra.mxu3 %v2440_v40 }
0x14a0   :  { %1812 = vmatmul.msk.bf16.vlgmr.msrb.gmra.mxu3 %vm156_vm0, %v1810_v55  ;;  %v2579_v55 = vld [vmem:[%s2693_s3 + $0x8] sm:$0xff] }
0x14a1   :  { %1376 = vmatpush.bf16.msrb.mxu3 %v2428_v37 }
0x14a5   :  { %1377 = vmatpush.bf16.msrb.mxu3 %v2445_v41 }
0x1513   :  { %v974_v25 = vpop.f32.mrf.mxu2  ;;  %v989_v6 = vpop.f32.mrf.mxu3 }
0x1514   :  { %v975_v26 = vadd.f32 %v2496_v24, %v974_v25  ;;  %v1006_v27 = vadd.f32 %v1005_v22, %v989_v6 }
0x1516   :  { %978 = vst [vmem:[#allocation10] sm:$0xff] %v975_v26  ;;  %v1009_v28 = vadd.f32 %v2459_v52, %v1006_v27 }
0x1518   :  { %1983 = vtanh.f32 %v1009_v28  ;;  %v1808_v30 = vmul.f32 -1.442695, %v1009_v28 }
0x151a   :  { %1985 = vpow2.f32 %v1808_v30 }
0x151b   :  { %v976_v33 = vpop.f32.mrf.mxu2  ;;  %v991_v0 = vpop.f32.mrf.mxu3 }
0x151e   :  { %v1984_v29 = vpop.eup %1983 }
0x151f   :  { %1032 = vrot.lane.b32.xlu0 %v1984_v29, %s2163_s21 }
0x1520   :  { %v1986_v31 = vpop.eup %1985 }
0x1521   :  { %v1013_v32 = vadd.f32 1.0, %v1986_v31  ;;  %v140_v31 = vlaneseq }
0x1523   :  { %1987 = vrcp.f32 %v1013_v32  ;;  %v1025_v43 = vand.u32 2147483648, %v1013_v32  ;;  %vm1019_vm9 = vweird.f32 %v1013_v32  ;;  %v1023_v44 = vand.u32 2147483647, %v1013_v32  ;;  %v1095_v57 = vpop.f32.mrf.mxu3 }
0x1525   :  { %v1026_v46 = vor.u32 1.1754944e-38, %v1025_v43  ;;  %vm1024_vm11 = vcmp.eq.f32.partialorder %v1023_v44, 8.507059e+37 }
0x1529   :  { %v1988_v34 = vpop.eup %1987 }
0x152a   :  { %v1015_v35 = vmul.f32 %v1988_v34, %v1013_v32  ;;  %vm1020_vm8 = vweird.f32 %v1988_v34  ;;  %v2526_v32 = vand.u32 127, %v140_v31 }
0x152b   :  { %vm1021_vm10 = vmor %vm1019_vm9, %vm1020_vm8  ;;  %v1097_v58 = vpop.f32.mrf.mxu3 }
0x152c   :  { %v1016_v36 = vsub.f32 1.0, %v1015_v35  ;;  %vm142_vm1 = vcmp.lt.s32.totalorder %v2526_v32, 32  ;;  %v2587_v58 = vld [vmem:[%s2693_s3] sm:$0xff] }
0x152e   :  { %v1017_v39 = vmul.f32 %v1988_v34, %v1016_v36 }
0x1530   :  { %v1018_v42 = vadd.f32 %v1988_v34, %v1017_v39 }
0x1532   :  { %v1022_v45 = vsel %vm1021_vm10, %v1988_v34, %v1018_v42 }
0x1533   :  { %v1027_v48 = vsel %vm1024_vm11, %v1026_v46, %v1022_v45 }
0x1534   :  { %v1030_v50 = vmul.f32 %v1027_v48, %v2464_v13 }
0x1591   :  { %v1033_v47 = vpop.permute.xlu0 %1032 }
0x1592   :  { %v1035_v49 = vmul.f32 %v1033_v47, %v1027_v48 }
0x1594   :  { %1037 = vrot.lane.b32.xlu1 %v1035_v49, %s2166_s4  ;;  %v2544_v49 = vld [vmem:[%s2693_s3 + $0x30] sm:$0xff] }
0x1606   :  { %v1038_v51 = vpop.permute.xlu1 %1037 }
0x1607   :  { %v1040_v53 = vadd.f32 %v1038_v51, %v1030_v50  ;;  %v2551_v50 = vld [vmem:[%s2693_s3 + $0x28] sm:$0xff]  ;;  %v2558_v51 = vld [vmem:[%s2693_s3 + $0x20] sm:$0xff] }
0x1609   :  { %1989 = vtanh.f32 %v1040_v53 }
0x160f   :  { %v1990_v54 = vpop.eup %1989 }
0x1610   :  { %1043 = vrot.lane.b32.xlu2 %v1990_v54, %s2163_s21  ;;  %v2572_v54 = vld [vmem:[%s2693_s3 + $0x10] sm:$0xff] }
0x166a   :  { %v1044_v2 = vpop.permute.xlu2 %1043 }
0x166b   :  { %v1046_v56 = vmul.f32 %v1044_v2, %v1027_v48  ;;  %v2538_v48 = vld [vmem:[%s2693_s3 + $0x38] sm:$0xff] }
0x166c   :  { %1230 = vmatpush.bf16.msra.mxu1 %v2538_v48 }
0x166d   :  { %v1047_v4 = vpack.c.bf16 %v1046_v56, %v1046_v56 }
0x166f   :  { %1049 = vrot.lane.b32.xlu0 %v1047_v4, %s2166_s4 }
0x1670   :  { %1231 = vmatpush.bf16.msra.mxu1 %v2544_v49 }
0x1674   :  { %1232 = vmatpush.bf16.msra.mxu1 %v2551_v50 }
0x1678   :  { %1233 = vmatpush.bf16.msra.mxu1 %v2558_v51 }
0x16e1   :  { %v1050_v59 = vpop.permute.xlu0 %1049 }
0x16e2   :  { %1809 = vmatmul.msk.bf16.vlgmr.msrb.gmra.mxu1 %vm156_vm0, %v1050_v59  ;;  %1811 = vmatmul.msk.bf16.vlgmr.msrb.gmra.mxu2 %vm156_vm0, %v1050_v59 }
0x16e3   :  { %1356 = vmatpush.bf16.msrb.mxu2 %v2538_v48 }
0x16e7   :  { %1357 = vmatpush.bf16.msrb.mxu2 %v2544_v49 }
0x16eb   :  { %1358 = vmatpush.bf16.msrb.mxu2 %v2551_v50 }
0x16ef   :  { %1359 = vmatpush.bf16.msrb.mxu2 %v2558_v51 }
0x175f   :  { %v1063_v60 = vpop.f32.mrf.mxu1 }
0x1760   :  { %v1064_v61 = vadd.f32 %v2496_v24, %v1063_v60 }
0x1762   :  { %1068 = vst [vmem:[#allocation10 + $0x8] sm:$0xff] %v1064_v61 }
0x1765   :  { %v1079_v62 = vpop.f32.mrf.mxu2 }
0x1766   :  { %v1096_v1 = vadd.f32 %v1095_v57, %v1079_v62 }
0x1767   :  { %v1065_v3 = vpop.f32.mrf.mxu1 }
0x1768   :  { %v1099_v63 = vadd.f32 %v2459_v52, %v1096_v1  ;;  %v2167_v3 = vmov 1.0|1.0  }
0x176a   :  { %1991 = vtanh.f32 %v1099_v63  ;;  %v1813_v8 = vmul.f32 -1.442695, %v1099_v63 }
0x176c   :  { %1993 = vpow2.f32 %v1813_v8 }
0x176d   :  { %v1081_v5 = vpop.f32.mrf.mxu2 }
0x1770   :  { %v1992_v7 = vpop.eup %1991 }
0x1771   :  { %1122 = vrot.lane.b32.xlu1 %v1992_v7, %s2163_s21 }
0x1772   :  { %v1994_v9 = vpop.eup %1993 }
0x1773   :  { %v1103_v10 = vadd.f32 1.0, %v1994_v9 }
0x1775   :  { %1995 = vrcp.f32 %v1103_v10  ;;  %v1115_v18 = vand.u32 2147483648, %v1103_v10  ;;  %vm1109_vm13 = vweird.f32 %v1103_v10  ;;  %v1113_v19 = vand.u32 2147483647, %v1103_v10 }
0x1777   :  { %v1116_v21 = vor.u32 1.1754944e-38, %v1115_v18  ;;  %vm1114_vm15 = vcmp.eq.f32.partialorder %v1113_v19, 8.507059e+37 }
0x177b   :  { %v1996_v11 = vpop.eup %1995 }
0x177c   :  { %v1105_v12 = vmul.f32 %v1996_v11, %v1103_v10  ;;  %vm1110_vm12 = vweird.f32 %v1996_v11 }
0x177d   :  { %vm1111_vm14 = vmor %vm1109_vm13, %vm1110_vm12 }
0x177e   :  { %v1106_v13 = vsub.f32 1.0, %v1105_v12 }
0x1780   :  { %v1107_v14 = vmul.f32 %v1996_v11, %v1106_v13 }
0x1782   :  { %v1108_v16 = vadd.f32 %v1996_v11, %v1107_v14 }
0x1784   :  { %v1112_v20 = vsel %vm1111_vm14, %v1996_v11, %v1108_v16 }
0x1785   :  { %v1117_v23 = vsel %vm1114_vm15, %v1116_v21, %v1112_v20 }
0x1786   :  { %v1120_v6 = vmul.f32 %v1117_v23, %v1040_v53  ;;  %v2565_v53 = vld [vmem:[%s2693_s3 + $0x18] sm:$0xff]  ;;  %s2168_s3 = smov [#allocation10]  }
0x1787   :  { %1234 = vmatpush.bf16.msra.mxu1 %v2565_v53  ;;  %1360 = vmatpush.bf16.msrb.mxu2 %v2565_v53  ;;  %s1715_s27 = sshll.u32 %s2168_s3, 4  ;;  %s1716_s27 = int_to_ptr.vmem [resolvable:$true] %s1715_s27 }
0x178b   :  { %1235 = vmatpush.bf16.msra.mxu1 %v2572_v54  ;;  %1361 = vmatpush.bf16.msrb.mxu2 %v2572_v54 }
0x178f   :  { %1236 = vmatpush.bf16.msra.mxu1 %v2579_v55  ;;  %1362 = vmatpush.bf16.msrb.mxu2 %v2579_v55 }
0x1793   :  { %1237 = vmatpush.bf16.msra.mxu1 %v2587_v58  ;;  %1363 = vmatpush.bf16.msrb.mxu2 %v2587_v58 }
0x1797   :  { %1450 = vmatpush.bf16.msrb.mxu1 %v2468_v15 }
0x179b   :  { %1451 = vmatpush.bf16.msrb.mxu1 %v2475_v17 }
0x17e3   :  { %v1123_v22 = vpop.permute.xlu1 %1122 }
0x17e4   :  { %v1125_v25 = vmul.f32 %v1123_v22, %v1117_v23 }
0x17e6   :  { %1127 = vrot.lane.b32.xlu2 %v1125_v25, %s2166_s4 }
0x1840   :  { %v1128_v26 = vpop.permute.xlu2 %1127 }
0x1841   :  { %v2517_v27 = vadd.f32 %v1128_v26, %v1120_v6 }
0x1843   :  { %1997 = vtanh.f32 %v2517_v27 }
0x1849   :  { %v1998_v28 = vpop.eup %1997 }
0x184a   :  { %1133 = vrot.lane.b32.xlu0 %v1998_v28, %s2163_s21 }
0x18bc   :  { %v1134_v33 = vpop.permute.xlu0 %1133 }
0x18bd   :  { %v1136_v0 = vmul.f32 %v1134_v33, %v1117_v23 }
0x18bf   :  { %v1137_v29 = vpack.c.bf16 %v1136_v0, %v1136_v0 }
0x18c1   :  { %1139 = vrot.lane.b32.xlu1 %v1137_v29, %s2166_s4 }
0x1933   :  { %v1140_v30 = vpop.permute.xlu1 %1139 }
0x1934   :  { %1814 = vmatmul.msk.bf16.vlgmr.msra.gmra.mxu0 %vm156_vm0, %v1140_v30  ;;  %1850 = vmatmul.msk.bf16.vlgmr.msra.gmra.mxu2 %vm156_vm0, %v1140_v30 }
0x1935   :  { %1392 = vmatpush.bf16.msra.mxu0 %v2433_v38  ;;  %1576 = vmatpush.bf16.msra.mxu2 %v2468_v15 }
0x1939   :  { %1393 = vmatpush.bf16.msra.mxu0 %v2440_v40  ;;  %1577 = vmatpush.bf16.msra.mxu2 %v2475_v17 }
0x19b1   :  { %v1153_v34 = vpop.f32.mrf.mxu0 }
0x19b2   :  { %v1154_v35 = vadd.f32 %v2496_v24, %v1153_v34 }
0x19b4   :  { %1158 = vst [vmem:[#allocation10 + $0x10] sm:$0xff] %v1154_v35  ;;  %v1159_v36 = vsel %vm142_vm1, %v1154_v35, -1e+30 }
0x19b5   :  { %1160 = vmax.xlane.f32.xlu2 %v1159_v36 }
0x19b7   :  { %v2532_v39 = vpop.f32.mrf.mxu2 }
0x19b9   :  { %v1155_v42 = vpop.f32.mrf.mxu0 }
0x19bf   :  { %v1255_v43 = vpop.f32.mrf.mxu2 }
0x1a28   :  { %v1161_v44 = vpop.xlane.xlu2 %1160 }
0x1a29   :  { %vm1162_vm2 = vcmp.eq.f32.partialorder %v1159_v36, %v1161_v44 }
0x1a2a   :  { %v1163_v45 = vsel %vm1162_vm2, %v2526_v32, 128 }
0x1a2b   :  { %v1165_v46 = vshra.s32 %v1163_v45, 16  ;;  %v1164_v2 = vand.u32 65535, %v1163_v45 }
0x1a2d   :  { %v1167_v47 = vcvt.s32.f32 %v1165_v46  ;;  %v1166_v4 = vcvt.s32.f32 %v1164_v2 }
0x1a2f   :  { %1168 = vmin.xlane.f32.xlu0 %v1167_v47 }
0x1aa2   :  { %v1169_v56 = vpop.xlane.xlu0 %1168 }
0x1aa3   :  { %vm1170_vm3 = vcmp.eq.f32.partialorder %v1167_v47, %v1169_v56  ;;  %v1175_v59 = vcvt.f32.s32 %v1169_v56 }
0x1aa4   :  { %v1171_v57 = vsel %vm1170_vm3, %v1166_v4, inf }
0x1aa5   :  { %1172 = vmin.xlane.f32.xlu1 %v1171_v57  ;;  %v1176_v61 = vshll.u32 %v1175_v59, 16 }
0x1b18   :  { %v1173_v60 = vpop.xlane.xlu1 %1172 }
0x1b19   :  { %v1174_v62 = vcvt.f32.s32 %v1173_v60 }
0x1b1b   :  { %v1177_v1 = vadd.s32 %v1176_v61, %v1174_v62 }
0x1b1d   :  { %vm1178_vm4 = vcmp.eq.s32.totalorder %v1177_v1, %v2526_v32 }
0x1b1e   :  { %vm1848_vm5 = vmpackc.low %vm1178_vm4, %vm1178_vm4 }
0x1b1f   :  { %1849 = vmatmul.msk.bf16.vlgmr.msra.gmra.mxu1 %vm1848_vm5, %v2167_v3 }
0x1b20   :  { %1518 = vmatpush.bf16.msra.mxu1 %v2433_v38 }
0x1b24   :  { %1519 = vmatpush.bf16.msra.mxu1 %v2440_v40 }
0x1b9c   :  { %v1239_v63 = vpop.f32.mrf.mxu1 }
0x1b9d   :  { %v1243_v5 = vpack.c.bf16 %v1239_v63, %v1239_v63 }
0x1b9f   :  { %1851 = vmatmul.msk.bf16.vlgmr.msra.gmra.mxu3 %vm156_vm0, %v1243_v5 }
0x1ba0   :  { %1482 = vmatpush.bf16.msra.mxu3 %v2538_v48 }
0x1ba4   :  { %v1241_v7 = vpop.f32.mrf.mxu1  ;;  %1483 = vmatpush.bf16.msra.mxu3 %v2544_v49 }
0x1ba8   :  { %1484 = vmatpush.bf16.msra.mxu3 %v2551_v50 }
0x1bac   :  { %1485 = vmatpush.bf16.msra.mxu3 %v2558_v51 }
0x1bb0   :  { %1486 = vmatpush.bf16.msra.mxu3 %v2565_v53 }
0x1bb4   :  { %1487 = vmatpush.bf16.msra.mxu3 %v2572_v54 }
0x1bb8   :  { %1488 = vmatpush.bf16.msra.mxu3 %v2579_v55 }
0x1bbc   :  { %1489 = vmatpush.bf16.msra.mxu3 %v2587_v58 }
0x1c22   :  { %v1269_v8 = vpop.f32.mrf.mxu3 }
0x1c23   :  { %v1270_v9 = vadd.f32 %v1269_v8, %v2532_v39 }
0x1c25   :  { %v1273_v10 = vadd.f32 %v2459_v52, %v1270_v9 }
0x1c27   :  { %1999 = vtanh.f32 %v1273_v10  ;;  %v1852_v13 = vmul.f32 -1.442695, %v1273_v10 }
0x1c29   :  { %2001 = vpow2.f32 %v1852_v13 }
0x1c2a   :  { %v1271_v11 = vpop.f32.mrf.mxu3 }
0x1c2d   :  { %v2000_v12 = vpop.eup %1999 }
0x1c2e   :  { %1296 = vrot.lane.b32.xlu2 %v2000_v12, %s2163_s21 }
0x1c2f   :  { %v2002_v14 = vpop.eup %2001 }
0x1c30   :  { %v1277_v16 = vadd.f32 1.0, %v2002_v14 }
0x1c32   :  { %2003 = vrcp.f32 %v1277_v16  ;;  %v1289_v23 = vand.u32 2147483648, %v1277_v16  ;;  %vm1283_vm7 = vweird.f32 %v1277_v16  ;;  %v1287_v25 = vand.u32 2147483647, %v1277_v16 }
0x1c34   :  { %v1290_v26 = vor.u32 1.1754944e-38, %v1289_v23  ;;  %vm1288_vm9 = vcmp.eq.f32.partialorder %v1287_v25, 8.507059e+37 }
0x1c38   :  { %v2004_v18 = vpop.eup %2003 }
0x1c39   :  { %v1279_v19 = vmul.f32 %v2004_v18, %v1277_v16  ;;  %vm1284_vm6 = vweird.f32 %v2004_v18 }
0x1c3a   :  { %vm1285_vm8 = vmor %vm1283_vm7, %vm1284_vm6 }
0x1c3b   :  { %v1280_v20 = vsub.f32 1.0, %v1279_v19 }
0x1c3d   :  { %v1281_v21 = vmul.f32 %v2004_v18, %v1280_v20 }
0x1c3f   :  { %v1282_v22 = vadd.f32 %v2004_v18, %v1281_v21 }
0x1c41   :  { %v1286_v6 = vsel %vm1285_vm8, %v2004_v18, %v1282_v22 }
0x1c42   :  { %v1291_v33 = vsel %vm1288_vm9, %v1290_v26, %v1286_v6 }
0x1c43   :  { %v1294_v29 = vmul.f32 %v1291_v33, %v2517_v27 }
0x1c88   :  { %v1297_v28 = vpop.permute.xlu2 %1296 }
0x1c89   :  { %v1299_v0 = vmul.f32 %v1297_v28, %v1291_v33 }
0x1c8b   :  { %1301 = vrot.lane.b32.xlu0 %v1299_v0, %s2166_s4 }
0x1cfd   :  { %v1302_v30 = vpop.permute.xlu0 %1301 }
0x1cfe   :  { %v2613_v31 = vadd.f32 %v1302_v30, %v1294_v29 }
0x1d00   :  { %2005 = vtanh.f32 %v2613_v31 }
0x1d06   :  { %v2006_v34 = vpop.eup %2005 }
0x1d07   :  { %1307 = vrot.lane.b32.xlu1 %v2006_v34, %s2163_s21 }
0x1d79   :  { %v1308_v35 = vpop.permute.xlu1 %1307 }
0x1d7a   :  { %v1310_v36 = vmul.f32 %v1308_v35, %v1291_v33 }
0x1d7c   :  { %v1311_v39 = vpack.c.bf16 %v1310_v36, %v1310_v36 }
0x1d7e   :  { %1313 = vrot.lane.b32.xlu2 %v1311_v39, %s2166_s4 }
0x1dd8   :  { %v1314_v42 = vpop.permute.xlu2 %1313 }
0x1dd9   :  { %1853 = vmatmul.msk.bf16.vlgmr.msrb.gmra.mxu0 %vm156_vm0, %v1314_v42  ;;  %1857 = vmatmul.msk.bf16.vlgmr.msrb.gmra.mxu3 %vm156_vm0, %v1314_v42 }
0x1dda   :  { %1502 = vmatpush.bf16.msrb.mxu0 %v2428_v37  ;;  %1702 = vmatpush.bf16.msrb.mxu3 %v2468_v15 }
0x1dde   :  { %1503 = vmatpush.bf16.msrb.mxu0 %v2445_v41  ;;  %1703 = vmatpush.bf16.msrb.mxu3 %v2475_v17 }
0x1e56   :  { %v1327_v27 = vpop.f32.mrf.mxu0 }
0x1e57   :  { %v1328_v43 = vadd.f32 %v2496_v24, %v1327_v27 }
0x1e59   :  { %1332 = vst [vmem:[#allocation10 + $0x18] sm:$0xff] %v1328_v43  ;;  %v1333_v44 = vsel %vm142_vm1, %v1328_v43, -1e+30 }
0x1e5a   :  { %1334 = vmax.xlane.f32.xlu0 %v1333_v44 }
0x1e5c   :  { %v1379_v45 = vpop.f32.mrf.mxu3 }
0x1e5e   :  { %v1329_v46 = vpop.f32.mrf.mxu0 }
0x1e64   :  { %v1381_v47 = vpop.f32.mrf.mxu3 }
0x1ecd   :  { %v1335_v2 = vpop.xlane.xlu0 %1334 }
0x1ece   :  { %vm1336_vm10 = vcmp.eq.f32.partialorder %v1333_v44, %v1335_v2 }
0x1ecf   :  { %v1337_v56 = vsel %vm1336_vm10, %v2526_v32, 128 }
0x1ed0   :  { %v1339_v15 = vshra.s32 %v1337_v56, 16  ;;  %v1338_v57 = vand.u32 65535, %v1337_v56 }
0x1ed2   :  { %v1341_v4 = vcvt.s32.f32 %v1339_v15  ;;  %v1340_v59 = vcvt.s32.f32 %v1338_v57 }
0x1ed4   :  { %1342 = vmin.xlane.f32.xlu2 %v1341_v4 }
0x1f47   :  { %v1343_v17 = vpop.xlane.xlu2 %1342 }
0x1f48   :  { %vm1344_vm11 = vcmp.eq.f32.partialorder %v1341_v4, %v1343_v17  ;;  %v1349_v61 = vcvt.f32.s32 %v1343_v17 }
0x1f49   :  { %v1345_v60 = vsel %vm1344_vm11, %v1340_v59, inf }
0x1f4a   :  { %1346 = vmin.xlane.f32.xlu1 %v1345_v60  ;;  %v1350_v1 = vshll.u32 %v1349_v61, 16 }
0x1fbd   :  { %v1347_v62 = vpop.xlane.xlu1 %1346 }
0x1fbe   :  { %v1348_v63 = vcvt.f32.s32 %v1347_v62 }
0x1fc0   :  { %v1351_v5 = vadd.s32 %v1350_v1, %v1348_v63 }
0x1fc2   :  { %vm1352_vm12 = vcmp.eq.s32.totalorder %v1351_v5, %v2526_v32 }
0x1fc3   :  { %vm1855_vm13 = vmpackc.low %vm1352_vm12, %vm1352_vm12 }
0x1fc4   :  { %1856 = vmatmul.msk.bf16.vlgmr.msrb.gmra.mxu2 %vm1855_vm13, %v2167_v3 }
0x1fc5   :  { %1644 = vmatpush.bf16.msrb.mxu2 %v2433_v38 }
0x1fc9   :  { %1645 = vmatpush.bf16.msrb.mxu2 %v2440_v40 }
0x2047   :  { %v1365_v7 = vpop.f32.mrf.mxu2 }
0x2048   :  { %v1369_v8 = vpack.c.bf16 %v1365_v7, %v1365_v7 }
0x204a   :  { %1858 = vmatmul.msk.bf16.vlgmr.msra.gmra.mxu0 %vm156_vm0, %v1369_v8 }
0x204b   :  { %1608 = vmatpush.bf16.msra.mxu0 %v2538_v48 }
0x204f   :  { %v1367_v9 = vpop.f32.mrf.mxu2  ;;  %1609 = vmatpush.bf16.msra.mxu0 %v2544_v49 }
0x2053   :  { %1610 = vmatpush.bf16.msra.mxu0 %v2551_v50 }
0x2057   :  { %1611 = vmatpush.bf16.msra.mxu0 %v2558_v51 }
0x205b   :  { %1612 = vmatpush.bf16.msra.mxu0 %v2565_v53 }
0x205f   :  { %1613 = vmatpush.bf16.msra.mxu0 %v2572_v54 }
0x2063   :  { %1614 = vmatpush.bf16.msra.mxu0 %v2579_v55 }
0x2067   :  { %1615 = vmatpush.bf16.msra.mxu0 %v2587_v58 }
0x20c7   :  { %v1395_v38 = vpop.f32.mrf.mxu0 }
0x20c8   :  { %v1396_v40 = vadd.f32 %v1395_v38, %v1379_v45 }
0x20ca   :  { %v1399_v10 = vadd.f32 %v2459_v52, %v1396_v40 }
0x20cc   :  { %2007 = vtanh.f32 %v1399_v10  ;;  %v1859_v49 = vmul.f32 -1.442695, %v1399_v10 }
0x20ce   :  { %2009 = vpow2.f32 %v1859_v49 }
0x20cf   :  { %v1397_v48 = vpop.f32.mrf.mxu0 }
0x20d2   :  { %v2008_v11 = vpop.eup %2007 }
0x20d3   :  { %1422 = vrot.lane.b32.xlu0 %v2008_v11, %s2163_s21 }
0x20d4   :  { %v2010_v50 = vpop.eup %2009 }
0x20d5   :  { %v1403_v51 = vadd.f32 1.0, %v2010_v50 }
0x20d7   :  { %2011 = vrcp.f32 %v1403_v51  ;;  %v1415_v58 = vand.u32 2147483648, %v1403_v51  ;;  %vm1409_vm15 = vweird.f32 %v1403_v51  ;;  %v1413_v14 = vand.u32 2147483647, %v1403_v51 }
0x20d9   :  { %v1416_v18 = vor.u32 1.1754944e-38, %v1415_v58  ;;  %vm1414_vm3 = vcmp.eq.f32.partialorder %v1413_v14, 8.507059e+37 }
0x20dd   :  { %v2012_v53 = vpop.eup %2011 }
0x20de   :  { %v1405_v54 = vmul.f32 %v2012_v53, %v1403_v51  ;;  %vm1410_vm14 = vweird.f32 %v2012_v53 }
0x20df   :  { %vm1411_vm2 = vmor %vm1409_vm15, %vm1410_vm14 }
0x20e0   :  { %v1406_v12 = vsub.f32 1.0, %v1405_v54 }
0x20e2   :  { %v1407_v55 = vmul.f32 %v2012_v53, %v1406_v12 }
0x20e4   :  { %v1408_v13 = vadd.f32 %v2012_v53, %v1407_v55 }
0x20e6   :  { %v1412_v16 = vsel %vm1411_vm2, %v2012_v53, %v1408_v13 }
0x20e7   :  { %v1417_v20 = vsel %vm1414_vm3, %v1416_v18, %v1412_v16 }
0x20e8   :  { %v1420_v22 = vmul.f32 %v1417_v20, %v2613_v31 }
0x2145   :  { %v1423_v19 = vpop.permute.xlu0 %1422 }
0x2146   :  { %v1425_v21 = vmul.f32 %v1423_v19, %v1417_v20 }
0x2148   :  { %1427 = vrot.lane.b32.xlu2 %v1425_v21, %s2166_s4 }
0x21a2   :  { %v1428_v23 = vpop.permute.xlu2 %1427 }
0x21a3   :  { %v2645_v25 = vadd.f32 %v1428_v23, %v1420_v22 }
0x21a5   :  { %2013 = vtanh.f32 %v2645_v25 }
0x21ab   :  { %v2014_v6 = vpop.eup %2013 }
0x21ac   :  { %1433 = vrot.lane.b32.xlu1 %v2014_v6, %s2163_s21 }
0x221e   :  { %v1434_v26 = vpop.permute.xlu1 %1433 }
0x221f   :  { %v1436_v28 = vmul.f32 %v1434_v26, %v1417_v20 }
0x2221   :  { %v1437_v33 = vpack.c.bf16 %v1436_v28, %v1436_v28 }
0x2223   :  { %1439 = vrot.lane.b32.xlu0 %v1437_v33, %s2166_s4 }
0x2295   :  { %v1440_v0 = vpop.permute.xlu0 %1439 }
0x2296   :  { %1860 = vmatmul.msk.bf16.vlgmr.msrb.gmra.mxu1 %vm156_vm0, %v1440_v0  ;;  %1864 = vmatmul.msk.bf16.vlgmr.msrb.gmra.mxu0 %vm156_vm0, %v1440_v0 }
0x2297   :  { %1628 = vmatpush.bf16.msrb.mxu1 %v2428_v37 }
0x229b   :  { %1629 = vmatpush.bf16.msrb.mxu1 %v2445_v41 }
0x2313   :  { %v1453_v29 = vpop.f32.mrf.mxu1  ;;  %v1505_v30 = vpop.f32.mrf.mxu0 }
0x2314   :  { %v1454_v31 = vadd.f32 %v2496_v24, %v1453_v29 }
0x2316   :  { %1458 = vst [vmem:[#allocation10 + $0x20] sm:$0xff] %v1454_v31  ;;  %v1459_v34 = vsel %vm142_vm1, %v1454_v31, -1e+30 }
0x2317   :  { %1460 = vmax.xlane.f32.xlu2 %v1459_v34 }
0x231b   :  { %v1455_v35 = vpop.f32.mrf.mxu1  ;;  %v1507_v36 = vpop.f32.mrf.mxu0 }
0x238a   :  { %v1461_v39 = vpop.xlane.xlu2 %1460 }
0x238b   :  { %vm1462_vm4 = vcmp.eq.f32.partialorder %v1459_v34, %v1461_v39 }
0x238c   :  { %v1463_v42 = vsel %vm1462_vm4, %v2526_v32, 128 }
0x238d   :  { %v1465_v27 = vshra.s32 %v1463_v42, 16  ;;  %v1464_v37 = vand.u32 65535, %v1463_v42 }
0x238f   :  { %v1467_v43 = vcvt.s32.f32 %v1465_v27  ;;  %v1466_v44 = vcvt.s32.f32 %v1464_v37 }
0x2391   :  { %1468 = vmin.xlane.f32.xlu0 %v1467_v43 }
0x2404   :  { %v1469_v41 = vpop.xlane.xlu0 %1468 }
0x2405   :  { %vm1470_vm5 = vcmp.eq.f32.partialorder %v1467_v43, %v1469_v41  ;;  %v1475_v46 = vcvt.f32.s32 %v1469_v41 }
0x2406   :  { %v1471_v45 = vsel %vm1470_vm5, %v1466_v44, inf }
0x2407   :  { %1472 = vmin.xlane.f32.xlu1 %v1471_v45  ;;  %v1476_v2 = vshll.u32 %v1475_v46, 16 }
0x247a   :  { %v1473_v47 = vpop.xlane.xlu1 %1472 }
0x247b   :  { %v1474_v56 = vcvt.f32.s32 %v1473_v47 }
0x247d   :  { %v1477_v15 = vadd.s32 %v1476_v2, %v1474_v56 }
0x247f   :  { %vm1478_vm6 = vcmp.eq.s32.totalorder %v1477_v15, %v2526_v32 }
0x2480   :  { %vm1862_vm7 = vmpackc.low %vm1478_vm6, %vm1478_vm6 }
0x2481   :  { %1863 = vmatmul.msk.bf16.vlgmr.msra.gmra.mxu3 %vm1862_vm7, %v2167_v3 }
0x2504   :  { %v1491_v4 = vpop.f32.mrf.mxu3 }
0x2505   :  { %v1495_v57 = vpack.c.bf16 %v1491_v4, %v1491_v4 }
0x2507   :  { %1865 = vmatmul.msk.bf16.vlgmr.msra.gmra.mxu1 %vm156_vm0, %v1495_v57 }
0x250c   :  { %v1493_v17 = vpop.f32.mrf.mxu3 }
0x2584   :  { %v1521_v59 = vpop.f32.mrf.mxu1 }
0x2585   :  { %v1522_v60 = vadd.f32 %v1521_v59, %v1505_v30 }
0x2587   :  { %v1525_v61 = vadd.f32 %v2459_v52, %v1522_v60 }
0x2589   :  { %2015 = vtanh.f32 %v1525_v61  ;;  %v1866_v63 = vmul.f32 -1.442695, %v1525_v61 }
0x258b   :  { %2017 = vpow2.f32 %v1866_v63 }
0x258c   :  { %v1523_v62 = vpop.f32.mrf.mxu1 }
0x258f   :  { %v2016_v1 = vpop.eup %2015 }
0x2590   :  { %1548 = vrot.lane.b32.xlu2 %v2016_v1, %s2163_s21 }
0x2591   :  { %v2018_v5 = vpop.eup %2017 }
0x2592   :  { %v1529_v7 = vadd.f32 1.0, %v2018_v5 }
0x2594   :  { %2019 = vrcp.f32 %v1529_v7  ;;  %v1541_v48 = vand.u32 2147483648, %v1529_v7  ;;  %vm1535_vm9 = vweird.f32 %v1529_v7  ;;  %v1539_v11 = vand.u32 2147483647, %v1529_v7 }
0x2596   :  { %v1542_v50 = vor.u32 1.1754944e-38, %v1541_v48  ;;  %vm1540_vm11 = vcmp.eq.f32.partialorder %v1539_v11, 8.507059e+37 }
0x259a   :  { %v2020_v8 = vpop.eup %2019 }
0x259b   :  { %v1531_v9 = vmul.f32 %v2020_v8, %v1529_v7  ;;  %vm1536_vm8 = vweird.f32 %v2020_v8 }
0x259c   :  { %vm1537_vm10 = vmor %vm1535_vm9, %vm1536_vm8 }
0x259d   :  { %v1532_v38 = vsub.f32 1.0, %v1531_v9 }
0x259f   :  { %v1533_v40 = vmul.f32 %v2020_v8, %v1532_v38 }
0x25a1   :  { %v1534_v10 = vadd.f32 %v2020_v8, %v1533_v40 }
0x25a3   :  { %v1538_v49 = vsel %vm1537_vm10, %v2020_v8, %v1534_v10 }
0x25a4   :  { %v1543_v53 = vsel %vm1540_vm11, %v1542_v50, %v1538_v49 }
0x25a5   :  { %v1546_v12 = vmul.f32 %v1543_v53, %v2645_v25 }
0x25ea   :  { %v1549_v51 = vpop.permute.xlu2 %1548 }
0x25eb   :  { %v1551_v54 = vmul.f32 %v1549_v51, %v1543_v53 }
0x25ed   :  { %1553 = vrot.lane.b32.xlu0 %v1551_v54, %s2166_s4 }
0x265f   :  { %v1554_v55 = vpop.permute.xlu0 %1553 }
0x2660   :  { %v2665_v13 = vadd.f32 %v1554_v55, %v1546_v12 }
0x2662   :  { %2021 = vtanh.f32 %v2665_v13 }
0x2668   :  { %v2022_v58 = vpop.eup %2021 }
0x2669   :  { %1559 = vrot.lane.b32.xlu1 %v2022_v58, %s2163_s21 }
0x26db   :  { %v1560_v14 = vpop.permute.xlu1 %1559 }
0x26dc   :  { %v1562_v16 = vmul.f32 %v1560_v14, %v1543_v53 }
0x26de   :  { %v1563_v18 = vpack.c.bf16 %v1562_v16, %v1562_v16 }
0x26e0   :  { %1565 = vrot.lane.b32.xlu0 %v1563_v18, %s2166_s4 }
0x2752   :  { %v1566_v19 = vpop.permute.xlu0 %1565 }
0x2753   :  { %1867 = vmatmul.msk.bf16.vlgmr.msra.gmra.mxu2 %vm156_vm0, %v1566_v19  ;;  %1871 = vmatmul.msk.bf16.vlgmr.msrb.gmra.mxu1 %vm156_vm0, %v1566_v19 }
0x27d0   :  { %v1631_v20 = vpop.f32.mrf.mxu1 }
0x27d6   :  { %v1579_v21 = vpop.f32.mrf.mxu2 }
0x27d7   :  { %v1580_v22 = vadd.f32 %v2496_v24, %v1579_v21 }
0x27d8   :  { %v1633_v23 = vpop.f32.mrf.mxu1 }
0x27d9   :  { %1584 = vst [vmem:[#allocation10 + $0x28] sm:$0xff] %v1580_v22  ;;  %v1585_v25 = vsel %vm142_vm1, %v1580_v22, -1e+30 }
0x27da   :  { %1586 = vmax.xlane.f32.xlu2 %v1585_v25 }
0x27de   :  { %v1581_v6 = vpop.f32.mrf.mxu2 }
0x284d   :  { %v1587_v26 = vpop.xlane.xlu2 %1586 }
0x284e   :  { %vm1588_vm12 = vcmp.eq.f32.partialorder %v1585_v25, %v1587_v26 }
0x284f   :  { %v1589_v28 = vsel %vm1588_vm12, %v2526_v32, 128 }
0x2850   :  { %v1591_v33 = vshra.s32 %v1589_v28, 16  ;;  %v1590_v29 = vand.u32 65535, %v1589_v28 }
0x2852   :  { %v1593_v0 = vcvt.s32.f32 %v1591_v33  ;;  %v1592_v31 = vcvt.s32.f32 %v1590_v29 }
0x2854   :  { %1594 = vmin.xlane.f32.xlu1 %v1593_v0 }
0x28c7   :  { %v1595_v30 = vpop.xlane.xlu1 %1594 }
0x28c8   :  { %vm1596_vm13 = vcmp.eq.f32.partialorder %v1593_v0, %v1595_v30  ;;  %v1601_v35 = vcvt.f32.s32 %v1595_v30 }
0x28c9   :  { %v1597_v34 = vsel %vm1596_vm13, %v1592_v31, inf }
0x28ca   :  { %1598 = vmin.xlane.f32.xlu0 %v1597_v34  ;;  %v1602_v39 = vshll.u32 %v1601_v35, 16 }
0x293d   :  { %v1599_v36 = vpop.xlane.xlu0 %1598 }
0x293e   :  { %v1600_v42 = vcvt.f32.s32 %v1599_v36 }
0x2940   :  { %v1603_v27 = vadd.s32 %v1602_v39, %v1600_v42 }
0x2942   :  { %vm1604_vm1 = vcmp.eq.s32.totalorder %v1603_v27, %v2526_v32 }
0x2943   :  { %vm1869_vm14 = vmpackc.low %vm1604_vm1, %vm1604_vm1 }
0x2944   :  { %1870 = vmatmul.msk.bf16.vlgmr.msra.gmra.mxu0 %vm1869_vm14, %v2167_v3 }
0x29c1   :  { %v1617_v43 = vpop.f32.mrf.mxu0 }
0x29c2   :  { %v1621_v37 = vpack.c.bf16 %v1617_v43, %v1617_v43 }
0x29c4   :  { %1872 = vmatmul.msk.bf16.vlgmr.msrb.gmra.mxu2 %vm156_vm0, %v1621_v37 }
0x29c9   :  { %v1619_v41 = vpop.f32.mrf.mxu0 }
0x2a47   :  { %v1647_v44 = vpop.f32.mrf.mxu2 }
0x2a48   :  { %v1648_v45 = vadd.f32 %v1647_v44, %v1631_v20 }
0x2a4a   :  { %v1651_v46 = vadd.f32 %v2459_v52, %v1648_v45 }
0x2a4c   :  { %2023 = vtanh.f32 %v1651_v46  ;;  %v1873_v56 = vmul.f32 -1.442695, %v1651_v46 }
0x2a4e   :  { %2025 = vpow2.f32 %v1873_v56 }
0x2a4f   :  { %v1649_v47 = vpop.f32.mrf.mxu2 }
0x2a52   :  { %v2024_v2 = vpop.eup %2023 }
0x2a53   :  { %1674 = vrot.lane.b32.xlu2 %v2024_v2, %s2163_s21 }
0x2a54   :  { %v2026_v32 = vpop.eup %2025 }
0x2a55   :  { %v1655_v15 = vadd.f32 1.0, %v2026_v32 }
0x2a57   :  { %2027 = vrcp.f32 %v1655_v15  ;;  %v1667_v60 = vand.u32 2147483648, %v1655_v15  ;;  %vm1661_vm2 = vweird.f32 %v1655_v15  ;;  %v1665_v61 = vand.u32 2147483647, %v1655_v15 }
0x2a59   :  { %v1668_v62 = vor.u32 1.1754944e-38, %v1667_v60  ;;  %vm1666_vm4 = vcmp.eq.f32.partialorder %v1665_v61, 8.507059e+37 }
0x2a5d   :  { %v2028_v3 = vpop.eup %2027 }
0x2a5e   :  { %v1657_v4 = vmul.f32 %v2028_v3, %v1655_v15  ;;  %vm1662_vm15 = vweird.f32 %v2028_v3 }
0x2a5f   :  { %vm1663_vm3 = vmor %vm1661_vm2, %vm1662_vm15 }
0x2a60   :  { %v1658_v57 = vsub.f32 1.0, %v1657_v4 }
0x2a62   :  { %v1659_v17 = vmul.f32 %v2028_v3, %v1658_v57 }
0x2a64   :  { %v1660_v59 = vadd.f32 %v2028_v3, %v1659_v17 }
0x2a66   :  { %v1664_v52 = vsel %vm1663_vm3, %v2028_v3, %v1660_v59 }
0x2a67   :  { %v1669_v63 = vsel %vm1666_vm4, %v1668_v62, %v1664_v52 }
0x2a68   :  { %v1672_v7 = vmul.f32 %v1669_v63, %v2665_v13 }
0x2aad   :  { %v1675_v1 = vpop.permute.xlu2 %1674 }
0x2aae   :  { %v1677_v5 = vmul.f32 %v1675_v1, %v1669_v63 }
0x2ab0   :  { %1679 = vrot.lane.b32.xlu1 %v1677_v5, %s2166_s4 }
0x2b22   :  { %v1680_v8 = vpop.permute.xlu1 %1679 }
0x2b23   :  { %v1682_v9 = vadd.f32 %v1680_v8, %v1672_v7 }
0x2b25   :  { %2029 = vtanh.f32 %v1682_v9 }
0x2b2b   :  { %v2030_v38 = vpop.eup %2029 }
0x2b2c   :  { %1685 = vrot.lane.b32.xlu0 %v2030_v38, %s2163_s21  ;;  %s2169_s21 = smov 128  }
0x2b9e   :  { %v1686_v40 = vpop.permute.xlu0 %1685 }
0x2b9f   :  { %v1688_v10 = vmul.f32 %v1686_v40, %v1669_v63 }
0x2ba1   :  { %v1689_v48 = vpack.c.bf16 %v1688_v10, %v1688_v10 }
0x2ba3   :  { %1691 = vrot.lane.b32.xlu2 %v1689_v48, %s2166_s4 }
0x2bfd   :  { %v1692_v11 = vpop.permute.xlu2 %1691 }
0x2bfe   :  { %1874 = vmatmul.msk.bf16.vlgmr.msrb.gmra.mxu3 %vm156_vm0, %v1692_v11 }
0x2c81   :  { %v1705_v49 = vpop.f32.mrf.mxu3 }
0x2c82   :  { %v1706_v50 = vadd.f32 %v2496_v24, %v1705_v49 }
0x2c84   :  { %1710 = vst [vmem:[#allocation10 + $0x30] sm:$0xff] %v1706_v50 }
0x2c85   :  { %1723 = dma.vmem_to_hbm [thread:$0]  %s1716_s27, 896, %s1718_s5, [#allocation4], %s2169_s21, %s2169_s21, %s2170_s30  }
0x2c89   :  { %v1707_v51 = vpop.f32.mrf.mxu3 }
0x2c8a   :  { %2157 = dma.done.wait [#allocation4], 896  }
0x2c8b   :  { %2158 = vsyncadd [#allocation4], 4294966400 }
0x2c8c   :  { %1728 = vsyncpa [#allocation3], 1 }
0x2c8d   :  { %1729 = vsyncpa [#allocation6], 1 }
0x2c8e   :  { %1730 = vsyncpa [#allocation9], 1 }
0x2c8f   :  { %1731 = vsyncpa [#allocation4], 1 }

// kernel: tpu_custom_call.1
= control target key start
LH: loop header
LB: loop body
LE: loop exit
PB: predicated region body
PF: predicated region fallthrough
CT: control target
= control target key end

     0   :  { %17 = vsyncpa [#allocation3], 0  ;;  %s2690_s0 = inlined_call_operand.vmem [shape: s32[8,1], index: 0, kind: input, shape index: {}]   ;;  %s2691_s1 = inlined_call_operand.vmem [shape: bf16[8,8,32], index: 1, kind: input, shape index: {}]   ;;  %s2692_s2 = inlined_call_operand.hbm [shape: bf16[1,32], index: 2, kind: input, shape index: {}]   ;;  %s2693_s3 = inlined_call_operand.vmem [shape: bf16[128,32], index: 3, kind: input, shape index: {}]   ;;  %s2694_s4 = inlined_call_operand.vmem [shape: bf16[32,128], index: 4, kind: input, shape index: {}]   ;;  %s2695_s5 = inlined_call_operand.vmem [shape: bf16[32,128], index: 5, kind: input, shape index: {}]   ;;  %s2696_s6 = inlined_call_operand.hbm [shape: f32[1,128], index: 6, kind: input, shape index: {}]   ;;  %s2697_s7 = inlined_call_operand.vmem [shape: bf16[32,128], index: 7, kind: input, shape index: {}]   ;;  %s2698_s8 = inlined_call_operand.vmem [shape: bf16[32,128], index: 8, kind: input, shape index: {}]   ;;  %s2699_s9 = inlined_call_operand.hbm [shape: f32[1,128], index: 9, kind: input, shape index: {}]   ;;  %s2700_s10 = inlined_call_operand.hbm [shape: bf16[32,128], index: 10, kind: input, shape index: {}]   ;;  %s2701_s11 = inlined_call_operand.vmem [shape: f32[1,128], index: 11, kind: input, shape index: {}]   ;;  %s2702_s12 = inlined_call_operand.hbm [shape: f32[7,8,128], index: 12, kind: output, shape index: {}]  }
   0x1   :  { %18 = vsyncpa [#allocation6], 0 }
   0x2   :  { %19 = vsyncpa [#allocation9], 0  ;;  %s47_s23 = sshll.u32 %s2696_s6, 4  ;;  %s48_s23 = int_to_ptr.hbm [resolvable:$true] %s47_s23 }
   0x3   :  { %20 = vsyncpa [#allocation4], 0  ;;  %s2159_s24 = smov [#allocation5]   ;;  %s30_s28 = sshll.u32 %s2692_s2, 4  ;;  %s31_s28 = int_to_ptr.hbm [resolvable:$true] %s30_s28 }
   0x4   :  { %s49_s25 = sshll.u32 %s2159_s24, 4  ;;  %s2160_s29 = smov [#allocation2]   ;;  %s50_s25 = int_to_ptr.vmem [resolvable:$true] %s49_s25 }
   0x5   :  { %52 = dma.hbm_to_vmem [thread:$0]  %s48_s23, 16, %s50_s25, [#allocation6]  }
   0x6   :  { %s32_s30 = sshll.u32 %s2160_s29, 4  ;;  %s62_s15 = sshll.u32 %s2699_s9, 4  ;;  %s33_s30 = int_to_ptr.vmem [resolvable:$true] %s32_s30  ;;  %s63_s15 = int_to_ptr.hbm [resolvable:$true] %s62_s15 }
   0x7   :  { %35 = dma.hbm_to_vmem [thread:$0]  %s31_s28, 16, %s33_s30, [#allocation3]  }
   0x8   :  { %s72_s17 = sshll.u32 %s2700_s10, 4  ;;  %s2161_s18 = smov [#allocation7]   ;;  %s73_s17 = int_to_ptr.hbm [resolvable:$true] %s72_s17 }
   0x9   :  { %s64_s19 = sshll.u32 %s2161_s18, 4  ;;  %s2162_s2 = smov [#allocation8]   ;;  %s65_s19 = int_to_ptr.vmem [resolvable:$true] %s64_s19 }
   0xa   :  { %67 = dma.hbm_to_vmem [thread:$0]  %s63_s15, 16, %s65_s19, [#allocation6]  }
   0xb   :  { %s74_s20 = sshll.u32 %s2162_s2, 4  ;;  %s2163_s21 = smov 64   ;;  %s75_s20 = int_to_ptr.vmem [resolvable:$true] %s74_s20 }
   0xc   :  { %s2164_s22 = smov 4  }
   0xd   :  { %80 = dma.hbm_to_vmem [thread:$0]  %s73_s17, 256, %s75_s20, [#allocation9], %s2163_s21, %s2163_s21, %s2164_s22  }
   0xe   :  { %2151 = dma.done.wait [#allocation3], 16  }
   0xf   :  { %2152 = vsyncadd [#allocation3], 4294967280 }
  0x10   :  { %2153 = dma.done.wait [#allocation6], 32  }
  0x11   :  { %2154 = vsyncadd [#allocation6], 4294967264 }
  0x12   :  { %2155 = dma.done.wait [#allocation9], 256  }
  0x13   :  { %2156 = vsyncadd [#allocation9], 4294967040  ;;  %v2165_v0 = vmov 0   ;;  %v2256_v1 = vld [vmem:[%s2695_s5 + $0x8] sm:$0xff]  ;;  %v2266_v3 = vld [vmem:[%s2695_s5] sm:$0xff]  ;;  %vm156_vm0 = vcmask 261120  }
  0x14   :  { %1905 = vset.pattern.permute.xlu1 %v2165_v0  ;;  %1906 = vset.pattern.permute.xlu2 %v2165_v0  ;;  %v2261_v2 = vld [vmem:[%s2694_s4 + $0x8] sm:$0xff]  ;;  %v2273_v4 = vld [vmem:[%s2694_s4] sm:$0xff]  ;;  %s2166_s4 = smov 32   ;;  %s1717_s5 = sshll.u32 %s2702_s12, 4  ;;  %s1718_s5 = int_to_ptr.hbm [resolvable:$true] %s1717_s5 }
  0x15   :  { %1907 = vset.pattern.permute.xlu0 %v2165_v0  ;;  %166 = vmatpush.bf16.msra.mxu0 %v2256_v1  ;;  %v143_v5 = vld [vmem:[%s2691_s1] sm:$0xf]  ;;  %v1750_v35 = vld [vmem:[%s2691_s1 + $0x4] sm:$0xf]  ;;  %s2170_s30 = smov 8  }
  0x16   :  { %194 = vmatpush.bf16.msra.mxu1 %v2261_v2  ;;  %281 = vmatpush.bf16.msra.mxu3 %v2261_v2  ;;  %v2298_v6 = vld [vmem:[#allocation5] ss:$0 sm:$0xff] }
  0x17   :  { %265 = vmatpush.bf16.msra.mxu2 %v2256_v1  ;;  %v2306_v33 = vld [vmem:[%s2690_s0] sm:$0xff] }
  0x18   :  { %vm242_vm5 = vcmp.gt.s32.totalorder %v2306_v33, 0  ;;  %vm326_vm7 = vcmp.gt.s32.totalorder %v2306_v33, 1  ;;  %vm410_vm13 = vcmp.gt.s32.totalorder %v2306_v33, 2 }
  0x19   :  { %167 = vmatpush.bf16.msra.mxu0 %v2266_v3  ;;  %v243_v34 = vsel %vm242_vm5, 1, %v2165_v0  ;;  %v327_v52 = vsel %vm326_vm7, 1, %v2165_v0  ;;  %vm578_vm5 = vcmp.gt.s32.totalorder %v2306_v33, 4 }
  0x1a   :  { %195 = vmatpush.bf16.msra.mxu1 %v2273_v4  ;;  %282 = vmatpush.bf16.msra.mxu3 %v2273_v4 }
  0x1b   :  { %266 = vmatpush.bf16.msra.mxu2 %v2266_v3 }
  0x1c   :  { %168 = vmatmul.bf16.vlgmr.msra.gmra.mxu0 %v2165_v0 }
  0x1d   :  { %349 = vmatpush.bf16.msrb.mxu0 %v2256_v1  ;;  %1748 = vmatmul.msk.bf16.vlgmr.msra.gmra.mxu1 %vm156_vm0, %v143_v5 }
  0x1e   :  { %365 = vmatpush.bf16.msrb.mxu1 %v2261_v2  ;;  %449 = vmatpush.bf16.msrb.mxu3 %v2261_v2 }
  0x1f   :  { %433 = vmatpush.bf16.msrb.mxu2 %v2256_v1  ;;  %1752 = vmatmul.msk.bf16.vlgmr.msra.gmra.mxu3 %vm156_vm0, %v1750_v35 }
  0x21   :  { %350 = vmatpush.bf16.msrb.mxu0 %v2266_v3 }
  0x22   :  { %366 = vmatpush.bf16.msrb.mxu1 %v2273_v4  ;;  %450 = vmatpush.bf16.msrb.mxu3 %v2273_v4 }
  0x23   :  { %434 = vmatpush.bf16.msrb.mxu2 %v2266_v3 }
  0x25   :  { %517 = vmatpush.bf16.msra.mxu0 %v2256_v1 }
  0x26   :  { %533 = vmatpush.bf16.msra.mxu1 %v2261_v2  ;;  %617 = vmatpush.bf16.msra.mxu3 %v2261_v2 }
  0x29   :  { %518 = vmatpush.bf16.msra.mxu0 %v2266_v3 }
  0x2a   :  { %534 = vmatpush.bf16.msra.mxu1 %v2273_v4  ;;  %618 = vmatpush.bf16.msra.mxu3 %v2273_v4 }
  0x99   :  { %v169_v7 = vpop.f32.mrf.mxu0 }
  0x9a   :  { %v197_v8 = vpop.f32.mrf.mxu1 }
  0x9b   :  { %v198_v9 = vadd.f32 %v197_v8, %v169_v7 }
  0x9d   :  { %v204_v10 = vadd.f32 %v2298_v6, %v198_v9 }
  0x9f   :  { %1911 = vtanh.f32 %v204_v10  ;;  %v1749_v14 = vmul.f32 -1.442695, %v204_v10 }
  0xa1   :  { %v171_v11 = vpop.f32.mrf.mxu0  ;;  %1913 = vpow2.f32 %v1749_v14 }
  0xa2   :  { %v199_v12 = vpop.f32.mrf.mxu1  ;;  %v284_v42 = vpop.f32.mrf.mxu3 }
  0xa3   :  { %v1754_v12 = vld [vmem:[%s2691_s1 + $0x8] sm:$0xf] }
  0xa4   :  { %1756 = vmatmul.msk.bf16.vlgmr.msrb.gmra.mxu1 %vm156_vm0, %v1754_v12 }
  0xa5   :  { %v1912_v13 = vpop.eup %1911  ;;  %701 = vmatpush.bf16.msrb.mxu1 %v2261_v2 }
  0xa6   :  { %227 = vrot.lane.b32.xlu0 %v1912_v13, %s2163_s21 }
  0xa7   :  { %v1914_v15 = vpop.eup %1913 }
  0xa8   :  { %v208_v16 = vadd.f32 1.0, %v1914_v15 }
  0xa9   :  { %702 = vmatpush.bf16.msrb.mxu1 %v2273_v4 }
  0xaa   :  { %1915 = vrcp.f32 %v208_v16  ;;  %v220_v22 = vand.u32 2147483648, %v208_v16  ;;  %vm214_vm2 = vweird.f32 %v208_v16  ;;  %v218_v23 = vand.u32 2147483647, %v208_v16  ;;  %v286_v43 = vpop.f32.mrf.mxu3 }
  0xac   :  { %v221_v25 = vor.u32 1.1754944e-38, %v220_v22  ;;  %vm219_vm4 = vcmp.eq.f32.partialorder %v218_v23, 8.507059e+37 }
  0xb0   :  { %v1916_v17 = vpop.eup %1915 }
  0xb1   :  { %v210_v18 = vmul.f32 %v1916_v17, %v208_v16  ;;  %vm215_vm1 = vweird.f32 %v1916_v17 }
  0xb2   :  { %vm216_vm3 = vmor %vm214_vm2, %vm215_vm1 }
  0xb3   :  { %v211_v19 = vsub.f32 1.0, %v210_v18 }
  0xb5   :  { %v212_v20 = vmul.f32 %v1916_v17, %v211_v19 }
  0xb7   :  { %v213_v21 = vadd.f32 %v1916_v17, %v212_v20 }
  0xb9   :  { %v217_v24 = vsel %vm216_vm3, %v1916_v17, %v213_v21 }
  0xba   :  { %v222_v27 = vsel %vm219_vm4, %v221_v25, %v217_v24  ;;  %vm494_vm4 = vcmp.gt.s32.totalorder %v2306_v33, 3 }
  0xbb   :  { %v225_v29 = vmul.f32 0.0, %v222_v27 }
 0x118   :  { %v228_v26 = vpop.permute.xlu0 %227 }
 0x119   :  { %v230_v28 = vmul.f32 %v228_v26, %v222_v27  ;;  %v411_v26 = vsel %vm410_vm13, 1, %v2165_v0 }
 0x11b   :  { %232 = vrot.lane.b32.xlu0 %v230_v28, %s2166_s4 }
 0x121   :  { %v368_v18 = vpop.f32.mrf.mxu1 }
 0x129   :  { %v370_v19 = vpop.f32.mrf.mxu1 }
 0x18d   :  { %v233_v30 = vpop.permute.xlu0 %232 }
 0x18e   :  { %v235_v31 = vadd.f32 %v233_v30, %v225_v29 }
 0x190   :  { %1917 = vtanh.f32 %v235_v31 }
 0x196   :  { %v1918_v32 = vpop.eup %1917 }
 0x197   :  { %238 = vrot.lane.b32.xlu1 %v1918_v32, %s2163_s21 }
 0x19f   :  { %245 = vperm.xlu1 %1905, %v243_v34  }
 0x209   :  { %v239_v36 = vpop.permute.xlu1 %238 }
 0x20a   :  { %v241_v37 = vmul.f32 %v239_v36, %v222_v27 }
 0x211   :  { %v246_v38 = vpop.permute.xlu1 %245 }
 0x212   :  { %vm247_vm6 = vcmp.eq.s32.totalorder %v246_v38, 1 }
 0x213   :  { %v248_v39 = vsel %vm247_vm6, %v241_v37, 0.0  ;;  %v249_v7 = vsel %vm247_vm6, %v235_v31, 0.0 }
 0x214   :  { %v252_v40 = vpack.c.bf16 %v248_v39, %v248_v39 }
 0x216   :  { %254 = vrot.lane.b32.xlu2 %v252_v40, %s2166_s4 }
 0x270   :  { %v255_v41 = vpop.permute.xlu2 %254 }
 0x271   :  { %1751 = vmatmul.msk.bf16.vlgmr.msra.gmra.mxu2 %vm156_vm0, %v255_v41 }
 0x272   :  { %601 = vmatpush.bf16.msra.mxu2 %v2256_v1 }
 0x276   :  { %602 = vmatpush.bf16.msra.mxu2 %v2266_v3 }
 0x2f4   :  { %v268_v44 = vpop.f32.mrf.mxu2 }
 0x2f5   :  { %v285_v45 = vadd.f32 %v284_v42, %v268_v44 }
 0x2f7   :  { %v288_v46 = vadd.f32 %v2298_v6, %v285_v45 }
 0x2f9   :  { %1919 = vtanh.f32 %v288_v46  ;;  %v1753_v49 = vmul.f32 -1.442695, %v288_v46 }
 0x2fb   :  { %1921 = vpow2.f32 %v1753_v49 }
 0x2fc   :  { %v270_v47 = vpop.f32.mrf.mxu2 }
 0x2ff   :  { %v1920_v48 = vpop.eup %1919 }
 0x300   :  { %311 = vrot.lane.b32.xlu2 %v1920_v48, %s2163_s21  ;;  %v1758_v48 = vld [vmem:[%s2691_s1 + $0xc] sm:$0xf] }
 0x301   :  { %v1922_v50 = vpop.eup %1921  ;;  %1760 = vmatmul.msk.bf16.vlgmr.msrb.gmra.mxu3 %vm156_vm0, %v1758_v48 }
 0x302   :  { %v292_v51 = vadd.f32 1.0, %v1922_v50  ;;  %785 = vmatpush.bf16.msrb.mxu3 %v2261_v2 }
 0x304   :  { %1923 = vrcp.f32 %v292_v51  ;;  %v304_v58 = vand.u32 2147483648, %v292_v51  ;;  %vm298_vm9 = vweird.f32 %v292_v51  ;;  %v302_v59 = vand.u32 2147483647, %v292_v51 }
 0x306   :  { %v305_v61 = vor.u32 1.1754944e-38, %v304_v58  ;;  %vm303_vm11 = vcmp.eq.f32.partialorder %v302_v59, 8.507059e+37  ;;  %786 = vmatpush.bf16.msrb.mxu3 %v2273_v4 }
 0x308   :  { %329 = vperm.xlu2 %1906, %v327_v52  }
 0x30a   :  { %v1924_v53 = vpop.eup %1923 }
 0x30b   :  { %v294_v54 = vmul.f32 %v1924_v53, %v292_v51  ;;  %vm299_vm8 = vweird.f32 %v1924_v53 }
 0x30c   :  { %vm300_vm10 = vmor %vm298_vm9, %vm299_vm8 }
 0x30d   :  { %v295_v55 = vsub.f32 1.0, %v294_v54 }
 0x30f   :  { %v296_v56 = vmul.f32 %v1924_v53, %v295_v55 }
 0x311   :  { %v297_v57 = vadd.f32 %v1924_v53, %v296_v56 }
 0x313   :  { %v301_v60 = vsel %vm300_vm10, %v1924_v53, %v297_v57 }
 0x314   :  { %v306_v63 = vsel %vm303_vm11, %v305_v61, %v301_v60 }
 0x315   :  { %v309_v8 = vmul.f32 %v306_v63, %v249_v7 }
 0x35a   :  { %v312_v62 = vpop.permute.xlu2 %311 }
 0x35b   :  { %v314_v5 = vmul.f32 %v312_v62, %v306_v63 }
 0x35d   :  { %316 = vrot.lane.b32.xlu0 %v314_v5, %s2166_s4 }
 0x362   :  { %v330_v13 = vpop.permute.xlu2 %329 }
 0x363   :  { %vm331_vm12 = vcmp.eq.s32.totalorder %v330_v13, 1 }
 0x384   :  { %v452_v55 = vpop.f32.mrf.mxu3 }
 0x38c   :  { %v454_v2 = vpop.f32.mrf.mxu3 }
 0x3cf   :  { %v317_v9 = vpop.permute.xlu0 %316 }
 0x3d0   :  { %v319_v10 = vadd.f32 %v317_v9, %v309_v8 }
 0x3d2   :  { %1925 = vtanh.f32 %v319_v10  ;;  %v333_v43 = vsel %vm331_vm12, %v319_v10, %v249_v7 }
 0x3d8   :  { %v1926_v11 = vpop.eup %1925 }
 0x3d9   :  { %322 = vrot.lane.b32.xlu1 %v1926_v11, %s2163_s21 }
 0x44b   :  { %v323_v14 = vpop.permute.xlu1 %322 }
 0x44c   :  { %v325_v15 = vmul.f32 %v323_v14, %v306_v63 }
 0x44e   :  { %v332_v16 = vsel %vm331_vm12, %v325_v15, %v248_v39 }
 0x44f   :  { %v336_v17 = vpack.c.bf16 %v332_v16, %v332_v16 }
 0x451   :  { %338 = vrot.lane.b32.xlu0 %v336_v17, %s2166_s4 }
 0x4c3   :  { %v339_v20 = vpop.permute.xlu0 %338 }
 0x4c4   :  { %1755 = vmatmul.msk.bf16.vlgmr.msrb.gmra.mxu0 %vm156_vm0, %v339_v20 }
 0x4c5   :  { %685 = vmatpush.bf16.msrb.mxu0 %v2256_v1 }
 0x4c9   :  { %686 = vmatpush.bf16.msrb.mxu0 %v2266_v3 }
 0x541   :  { %v352_v21 = vpop.f32.mrf.mxu0 }
 0x542   :  { %v369_v22 = vadd.f32 %v368_v18, %v352_v21 }
 0x544   :  { %v372_v23 = vadd.f32 %v2298_v6, %v369_v22  ;;  %v1762_v22 = vld [vmem:[%s2691_s1 + $0x10] sm:$0xf] }
 0x545   :  { %1764 = vmatmul.msk.bf16.vlgmr.msra.gmra.mxu1 %vm156_vm0, %v1762_v22 }
 0x546   :  { %1927 = vtanh.f32 %v372_v23  ;;  %v1757_v27 = vmul.f32 -1.442695, %v372_v23 }
 0x548   :  { %1929 = vpow2.f32 %v1757_v27 }
 0x549   :  { %v354_v24 = vpop.f32.mrf.mxu0 }
 0x54c   :  { %v1928_v25 = vpop.eup %1927 }
 0x54d   :  { %395 = vrot.lane.b32.xlu1 %v1928_v25, %s2163_s21 }
 0x54e   :  { %v1930_v28 = vpop.eup %1929 }
 0x54f   :  { %v376_v29 = vadd.f32 1.0, %v1930_v28 }
 0x551   :  { %1931 = vrcp.f32 %v376_v29  ;;  %v388_v36 = vand.u32 2147483648, %v376_v29  ;;  %vm382_vm15 = vweird.f32 %v376_v29  ;;  %v386_v37 = vand.u32 2147483647, %v376_v29 }
 0x553   :  { %v389_v39 = vor.u32 1.1754944e-38, %v388_v36  ;;  %vm387_vm2 = vcmp.eq.f32.partialorder %v386_v37, 8.507059e+37 }
 0x555   :  { %413 = vperm.xlu1 %1905, %v411_v26  }
 0x557   :  { %v1932_v30 = vpop.eup %1931 }
 0x558   :  { %v378_v31 = vmul.f32 %v1932_v30, %v376_v29  ;;  %vm383_vm14 = vweird.f32 %v1932_v30 }
 0x559   :  { %vm384_vm1 = vmor %vm382_vm15, %vm383_vm14 }
 0x55a   :  { %v379_v32 = vsub.f32 1.0, %v378_v31 }
 0x55c   :  { %v380_v34 = vmul.f32 %v1932_v30, %v379_v32 }
 0x55e   :  { %v381_v35 = vadd.f32 %v1932_v30, %v380_v34 }
 0x560   :  { %v385_v38 = vsel %vm384_vm1, %v1932_v30, %v381_v35  ;;  %vm662_vm1 = vcmp.gt.s32.totalorder %v2306_v33, 5 }
 0x561   :  { %v390_v41 = vsel %vm387_vm2, %v389_v39, %v385_v38 }
 0x562   :  { %v393_v44 = vmul.f32 %v390_v41, %v333_v43 }
 0x5bf   :  { %v396_v40 = vpop.permute.xlu1 %395 }
 0x5c0   :  { %v398_v42 = vmul.f32 %v396_v40, %v390_v41 }
 0x5c2   :  { %400 = vrot.lane.b32.xlu2 %v398_v42, %s2166_s4  ;;  %v536_v28 = vpop.f32.mrf.mxu1 }
 0x5c7   :  { %v414_v49 = vpop.permute.xlu1 %413 }
 0x5c8   :  { %vm415_vm3 = vcmp.eq.s32.totalorder %v414_v49, 1 }
 0x5ca   :  { %v538_v29 = vpop.f32.mrf.mxu1 }
 0x61c   :  { %v401_v45 = vpop.permute.xlu2 %400 }
 0x61d   :  { %v403_v46 = vadd.f32 %v401_v45, %v393_v44 }
 0x61f   :  { %1933 = vtanh.f32 %v403_v46  ;;  %v417_v17 = vsel %vm415_vm3, %v403_v46, %v333_v43 }
 0x625   :  { %v1934_v47 = vpop.eup %1933 }
 0x626   :  { %406 = vrot.lane.b32.xlu0 %v1934_v47, %s2163_s21 }
 0x698   :  { %v407_v50 = vpop.permute.xlu0 %406 }
 0x699   :  { %v409_v51 = vmul.f32 %v407_v50, %v390_v41 }
 0x69b   :  { %v416_v52 = vsel %vm415_vm3, %v409_v51, %v332_v16 }
 0x69c   :  { %v420_v53 = vpack.c.bf16 %v416_v52, %v416_v52 }
 0x69e   :  { %422 = vrot.lane.b32.xlu2 %v420_v53, %s2166_s4 }
 0x6f8   :  { %v423_v54 = vpop.permute.xlu2 %422 }
 0x6f9   :  { %1759 = vmatmul.msk.bf16.vlgmr.msrb.gmra.mxu2 %vm156_vm0, %v423_v54 }
 0x6fa   :  { %769 = vmatpush.bf16.msrb.mxu2 %v2256_v1  ;;  %v495_v1 = vsel %vm494_vm4, 1, %v2165_v0 }
 0x6fe   :  { %770 = vmatpush.bf16.msrb.mxu2 %v2266_v3  ;;  %v579_v3 = vsel %vm578_vm5, 1, %v2165_v0 }
 0x77c   :  { %v436_v56 = vpop.f32.mrf.mxu2 }
 0x77d   :  { %v453_v4 = vadd.f32 %v452_v55, %v436_v56  ;;  %v1766_v56 = vld [vmem:[%s2691_s1 + $0x14] sm:$0xf] }
 0x77e   :  { %1768 = vmatmul.msk.bf16.vlgmr.msra.gmra.mxu3 %vm156_vm0, %v1766_v56 }
 0x77f   :  { %v456_v57 = vadd.f32 %v2298_v6, %v453_v4 }
 0x781   :  { %1935 = vtanh.f32 %v456_v57  ;;  %v1761_v60 = vmul.f32 -1.442695, %v456_v57 }
 0x783   :  { %1937 = vpow2.f32 %v1761_v60 }
 0x784   :  { %v438_v58 = vpop.f32.mrf.mxu2 }
 0x787   :  { %v1936_v59 = vpop.eup %1935 }
 0x788   :  { %479 = vrot.lane.b32.xlu0 %v1936_v59, %s2163_s21 }
 0x789   :  { %v1938_v61 = vpop.eup %1937 }
 0x78a   :  { %v460_v62 = vadd.f32 1.0, %v1938_v61 }
 0x78c   :  { %1939 = vrcp.f32 %v460_v62  ;;  %v472_v10 = vand.u32 2147483648, %v460_v62  ;;  %vm466_vm7 = vweird.f32 %v460_v62  ;;  %v470_v11 = vand.u32 2147483647, %v460_v62 }
 0x78e   :  { %v473_v13 = vor.u32 1.1754944e-38, %v472_v10  ;;  %vm471_vm9 = vcmp.eq.f32.partialorder %v470_v11, 8.507059e+37 }
 0x790   :  { %497 = vperm.xlu0 %1907, %v495_v1  }
 0x792   :  { %v1940_v63 = vpop.eup %1939 }
 0x793   :  { %v462_v5 = vmul.f32 %v1940_v63, %v460_v62  ;;  %vm467_vm6 = vweird.f32 %v1940_v63 }
 0x794   :  { %vm468_vm8 = vmor %vm466_vm7, %vm467_vm6  ;;  %vm746_vm7 = vcmp.gt.s32.totalorder %v2306_v33, 6 }
 0x795   :  { %v463_v7 = vsub.f32 1.0, %v462_v5 }
 0x797   :  { %v464_v8 = vmul.f32 %v1940_v63, %v463_v7 }
 0x798   :  { %581 = vperm.xlu0 %1907, %v579_v3  }
 0x799   :  { %v465_v9 = vadd.f32 %v1940_v63, %v464_v8 }
 0x79b   :  { %v469_v12 = vsel %vm468_vm8, %v1940_v63, %v465_v9  ;;  %v663_v9 = vsel %vm662_vm1, 1, %v2165_v0 }
 0x79c   :  { %v474_v15 = vsel %vm471_vm9, %v473_v13, %v469_v12 }
 0x79d   :  { %v477_v18 = vmul.f32 %v474_v15, %v417_v17 }
 0x7fa   :  { %v480_v14 = vpop.permute.xlu0 %479 }
 0x7fb   :  { %v482_v16 = vmul.f32 %v480_v14, %v474_v15 }
 0x7fd   :  { %484 = vrot.lane.b32.xlu1 %v482_v16, %s2166_s4 }
 0x801   :  { %v620_v61 = vpop.f32.mrf.mxu3 }
 0x802   :  { %v498_v23 = vpop.permute.xlu0 %497 }
 0x803   :  { %vm499_vm10 = vcmp.eq.s32.totalorder %v498_v23, 1 }
 0x809   :  { %v622_v62 = vpop.f32.mrf.mxu3 }
 0x80a   :  { %v582_v4 = vpop.permute.xlu0 %581 }
 0x80b   :  { %vm583_vm15 = vcmp.eq.s32.totalorder %v582_v4, 1 }
 0x86f   :  { %v485_v19 = vpop.permute.xlu1 %484 }
 0x870   :  { %v487_v20 = vadd.f32 %v485_v19, %v477_v18 }
 0x872   :  { %1941 = vtanh.f32 %v487_v20 }
 0x878   :  { %v1942_v21 = vpop.eup %1941 }
 0x879   :  { %490 = vrot.lane.b32.xlu2 %v1942_v21, %s2163_s21 }
 0x8d3   :  { %v491_v24 = vpop.permute.xlu2 %490 }
 0x8d4   :  { %v493_v25 = vmul.f32 %v491_v24, %v474_v15 }
 0x8d6   :  { %v500_v26 = vsel %vm499_vm10, %v493_v25, %v416_v52  ;;  %v501_v52 = vsel %vm499_vm10, %v487_v20, %v417_v17 }
 0x8d7   :  { %v504_v27 = vpack.c.bf16 %v500_v26, %v500_v26 }
 0x8d9   :  { %506 = vrot.lane.b32.xlu1 %v504_v27, %s2166_s4 }
 0x94b   :  { %v507_v30 = vpop.permute.xlu1 %506 }
 0x94c   :  { %1763 = vmatmul.msk.bf16.vlgmr.msra.gmra.mxu0 %vm156_vm0, %v507_v30  ;;  %v1770_v30 = vld [vmem:[%s2691_s1 + $0x18] sm:$0xf] }
 0x94d   :  { %1772 = vmatmul.msk.bf16.vlgmr.msrb.gmra.mxu1 %vm156_vm0, %v1770_v30 }
 0x9c9   :  { %v520_v31 = vpop.f32.mrf.mxu0 }
 0x9ca   :  { %v537_v32 = vadd.f32 %v536_v28, %v520_v31 }
 0x9cc   :  { %v540_v34 = vadd.f32 %v2298_v6, %v537_v32 }
 0x9ce   :  { %1943 = vtanh.f32 %v540_v34  ;;  %v1765_v37 = vmul.f32 -1.442695, %v540_v34 }
 0x9d0   :  { %1945 = vpow2.f32 %v1765_v37  ;;  %v704_v37 = vpop.f32.mrf.mxu1 }
 0x9d1   :  { %v522_v35 = vpop.f32.mrf.mxu0 }
 0x9d4   :  { %v1944_v36 = vpop.eup %1943 }
 0x9d5   :  { %563 = vrot.lane.b32.xlu2 %v1944_v36, %s2163_s21 }
 0x9d6   :  { %v1946_v38 = vpop.eup %1945 }
 0x9d7   :  { %v544_v39 = vadd.f32 1.0, %v1946_v38 }
 0x9d8   :  { %v706_v38 = vpop.f32.mrf.mxu1 }
 0x9d9   :  { %1947 = vrcp.f32 %v544_v39  ;;  %v556_v45 = vand.u32 2147483648, %v544_v39  ;;  %vm550_vm12 = vweird.f32 %v544_v39  ;;  %v554_v46 = vand.u32 2147483647, %v544_v39  ;;  %v2433_v38 = vld [vmem:[%s2697_s7 + $0x8] sm:$0xff] }
 0x9da   :  { %895 = vmatpush.bf16.msra.mxu1 %v2433_v38 }
 0x9db   :  { %v557_v48 = vor.u32 1.1754944e-38, %v556_v45  ;;  %vm555_vm14 = vcmp.eq.f32.partialorder %v554_v46, 8.507059e+37  ;;  %v747_v45 = vsel %vm746_vm7, 1, %v2165_v0 }
 0x9df   :  { %v1948_v40 = vpop.eup %1947 }
 0x9e0   :  { %v546_v41 = vmul.f32 %v1948_v40, %v544_v39  ;;  %vm551_vm11 = vweird.f32 %v1948_v40 }
 0x9e1   :  { %vm552_vm13 = vmor %vm550_vm12, %vm551_vm11 }
 0x9e2   :  { %v547_v42 = vsub.f32 1.0, %v546_v41 }
 0x9e4   :  { %v548_v43 = vmul.f32 %v1948_v40, %v547_v42 }
 0x9e6   :  { %v549_v44 = vadd.f32 %v1948_v40, %v548_v43 }
 0x9e8   :  { %v553_v47 = vsel %vm552_vm13, %v1948_v40, %v549_v44  ;;  %vm830_vm13 = vcmp.gt.s32.totalorder %v2306_v33, 7 }
 0x9e9   :  { %v558_v50 = vsel %vm555_vm14, %v557_v48, %v553_v47 }
 0x9ea   :  { %v561_v53 = vmul.f32 %v558_v50, %v501_v52 }
 0xa2f   :  { %v564_v49 = vpop.permute.xlu2 %563 }
 0xa30   :  { %v566_v51 = vmul.f32 %v564_v49, %v558_v50 }
 0xa32   :  { %568 = vrot.lane.b32.xlu1 %v566_v51, %s2166_s4 }
 0xaa4   :  { %v569_v54 = vpop.permute.xlu1 %568 }
 0xaa5   :  { %v571_v55 = vadd.f32 %v569_v54, %v561_v53 }
 0xaa7   :  { %1949 = vtanh.f32 %v571_v55  ;;  %v585_v25 = vsel %vm583_vm15, %v571_v55, %v501_v52 }
 0xaad   :  { %v1950_v2 = vpop.eup %1949 }
 0xaae   :  { %574 = vrot.lane.b32.xlu2 %v1950_v2, %s2163_s21 }
 0xb08   :  { %v575_v57 = vpop.permute.xlu2 %574 }
 0xb09   :  { %v577_v58 = vmul.f32 %v575_v57, %v558_v50 }
 0xb0b   :  { %v584_v59 = vsel %vm583_vm15, %v577_v58, %v500_v26 }
 0xb0c   :  { %v588_v60 = vpack.c.bf16 %v584_v59, %v584_v59 }
 0xb0e   :  { %590 = vrot.lane.b32.xlu1 %v588_v60, %s2166_s4 }
 0xb80   :  { %v591_v1 = vpop.permute.xlu1 %590 }
 0xb81   :  { %1767 = vmatmul.msk.bf16.vlgmr.msra.gmra.mxu2 %vm156_vm0, %v591_v1 }
 0xc04   :  { %v604_v3 = vpop.f32.mrf.mxu2 }
 0xc05   :  { %v621_v63 = vadd.f32 %v620_v61, %v604_v3  ;;  %v1774_v3 = vld [vmem:[%s2691_s1 + $0x1c] sm:$0xf] }
 0xc06   :  { %1776 = vmatmul.msk.bf16.vlgmr.msrb.gmra.mxu3 %vm156_vm0, %v1774_v3 }
 0xc07   :  { %v624_v5 = vadd.f32 %v2298_v6, %v621_v63 }
 0xc09   :  { %1951 = vtanh.f32 %v624_v5  ;;  %v1769_v10 = vmul.f32 -1.442695, %v624_v5 }
 0xc0b   :  { %1953 = vpow2.f32 %v1769_v10 }
 0xc0c   :  { %v606_v7 = vpop.f32.mrf.mxu2 }
 0xc0f   :  { %v1952_v8 = vpop.eup %1951 }
 0xc10   :  { %647 = vrot.lane.b32.xlu2 %v1952_v8, %s2163_s21 }
 0xc11   :  { %v1954_v11 = vpop.eup %1953 }
 0xc12   :  { %v628_v12 = vadd.f32 1.0, %v1954_v11 }
 0xc14   :  { %1955 = vrcp.f32 %v628_v12  ;;  %v640_v18 = vand.u32 2147483648, %v628_v12  ;;  %vm634_vm3 = vweird.f32 %v628_v12  ;;  %v638_v19 = vand.u32 2147483647, %v628_v12 }
 0xc16   :  { %v641_v21 = vor.u32 1.1754944e-38, %v640_v18  ;;  %vm639_vm5 = vcmp.eq.f32.partialorder %v638_v19, 8.507059e+37  ;;  %v831_v18 = vsel %vm830_vm13, 1, %v2165_v0 }
 0xc18   :  { %665 = vperm.xlu2 %1906, %v663_v9  }
 0xc1a   :  { %v1956_v13 = vpop.eup %1955 }
 0xc1b   :  { %v630_v14 = vmul.f32 %v1956_v13, %v628_v12  ;;  %vm635_vm2 = vweird.f32 %v1956_v13 }
 0xc1c   :  { %vm636_vm4 = vmor %vm634_vm3, %vm635_vm2 }
 0xc1d   :  { %v631_v15 = vsub.f32 1.0, %v630_v14 }
 0xc1f   :  { %v632_v16 = vmul.f32 %v1956_v13, %v631_v15 }
 0xc21   :  { %v633_v17 = vadd.f32 %v1956_v13, %v632_v16 }
 0xc23   :  { %v637_v20 = vsel %vm636_vm4, %v1956_v13, %v633_v17 }
 0xc24   :  { %v642_v23 = vsel %vm639_vm5, %v641_v21, %v637_v20 }
 0xc25   :  { %v645_v26 = vmul.f32 %v642_v23, %v585_v25 }
 0xc6a   :  { %v648_v22 = vpop.permute.xlu2 %647 }
 0xc6b   :  { %v650_v24 = vmul.f32 %v648_v22, %v642_v23 }
 0xc6d   :  { %652 = vrot.lane.b32.xlu0 %v650_v24, %s2166_s4 }
 0xc72   :  { %v666_v31 = vpop.permute.xlu2 %665 }
 0xc73   :  { %vm667_vm6 = vcmp.eq.s32.totalorder %v666_v31, 1 }
 0xc89   :  { %v788_v11 = vpop.f32.mrf.mxu3 }
 0xc91   :  { %v790_v12 = vpop.f32.mrf.mxu3 }
 0xcdf   :  { %v653_v27 = vpop.permute.xlu0 %652 }
 0xce0   :  { %v655_v28 = vadd.f32 %v653_v27, %v645_v26 }
 0xce2   :  { %1957 = vtanh.f32 %v655_v28 }
 0xce8   :  { %v1958_v29 = vpop.eup %1957 }
 0xce9   :  { %658 = vrot.lane.b32.xlu1 %v1958_v29, %s2163_s21 }
 0xd5b   :  { %v659_v32 = vpop.permute.xlu1 %658 }
 0xd5c   :  { %v661_v34 = vmul.f32 %v659_v32, %v642_v23 }
 0xd5e   :  { %v668_v35 = vsel %vm667_vm6, %v661_v34, %v584_v59  ;;  %v669_v59 = vsel %vm667_vm6, %v655_v28, %v585_v25 }
 0xd5f   :  { %v672_v36 = vpack.c.bf16 %v668_v35, %v668_v35 }
 0xd61   :  { %674 = vrot.lane.b32.xlu0 %v672_v36, %s2166_s4 }
 0xdd3   :  { %v675_v39 = vpop.permute.xlu0 %674 }
 0xdd4   :  { %1771 = vmatmul.msk.bf16.vlgmr.msrb.gmra.mxu0 %vm156_vm0, %v675_v39  ;;  %v837_v39 = vld [vmem:[#allocation2] sm:$0x1] }
 0xe51   :  { %v688_v40 = vpop.f32.mrf.mxu0 }
 0xe52   :  { %v705_v41 = vadd.f32 %v704_v37, %v688_v40  ;;  %v2428_v37 = vld [vmem:[%s2698_s8 + $0x8] sm:$0xff]  ;;  %v2440_v40 = vld [vmem:[%s2697_s7] sm:$0xff] }
 0xe53   :  { %867 = vmatpush.bf16.msra.mxu0 %v2428_v37  ;;  %986 = vmatpush.bf16.msra.mxu3 %v2428_v37 }
 0xe54   :  { %v708_v42 = vadd.f32 %v2298_v6, %v705_v41  ;;  %v2445_v41 = vld [vmem:[%s2698_s8] sm:$0xff]  ;;  %896 = vmatpush.bf16.msra.mxu1 %v2440_v40 }
 0xe56   :  { %1959 = vtanh.f32 %v708_v42  ;;  %v1773_v46 = vmul.f32 -1.442695, %v708_v42  ;;  %v839_v42 = vpack.i.b16 %v837_v39, %v837_v39 }
 0xe57   :  { %868 = vmatpush.bf16.msra.mxu0 %v2445_v41  ;;  %987 = vmatpush.bf16.msra.mxu3 %v2445_v41 }
 0xe58   :  { %1961 = vpow2.f32 %v1773_v46 }
 0xe59   :  { %v690_v43 = vpop.f32.mrf.mxu0 }
 0xe5a   :  { %v841_v43 = vperm.slane %v839_v42, 0 }
 0xe5b   :  { %1002 = vmatpush.bf16.msrb.mxu0 %v2433_v38  ;;  %1092 = vmatpush.bf16.msrb.mxu3 %v2433_v38 }
 0xe5c   :  { %v1960_v44 = vpop.eup %1959  ;;  %1795 = vmatmul.msk.bf16.vlgmr.msra.gmra.mxu1 %vm156_vm0, %v841_v43 }
 0xe5d   :  { %731 = vrot.lane.b32.xlu1 %v1960_v44, %s2163_s21 }
 0xe5e   :  { %v1962_v47 = vpop.eup %1961 }
 0xe5f   :  { %v712_v48 = vadd.f32 1.0, %v1962_v47  ;;  %1003 = vmatpush.bf16.msrb.mxu0 %v2440_v40  ;;  %1093 = vmatpush.bf16.msrb.mxu3 %v2440_v40 }
 0xe61   :  { %1963 = vrcp.f32 %v712_v48  ;;  %v724_v54 = vand.u32 2147483648, %v712_v48  ;;  %vm718_vm9 = vweird.f32 %v712_v48  ;;  %v722_v55 = vand.u32 2147483647, %v712_v48 }
 0xe63   :  { %v725_v56 = vor.u32 1.1754944e-38, %v724_v54  ;;  %vm723_vm11 = vcmp.eq.f32.partialorder %v722_v55, 8.507059e+37 }
 0xe65   :  { %749 = vperm.xlu1 %1905, %v747_v45  }
 0xe67   :  { %v1964_v49 = vpop.eup %1963 }
 0xe68   :  { %v714_v50 = vmul.f32 %v1964_v49, %v712_v48  ;;  %vm719_vm8 = vweird.f32 %v1964_v49 }
 0xe69   :  { %vm720_vm10 = vmor %vm718_vm9, %vm719_vm8 }
 0xe6a   :  { %v715_v51 = vsub.f32 1.0, %v714_v50 }
 0xe6c   :  { %v716_v52 = vmul.f32 %v1964_v49, %v715_v51 }
 0xe6e   :  { %v717_v53 = vadd.f32 %v1964_v49, %v716_v52  ;;  %v2459_v52 = vld [vmem:[#allocation7] ss:$0 sm:$0xff] }
 0xe70   :  { %v721_v2 = vsel %vm720_vm10, %v1964_v49, %v717_v53 }
 0xe71   :  { %v726_v57 = vsel %vm723_vm11, %v725_v56, %v721_v2 }
 0xe72   :  { %v729_v60 = vmul.f32 %v726_v57, %v669_v59 }
 0xecf   :  { %v732_v4 = vpop.permute.xlu1 %731 }
 0xed0   :  { %v734_v58 = vmul.f32 %v732_v4, %v726_v57 }
 0xed2   :  { %736 = vrot.lane.b32.xlu2 %v734_v58, %s2166_s4 }
 0xed7   :  { %v750_v63 = vpop.permute.xlu1 %749 }
 0xed8   :  { %vm751_vm12 = vcmp.eq.s32.totalorder %v750_v63, 1 }
 0xed9   :  { %v898_v49 = vpop.f32.mrf.mxu1 }
 0xee1   :  { %v900_v50 = vpop.f32.mrf.mxu1 }
 0xf2c   :  { %v737_v61 = vpop.permute.xlu2 %736 }
 0xf2d   :  { %v739_v62 = vadd.f32 %v737_v61, %v729_v60 }
 0xf2f   :  { %1965 = vtanh.f32 %v739_v62  ;;  %v753_v31 = vsel %vm751_vm12, %v739_v62, %v669_v59 }
 0xf35   :  { %v1966_v1 = vpop.eup %1965 }
 0xf36   :  { %742 = vrot.lane.b32.xlu0 %v1966_v1, %s2163_s21 }
 0xfa8   :  { %v743_v5 = vpop.permute.xlu0 %742 }
 0xfa9   :  { %v745_v7 = vmul.f32 %v743_v5, %v726_v57 }
 0xfab   :  { %v2412_v8 = vsel %vm751_vm12, %v745_v7, %v668_v35 }
 0xfac   :  { %v756_v9 = vpack.c.bf16 %v2412_v8, %v2412_v8 }
 0xfae   :  { %758 = vrot.lane.b32.xlu2 %v756_v9, %s2166_s4 }
0x1008   :  { %v759_v10 = vpop.permute.xlu2 %758 }
0x1009   :  { %1775 = vmatmul.msk.bf16.vlgmr.msrb.gmra.mxu2 %vm156_vm0, %v759_v10 }
0x108c   :  { %v772_v13 = vpop.f32.mrf.mxu2 }
0x108d   :  { %v789_v14 = vadd.f32 %v788_v11, %v772_v13 }
0x108f   :  { %v792_v15 = vadd.f32 %v2298_v6, %v789_v14 }
0x1091   :  { %1967 = vtanh.f32 %v792_v15  ;;  %v1777_v19 = vmul.f32 -1.442695, %v792_v15  ;;  %v2468_v15 = vld [vmem:[#allocation8 + $0x8] sm:$0xff] }
0x1092   :  { %971 = vmatpush.bf16.msra.mxu2 %v2468_v15  ;;  %1060 = vmatpush.bf16.msrb.mxu1 %v2468_v15 }
0x1093   :  { %1969 = vpow2.f32 %v1777_v19 }
0x1094   :  { %v774_v16 = vpop.f32.mrf.mxu2 }
0x1095   :  { %v979_v16 = vld [vmem:[%s2691_s1] sm:$0xf] }
0x1097   :  { %v1968_v17 = vpop.eup %1967 }
0x1098   :  { %815 = vrot.lane.b32.xlu0 %v1968_v17, %s2163_s21  ;;  %v2475_v17 = vld [vmem:[#allocation8] sm:$0xff] }
0x1099   :  { %v1970_v20 = vpop.eup %1969  ;;  %972 = vmatpush.bf16.msra.mxu2 %v2475_v17  ;;  %1061 = vmatpush.bf16.msrb.mxu1 %v2475_v17 }
0x109a   :  { %v796_v21 = vadd.f32 1.0, %v1970_v20 }
0x109c   :  { %1971 = vrcp.f32 %v796_v21  ;;  %v808_v26 = vand.u32 2147483648, %v796_v21  ;;  %vm802_vm15 = vweird.f32 %v796_v21  ;;  %v806_v27 = vand.u32 2147483647, %v796_v21 }
0x109d   :  { %1076 = vmatpush.bf16.msrb.mxu2 %v2428_v37 }
0x109e   :  { %v809_v33 = vor.u32 1.1754944e-38, %v808_v26  ;;  %vm807_vm2 = vcmp.eq.f32.partialorder %v806_v27, 8.507059e+37 }
0x10a0   :  { %833 = vperm.xlu0 %1907, %v831_v18  }
0x10a1   :  { %1077 = vmatpush.bf16.msrb.mxu2 %v2445_v41 }
0x10a2   :  { %v1972_v22 = vpop.eup %1971 }
0x10a3   :  { %v798_v23 = vmul.f32 %v1972_v22, %v796_v21  ;;  %vm803_vm14 = vweird.f32 %v1972_v22 }
0x10a4   :  { %vm804_vm1 = vmor %vm802_vm15, %vm803_vm14 }
0x10a5   :  { %v799_v24 = vsub.f32 1.0, %v798_v23 }
0x10a7   :  { %v800_v25 = vmul.f32 %v1972_v22, %v799_v24  ;;  %v2496_v24 = vld [vmem:[%s2701_s11] ss:$0 sm:$0xff] }
0x10a9   :  { %v801_v6 = vadd.f32 %v1972_v22, %v800_v25 }
0x10ab   :  { %v805_v28 = vsel %vm804_vm1, %v1972_v22, %v801_v6 }
0x10ac   :  { %v810_v29 = vsel %vm807_vm2, %v809_v33, %v805_v28 }
0x10ad   :  { %v813_v32 = vmul.f32 %v810_v29, %v753_v31 }
0x110a   :  { %v816_v0 = vpop.permute.xlu0 %815 }
0x110b   :  { %v818_v30 = vmul.f32 %v816_v0, %v810_v29 }
0x110d   :  { %820 = vrot.lane.b32.xlu1 %v818_v30, %s2166_s4 }
0x1112   :  { %v834_v44 = vpop.permute.xlu0 %833 }
0x1113   :  { %vm835_vm3 = vcmp.eq.s32.totalorder %v834_v44, 1 }
0x117f   :  { %v821_v34 = vpop.permute.xlu1 %820 }
0x1180   :  { %v823_v35 = vadd.f32 %v821_v34, %v813_v32 }
0x1182   :  { %1973 = vtanh.f32 %v823_v35 }
0x1188   :  { %v1974_v36 = vpop.eup %1973 }
0x1189   :  { %826 = vrot.lane.b32.xlu2 %v1974_v36, %s2163_s21 }
0x11e3   :  { %v827_v45 = vpop.permute.xlu2 %826 }
0x11e4   :  { %v829_v46 = vmul.f32 %v827_v45, %v810_v29 }
0x11e6   :  { %v836_v47 = vsel %vm835_vm3, %v829_v46, %v2412_v8 }
0x11e7   :  { %v842_v48 = vpack.c.bf16 %v836_v47, %v836_v47 }
0x11e9   :  { %844 = vrot.lane.b32.xlu1 %v842_v48, %s2166_s4 }
0x125b   :  { %v845_v51 = vpop.permute.xlu1 %844 }
0x125c   :  { %1786 = vmatmul.msk.bf16.vlgmr.msra.gmra.mxu0 %vm156_vm0, %v845_v51 }
0x125d   :  { %1150 = vmatpush.bf16.msra.mxu0 %v2468_v15 }
0x1261   :  { %1151 = vmatpush.bf16.msra.mxu0 %v2475_v17 }
0x126c   :  { %1807 = vmatmul.msk.bf16.vlgmr.msrb.gmra.mxu0 %vm156_vm0, %v979_v16 }
0x126d   :  { %1324 = vmatpush.bf16.msrb.mxu0 %v2468_v15 }
0x1271   :  { %1325 = vmatpush.bf16.msrb.mxu0 %v2475_v17 }
0x12d9   :  { %v870_v53 = vpop.f32.mrf.mxu0 }
0x12da   :  { %v899_v54 = vadd.f32 %v898_v49, %v870_v53 }
0x12dc   :  { %v905_v55 = vadd.f32 %v2459_v52, %v899_v54 }
0x12de   :  { %1975 = vtanh.f32 %v905_v55  ;;  %v1796_v4 = vmul.f32 -1.442695, %v905_v55  ;;  %v1810_v55 = vld [vmem:[%s2691_s1 + $0x4] sm:$0xf] }
0x12e0   :  { %1977 = vpow2.f32 %v1796_v4 }
0x12e1   :  { %v872_v2 = vpop.f32.mrf.mxu0 }
0x12e4   :  { %v1976_v56 = vpop.eup %1975 }
0x12e5   :  { %928 = vrot.lane.b32.xlu2 %v1976_v56, %s2163_s21 }
0x12e6   :  { %v1978_v57 = vpop.eup %1977 }
0x12e7   :  { %v909_v58 = vadd.f32 1.0, %v1978_v57 }
0x12e9   :  { %1979 = vrcp.f32 %v909_v58  ;;  %v921_v3 = vand.u32 2147483648, %v909_v58  ;;  %vm915_vm5 = vweird.f32 %v909_v58  ;;  %v919_v63 = vand.u32 2147483647, %v909_v58  ;;  %v1005_v22 = vpop.f32.mrf.mxu0 }
0x12eb   :  { %v922_v7 = vor.u32 1.1754944e-38, %v921_v3  ;;  %vm920_vm7 = vcmp.eq.f32.partialorder %v919_v63, 8.507059e+37 }
0x12ef   :  { %v1980_v59 = vpop.eup %1979 }
0x12f0   :  { %v911_v60 = vmul.f32 %v1980_v59, %v909_v58  ;;  %vm916_vm4 = vweird.f32 %v1980_v59 }
0x12f1   :  { %vm917_vm6 = vmor %vm915_vm5, %vm916_vm4  ;;  %v1007_v23 = vpop.f32.mrf.mxu0 }
0x12f2   :  { %v912_v61 = vsub.f32 1.0, %v911_v60 }
0x12f4   :  { %v913_v62 = vmul.f32 %v1980_v59, %v912_v61 }
0x12f6   :  { %v914_v1 = vadd.f32 %v1980_v59, %v913_v62 }
0x12f8   :  { %v918_v5 = vsel %vm917_vm6, %v1980_v59, %v914_v1 }
0x12f9   :  { %v923_v9 = vsel %vm920_vm7, %v922_v7, %v918_v5 }
0x12fa   :  { %v926_v11 = vmul.f32 0.0, %v923_v9 }
0x133f   :  { %v929_v8 = vpop.permute.xlu2 %928 }
0x1340   :  { %v931_v10 = vmul.f32 %v929_v8, %v923_v9 }
0x1342   :  { %933 = vrot.lane.b32.xlu0 %v931_v10, %s2166_s4 }
0x13b4   :  { %v934_v12 = vpop.permute.xlu0 %933 }
0x13b5   :  { %v2464_v13 = vadd.f32 %v934_v12, %v926_v11 }
0x13b7   :  { %1981 = vtanh.f32 %v2464_v13 }
0x13bd   :  { %v1982_v14 = vpop.eup %1981 }
0x13be   :  { %939 = vrot.lane.b32.xlu1 %v1982_v14, %s2163_s21 }
0x1430   :  { %v940_v18 = vpop.permute.xlu1 %939 }
0x1431   :  { %v942_v19 = vmul.f32 %v940_v18, %v923_v9 }
0x1433   :  { %v943_v20 = vpack.c.bf16 %v942_v19, %v942_v19 }
0x1435   :  { %948 = vrot.lane.b32.xlu2 %v943_v20, %s2166_s4 }
0x148f   :  { %v949_v21 = vpop.permute.xlu2 %948 }
0x1490   :  { %1805 = vmatmul.msk.bf16.vlgmr.msra.gmra.mxu2 %vm156_vm0, %v949_v21  ;;  %1806 = vmatmul.msk.bf16.vlgmr.msra.gmra.mxu3 %vm156_vm0, %v949_v21 }
0x1491   :  { %1250 = vmatpush.bf16.msra.mxu2 %v2428_v37  ;;  %1266 = vmatpush.bf16.msra.mxu3 %v2433_v38 }
0x1495   :  { %1251 = vmatpush.bf16.msra.mxu2 %v2445_v41  ;;  %1267 = vmatpush.bf16.msra.mxu3 %v2440_v40 }
0x14a0   :  { %1812 = vmatmul.msk.bf16.vlgmr.msrb.gmra.mxu3 %vm156_vm0, %v1810_v55  ;;  %v2579_v55 = vld [vmem:[%s2693_s3 + $0x8] sm:$0xff] }
0x14a1   :  { %1376 = vmatpush.bf16.msrb.mxu3 %v2428_v37 }
0x14a5   :  { %1377 = vmatpush.bf16.msrb.mxu3 %v2445_v41 }
0x1513   :  { %v974_v25 = vpop.f32.mrf.mxu2  ;;  %v989_v6 = vpop.f32.mrf.mxu3 }
0x1514   :  { %v975_v26 = vadd.f32 %v2496_v24, %v974_v25  ;;  %v1006_v27 = vadd.f32 %v1005_v22, %v989_v6 }
0x1516   :  { %978 = vst [vmem:[#allocation10] sm:$0xff] %v975_v26  ;;  %v1009_v28 = vadd.f32 %v2459_v52, %v1006_v27 }
0x1518   :  { %1983 = vtanh.f32 %v1009_v28  ;;  %v1808_v30 = vmul.f32 -1.442695, %v1009_v28 }
0x151a   :  { %1985 = vpow2.f32 %v1808_v30 }
0x151b   :  { %v976_v33 = vpop.f32.mrf.mxu2  ;;  %v991_v0 = vpop.f32.mrf.mxu3 }
0x151e   :  { %v1984_v29 = vpop.eup %1983 }
0x151f   :  { %1032 = vrot.lane.b32.xlu0 %v1984_v29, %s2163_s21 }
0x1520   :  { %v1986_v31 = vpop.eup %1985 }
0x1521   :  { %v1013_v32 = vadd.f32 1.0, %v1986_v31  ;;  %v140_v31 = vlaneseq }
0x1523   :  { %1987 = vrcp.f32 %v1013_v32  ;;  %v1025_v43 = vand.u32 2147483648, %v1013_v32  ;;  %vm1019_vm9 = vweird.f32 %v1013_v32  ;;  %v1023_v44 = vand.u32 2147483647, %v1013_v32  ;;  %v1095_v57 = vpop.f32.mrf.mxu3 }
0x1525   :  { %v1026_v46 = vor.u32 1.1754944e-38, %v1025_v43  ;;  %vm1024_vm11 = vcmp.eq.f32.partialorder %v1023_v44, 8.507059e+37 }
0x1529   :  { %v1988_v34 = vpop.eup %1987 }
0x152a   :  { %v1015_v35 = vmul.f32 %v1988_v34, %v1013_v32  ;;  %vm1020_vm8 = vweird.f32 %v1988_v34  ;;  %v2526_v32 = vand.u32 127, %v140_v31 }
0x152b   :  { %vm1021_vm10 = vmor %vm1019_vm9, %vm1020_vm8  ;;  %v1097_v58 = vpop.f32.mrf.mxu3 }
0x152c   :  { %v1016_v36 = vsub.f32 1.0, %v1015_v35  ;;  %vm142_vm1 = vcmp.lt.s32.totalorder %v2526_v32, 32  ;;  %v2587_v58 = vld [vmem:[%s2693_s3] sm:$0xff] }
0x152e   :  { %v1017_v39 = vmul.f32 %v1988_v34, %v1016_v36 }
0x1530   :  { %v1018_v42 = vadd.f32 %v1988_v34, %v1017_v39 }
0x1532   :  { %v1022_v45 = vsel %vm1021_vm10, %v1988_v34, %v1018_v42 }
0x1533   :  { %v1027_v48 = vsel %vm1024_vm11, %v1026_v46, %v1022_v45 }
0x1534   :  { %v1030_v50 = vmul.f32 %v1027_v48, %v2464_v13 }
0x1591   :  { %v1033_v47 = vpop.permute.xlu0 %1032 }
0x1592   :  { %v1035_v49 = vmul.f32 %v1033_v47, %v1027_v48 }
0x1594   :  { %1037 = vrot.lane.b32.xlu1 %v1035_v49, %s2166_s4  ;;  %v2544_v49 = vld [vmem:[%s2693_s3 + $0x30] sm:$0xff] }
0x1606   :  { %v1038_v51 = vpop.permute.xlu1 %1037 }
0x1607   :  { %v1040_v53 = vadd.f32 %v1038_v51, %v1030_v50  ;;  %v2551_v50 = vld [vmem:[%s2693_s3 + $0x28] sm:$0xff]  ;;  %v2558_v51 = vld [vmem:[%s2693_s3 + $0x20] sm:$0xff] }
0x1609   :  { %1989 = vtanh.f32 %v1040_v53 }
0x160f   :  { %v1990_v54 = vpop.eup %1989 }
0x1610   :  { %1043 = vrot.lane.b32.xlu2 %v1990_v54, %s2163_s21  ;;  %v2572_v54 = vld [vmem:[%s2693_s3 + $0x10] sm:$0xff] }
0x166a   :  { %v1044_v2 = vpop.permute.xlu2 %1043 }
0x166b   :  { %v1046_v56 = vmul.f32 %v1044_v2, %v1027_v48  ;;  %v2538_v48 = vld [vmem:[%s2693_s3 + $0x38] sm:$0xff] }
0x166c   :  { %1230 = vmatpush.bf16.msra.mxu1 %v2538_v48 }
0x166d   :  { %v1047_v4 = vpack.c.bf16 %v1046_v56, %v1046_v56 }
0x166f   :  { %1049 = vrot.lane.b32.xlu0 %v1047_v4, %s2166_s4 }
0x1670   :  { %1231 = vmatpush.bf16.msra.mxu1 %v2544_v49 }
0x1674   :  { %1232 = vmatpush.bf16.msra.mxu1 %v2551_v50 }
0x1678   :  { %1233 = vmatpush.bf16.msra.mxu1 %v2558_v51 }
0x16e1   :  { %v1050_v59 = vpop.permute.xlu0 %1049 }
0x16e2   :  { %1809 = vmatmul.msk.bf16.vlgmr.msrb.gmra.mxu1 %vm156_vm0, %v1050_v59  ;;  %1811 = vmatmul.msk.bf16.vlgmr.msrb.gmra.mxu2 %vm156_vm0, %v1050_v59 }
0x16e3   :  { %1356 = vmatpush.bf16.msrb.mxu2 %v2538_v48 }
0x16e7   :  { %1357 = vmatpush.bf16.msrb.mxu2 %v2544_v49 }
0x16eb   :  { %1358 = vmatpush.bf16.msrb.mxu2 %v2551_v50 }
0x16ef   :  { %1359 = vmatpush.bf16.msrb.mxu2 %v2558_v51 }
0x175f   :  { %v1063_v60 = vpop.f32.mrf.mxu1 }
0x1760   :  { %v1064_v61 = vadd.f32 %v2496_v24, %v1063_v60 }
0x1762   :  { %1068 = vst [vmem:[#allocation10 + $0x8] sm:$0xff] %v1064_v61 }
0x1765   :  { %v1079_v62 = vpop.f32.mrf.mxu2 }
0x1766   :  { %v1096_v1 = vadd.f32 %v1095_v57, %v1079_v62 }
0x1767   :  { %v1065_v3 = vpop.f32.mrf.mxu1 }
0x1768   :  { %v1099_v63 = vadd.f32 %v2459_v52, %v1096_v1  ;;  %v2167_v3 = vmov 1.0|1.0  }
0x176a   :  { %1991 = vtanh.f32 %v1099_v63  ;;  %v1813_v8 = vmul.f32 -1.442695, %v1099_v63 }
0x176c   :  { %1993 = vpow2.f32 %v1813_v8 }
0x176d   :  { %v1081_v5 = vpop.f32.mrf.mxu2 }
0x1770   :  { %v1992_v7 = vpop.eup %1991 }
0x1771   :  { %1122 = vrot.lane.b32.xlu1 %v1992_v7, %s2163_s21 }
0x1772   :  { %v1994_v9 = vpop.eup %1993 }
0x1773   :  { %v1103_v10 = vadd.f32 1.0, %v1994_v9 }
0x1775   :  { %1995 = vrcp.f32 %v1103_v10  ;;  %v1115_v18 = vand.u32 2147483648, %v1103_v10  ;;  %vm1109_vm13 = vweird.f32 %v1103_v10  ;;  %v1113_v19 = vand.u32 2147483647, %v1103_v10 }
0x1777   :  { %v1116_v21 = vor.u32 1.1754944e-38, %v1115_v18  ;;  %vm1114_vm15 = vcmp.eq.f32.partialorder %v1113_v19, 8.507059e+37 }
0x177b   :  { %v1996_v11 = vpop.eup %1995 }
0x177c   :  { %v1105_v12 = vmul.f32 %v1996_v11, %v1103_v10  ;;  %vm1110_vm12 = vweird.f32 %v1996_v11 }
0x177d   :  { %vm1111_vm14 = vmor %vm1109_vm13, %vm1110_vm12 }
0x177e   :  { %v1106_v13 = vsub.f32 1.0, %v1105_v12 }
0x1780   :  { %v1107_v14 = vmul.f32 %v1996_v11, %v1106_v13 }
0x1782   :  { %v1108_v16 = vadd.f32 %v1996_v11, %v1107_v14 }
0x1784   :  { %v1112_v20 = vsel %vm1111_vm14, %v1996_v11, %v1108_v16 }
0x1785   :  { %v1117_v23 = vsel %vm1114_vm15, %v1116_v21, %v1112_v20 }
0x1786   :  { %v1120_v6 = vmul.f32 %v1117_v23, %v1040_v53  ;;  %v2565_v53 = vld [vmem:[%s2693_s3 + $0x18] sm:$0xff]  ;;  %s2168_s3 = smov [#allocation10]  }
0x1787   :  { %1234 = vmatpush.bf16.msra.mxu1 %v2565_v53  ;;  %1360 = vmatpush.bf16.msrb.mxu2 %v2565_v53  ;;  %s1715_s27 = sshll.u32 %s2168_s3, 4  ;;  %s1716_s27 = int_to_ptr.vmem [resolvable:$true] %s1715_s27 }
0x178b   :  { %1235 = vmatpush.bf16.msra.mxu1 %v2572_v54  ;;  %1361 = vmatpush.bf16.msrb.mxu2 %v2572_v54 }
0x178f   :  { %1236 = vmatpush.bf16.msra.mxu1 %v2579_v55  ;;  %1362 = vmatpush.bf16.msrb.mxu2 %v2579_v55 }
0x1793   :  { %1237 = vmatpush.bf16.msra.mxu1 %v2587_v58  ;;  %1363 = vmatpush.bf16.msrb.mxu2 %v2587_v58 }
0x1797   :  { %1450 = vmatpush.bf16.msrb.mxu1 %v2468_v15 }
0x179b   :  { %1451 = vmatpush.bf16.msrb.mxu1 %v2475_v17 }
0x17e3   :  { %v1123_v22 = vpop.permute.xlu1 %1122 }
0x17e4   :  { %v1125_v25 = vmul.f32 %v1123_v22, %v1117_v23 }
0x17e6   :  { %1127 = vrot.lane.b32.xlu2 %v1125_v25, %s2166_s4 }
0x1840   :  { %v1128_v26 = vpop.permute.xlu2 %1127 }
0x1841   :  { %v2517_v27 = vadd.f32 %v1128_v26, %v1120_v6 }
0x1843   :  { %1997 = vtanh.f32 %v2517_v27 }
0x1849   :  { %v1998_v28 = vpop.eup %1997 }
0x184a   :  { %1133 = vrot.lane.b32.xlu0 %v1998_v28, %s2163_s21 }
0x18bc   :  { %v1134_v33 = vpop.permute.xlu0 %1133 }
0x18bd   :  { %v1136_v0 = vmul.f32 %v1134_v33, %v1117_v23 }
0x18bf   :  { %v1137_v29 = vpack.c.bf16 %v1136_v0, %v1136_v0 }
0x18c1   :  { %1139 = vrot.lane.b32.xlu1 %v1137_v29, %s2166_s4 }
0x1933   :  { %v1140_v30 = vpop.permute.xlu1 %1139 }
0x1934   :  { %1814 = vmatmul.msk.bf16.vlgmr.msra.gmra.mxu0 %vm156_vm0, %v1140_v30  ;;  %1850 = vmatmul.msk.bf16.vlgmr.msra.gmra.mxu2 %vm156_vm0, %v1140_v30 }
0x1935   :  { %1392 = vmatpush.bf16.msra.mxu0 %v2433_v38  ;;  %1576 = vmatpush.bf16.msra.mxu2 %v2468_v15 }
0x1939   :  { %1393 = vmatpush.bf16.msra.mxu0 %v2440_v40  ;;  %1577 = vmatpush.bf16.msra.mxu2 %v2475_v17 }
0x19b1   :  { %v1153_v34 = vpop.f32.mrf.mxu0 }
0x19b2   :  { %v1154_v35 = vadd.f32 %v2496_v24, %v1153_v34 }
0x19b4   :  { %1158 = vst [vmem:[#allocation10 + $0x10] sm:$0xff] %v1154_v35  ;;  %v1159_v36 = vsel %vm142_vm1, %v1154_v35, -1e+30 }
0x19b5   :  { %1160 = vmax.xlane.f32.xlu2 %v1159_v36 }
0x19b7   :  { %v2532_v39 = vpop.f32.mrf.mxu2 }
0x19b9   :  { %v1155_v42 = vpop.f32.mrf.mxu0 }
0x19bf   :  { %v1255_v43 = vpop.f32.mrf.mxu2 }
0x1a28   :  { %v1161_v44 = vpop.xlane.xlu2 %1160 }
0x1a29   :  { %vm1162_vm2 = vcmp.eq.f32.partialorder %v1159_v36, %v1161_v44 }
0x1a2a   :  { %v1163_v45 = vsel %vm1162_vm2, %v2526_v32, 128 }
0x1a2b   :  { %v1165_v46 = vshra.s32 %v1163_v45, 16  ;;  %v1164_v2 = vand.u32 65535, %v1163_v45 }
0x1a2d   :  { %v1167_v47 = vcvt.s32.f32 %v1165_v46  ;;  %v1166_v4 = vcvt.s32.f32 %v1164_v2 }
0x1a2f   :  { %1168 = vmin.xlane.f32.xlu0 %v1167_v47 }
0x1aa2   :  { %v1169_v56 = vpop.xlane.xlu0 %1168 }
0x1aa3   :  { %vm1170_vm3 = vcmp.eq.f32.partialorder %v1167_v47, %v1169_v56  ;;  %v1175_v59 = vcvt.f32.s32 %v1169_v56 }
0x1aa4   :  { %v1171_v57 = vsel %vm1170_vm3, %v1166_v4, inf }
0x1aa5   :  { %1172 = vmin.xlane.f32.xlu1 %v1171_v57  ;;  %v1176_v61 = vshll.u32 %v1175_v59, 16 }
0x1b18   :  { %v1173_v60 = vpop.xlane.xlu1 %1172 }
0x1b19   :  { %v1174_v62 = vcvt.f32.s32 %v1173_v60 }
0x1b1b   :  { %v1177_v1 = vadd.s32 %v1176_v61, %v1174_v62 }
0x1b1d   :  { %vm1178_vm4 = vcmp.eq.s32.totalorder %v1177_v1, %v2526_v32 }
0x1b1e   :  { %vm1848_vm5 = vmpackc.low %vm1178_vm4, %vm1178_vm4 }
0x1b1f   :  { %1849 = vmatmul.msk.bf16.vlgmr.msra.gmra.mxu1 %vm1848_vm5, %v2167_v3 }
0x1b20   :  { %1518 = vmatpush.bf16.msra.mxu1 %v2433_v38 }
0x1b24   :  { %1519 = vmatpush.bf16.msra.mxu1 %v2440_v40 }
0x1b9c   :  { %v1239_v63 = vpop.f32.mrf.mxu1 }
0x1b9d   :  { %v1243_v5 = vpack.c.bf16 %v1239_v63, %v1239_v63 }
0x1b9f   :  { %1851 = vmatmul.msk.bf16.vlgmr.msra.gmra.mxu3 %vm156_vm0, %v1243_v5 }
0x1ba0   :  { %1482 = vmatpush.bf16.msra.mxu3 %v2538_v48 }
0x1ba4   :  { %v1241_v7 = vpop.f32.mrf.mxu1  ;;  %1483 = vmatpush.bf16.msra.mxu3 %v2544_v49 }
0x1ba8   :  { %1484 = vmatpush.bf16.msra.mxu3 %v2551_v50 }
0x1bac   :  { %1485 = vmatpush.bf16.msra.mxu3 %v2558_v51 }
0x1bb0   :  { %1486 = vmatpush.bf16.msra.mxu3 %v2565_v53 }
0x1bb4   :  { %1487 = vmatpush.bf16.msra.mxu3 %v2572_v54 }
0x1bb8   :  { %1488 = vmatpush.bf16.msra.mxu3 %v2579_v55 }
0x1bbc   :  { %1489 = vmatpush.bf16.msra.mxu3 %v2587_v58 }
0x1c22   :  { %v1269_v8 = vpop.f32.mrf.mxu3 }
0x1c23   :  { %v1270_v9 = vadd.f32 %v1269_v8, %v2532_v39 }
0x1c25   :  { %v1273_v10 = vadd.f32 %v2459_v52, %v1270_v9 }
0x1c27   :  { %1999 = vtanh.f32 %v1273_v10  ;;  %v1852_v13 = vmul.f32 -1.442695, %v1273_v10 }
0x1c29   :  { %2001 = vpow2.f32 %v1852_v13 }
0x1c2a   :  { %v1271_v11 = vpop.f32.mrf.mxu3 }
0x1c2d   :  { %v2000_v12 = vpop.eup %1999 }
0x1c2e   :  { %1296 = vrot.lane.b32.xlu2 %v2000_v12, %s2163_s21 }
0x1c2f   :  { %v2002_v14 = vpop.eup %2001 }
0x1c30   :  { %v1277_v16 = vadd.f32 1.0, %v2002_v14 }
0x1c32   :  { %2003 = vrcp.f32 %v1277_v16  ;;  %v1289_v23 = vand.u32 2147483648, %v1277_v16  ;;  %vm1283_vm7 = vweird.f32 %v1277_v16  ;;  %v1287_v25 = vand.u32 2147483647, %v1277_v16 }
0x1c34   :  { %v1290_v26 = vor.u32 1.1754944e-38, %v1289_v23  ;;  %vm1288_vm9 = vcmp.eq.f32.partialorder %v1287_v25, 8.507059e+37 }
0x1c38   :  { %v2004_v18 = vpop.eup %2003 }
0x1c39   :  { %v1279_v19 = vmul.f32 %v2004_v18, %v1277_v16  ;;  %vm1284_vm6 = vweird.f32 %v2004_v18 }
0x1c3a   :  { %vm1285_vm8 = vmor %vm1283_vm7, %vm1284_vm6 }
0x1c3b   :  { %v1280_v20 = vsub.f32 1.0, %v1279_v19 }
0x1c3d   :  { %v1281_v21 = vmul.f32 %v2004_v18, %v1280_v20 }
0x1c3f   :  { %v1282_v22 = vadd.f32 %v2004_v18, %v1281_v21 }
0x1c41   :  { %v1286_v6 = vsel %vm1285_vm8, %v2004_v18, %v1282_v22 }
0x1c42   :  { %v1291_v33 = vsel %vm1288_vm9, %v1290_v26, %v1286_v6 }
0x1c43   :  { %v1294_v29 = vmul.f32 %v1291_v33, %v2517_v27 }
0x1c88   :  { %v1297_v28 = vpop.permute.xlu2 %1296 }
0x1c89   :  { %v1299_v0 = vmul.f32 %v1297_v28, %v1291_v33 }
0x1c8b   :  { %1301 = vrot.lane.b32.xlu0 %v1299_v0, %s2166_s4 }
0x1cfd   :  { %v1302_v30 = vpop.permute.xlu0 %1301 }
0x1cfe   :  { %v2613_v31 = vadd.f32 %v1302_v30, %v1294_v29 }
0x1d00   :  { %2005 = vtanh.f32 %v2613_v31 }
0x1d06   :  { %v2006_v34 = vpop.eup %2005 }
0x1d07   :  { %1307 = vrot.lane.b32.xlu1 %v2006_v34, %s2163_s21 }
0x1d79   :  { %v1308_v35 = vpop.permute.xlu1 %1307 }
0x1d7a   :  { %v1310_v36 = vmul.f32 %v1308_v35, %v1291_v33 }
0x1d7c   :  { %v1311_v39 = vpack.c.bf16 %v1310_v36, %v1310_v36 }
0x1d7e   :  { %1313 = vrot.lane.b32.xlu2 %v1311_v39, %s2166_s4 }
0x1dd8   :  { %v1314_v42 = vpop.permute.xlu2 %1313 }
0x1dd9   :  { %1853 = vmatmul.msk.bf16.vlgmr.msrb.gmra.mxu0 %vm156_vm0, %v1314_v42  ;;  %1857 = vmatmul.msk.bf16.vlgmr.msrb.gmra.mxu3 %vm156_vm0, %v1314_v42 }
0x1dda   :  { %1502 = vmatpush.bf16.msrb.mxu0 %v2428_v37  ;;  %1702 = vmatpush.bf16.msrb.mxu3 %v2468_v15 }
0x1dde   :  { %1503 = vmatpush.bf16.msrb.mxu0 %v2445_v41  ;;  %1703 = vmatpush.bf16.msrb.mxu3 %v2475_v17 }
0x1e56   :  { %v1327_v27 = vpop.f32.mrf.mxu0 }
0x1e57   :  { %v1328_v43 = vadd.f32 %v2496_v24, %v1327_v27 }
0x1e59   :  { %1332 = vst [vmem:[#allocation10 + $0x18] sm:$0xff] %v1328_v43  ;;  %v1333_v44 = vsel %vm142_vm1, %v1328_v43, -1e+30 }
0x1e5a   :  { %1334 = vmax.xlane.f32.xlu0 %v1333_v44 }
0x1e5c   :  { %v1379_v45 = vpop.f32.mrf.mxu3 }
0x1e5e   :  { %v1329_v46 = vpop.f32.mrf.mxu0 }
0x1e64   :  { %v1381_v47 = vpop.f32.mrf.mxu3 }
0x1ecd   :  { %v1335_v2 = vpop.xlane.xlu0 %1334 }
0x1ece   :  { %vm1336_vm10 = vcmp.eq.f32.partialorder %v1333_v44, %v1335_v2 }
0x1ecf   :  { %v1337_v56 = vsel %vm1336_vm10, %v2526_v32, 128 }
0x1ed0   :  { %v1339_v15 = vshra.s32 %v1337_v56, 16  ;;  %v1338_v57 = vand.u32 65535, %v1337_v56 }
0x1ed2   :  { %v1341_v4 = vcvt.s32.f32 %v1339_v15  ;;  %v1340_v59 = vcvt.s32.f32 %v1338_v57 }
0x1ed4   :  { %1342 = vmin.xlane.f32.xlu2 %v1341_v4 }
0x1f47   :  { %v1343_v17 = vpop.xlane.xlu2 %1342 }
0x1f48   :  { %vm1344_vm11 = vcmp.eq.f32.partialorder %v1341_v4, %v1343_v17  ;;  %v1349_v61 = vcvt.f32.s32 %v1343_v17 }
0x1f49   :  { %v1345_v60 = vsel %vm1344_vm11, %v1340_v59, inf }
0x1f4a   :  { %1346 = vmin.xlane.f32.xlu1 %v1345_v60  ;;  %v1350_v1 = vshll.u32 %v1349_v61, 16 }
0x1fbd   :  { %v1347_v62 = vpop.xlane.xlu1 %1346 }
0x1fbe   :  { %v1348_v63 = vcvt.f32.s32 %v1347_v62 }
0x1fc0   :  { %v1351_v5 = vadd.s32 %v1350_v1, %v1348_v63 }
0x1fc2   :  { %vm1352_vm12 = vcmp.eq.s32.totalorder %v1351_v5, %v2526_v32 }
0x1fc3   :  { %vm1855_vm13 = vmpackc.low %vm1352_vm12, %vm1352_vm12 }
0x1fc4   :  { %1856 = vmatmul.msk.bf16.vlgmr.msrb.gmra.mxu2 %vm1855_vm13, %v2167_v3 }
0x1fc5   :  { %1644 = vmatpush.bf16.msrb.mxu2 %v2433_v38 }
0x1fc9   :  { %1645 = vmatpush.bf16.msrb.mxu2 %v2440_v40 }
0x2047   :  { %v1365_v7 = vpop.f32.mrf.mxu2 }
0x2048   :  { %v1369_v8 = vpack.c.bf16 %v1365_v7, %v1365_v7 }
0x204a   :  { %1858 = vmatmul.msk.bf16.vlgmr.msra.gmra.mxu0 %vm156_vm0, %v1369_v8 }
0x204b   :  { %1608 = vmatpush.bf16.msra.mxu0 %v2538_v48 }
0x204f   :  { %v1367_v9 = vpop.f32.mrf.mxu2  ;;  %1609 = vmatpush.bf16.msra.mxu0 %v2544_v49 }
0x2053   :  { %1610 = vmatpush.bf16.msra.mxu0 %v2551_v50 }
0x2057   :  { %1611 = vmatpush.bf16.msra.mxu0 %v2558_v51 }
0x205b   :  { %1612 = vmatpush.bf16.msra.mxu0 %v2565_v53 }
0x205f   :  { %1613 = vmatpush.bf16.msra.mxu0 %v2572_v54 }
0x2063   :  { %1614 = vmatpush.bf16.msra.mxu0 %v2579_v55 }
0x2067   :  { %1615 = vmatpush.bf16.msra.mxu0 %v2587_v58 }
0x20c7   :  { %v1395_v38 = vpop.f32.mrf.mxu0 }
0x20c8   :  { %v1396_v40 = vadd.f32 %v1395_v38, %v1379_v45 }
0x20ca   :  { %v1399_v10 = vadd.f32 %v2459_v52, %v1396_v40 }
0x20cc   :  { %2007 = vtanh.f32 %v1399_v10  ;;  %v1859_v49 = vmul.f32 -1.442695, %v1399_v10 }
0x20ce   :  { %2009 = vpow2.f32 %v1859_v49 }
0x20cf   :  { %v1397_v48 = vpop.f32.mrf.mxu0 }
0x20d2   :  { %v2008_v11 = vpop.eup %2007 }
0x20d3   :  { %1422 = vrot.lane.b32.xlu0 %v2008_v11, %s2163_s21 }
0x20d4   :  { %v2010_v50 = vpop.eup %2009 }
0x20d5   :  { %v1403_v51 = vadd.f32 1.0, %v2010_v50 }
0x20d7   :  { %2011 = vrcp.f32 %v1403_v51  ;;  %v1415_v58 = vand.u32 2147483648, %v1403_v51  ;;  %vm1409_vm15 = vweird.f32 %v1403_v51  ;;  %v1413_v14 = vand.u32 2147483647, %v1403_v51 }
0x20d9   :  { %v1416_v18 = vor.u32 1.1754944e-38, %v1415_v58  ;;  %vm1414_vm3 = vcmp.eq.f32.partialorder %v1413_v14, 8.507059e+37 }
0x20dd   :  { %v2012_v53 = vpop.eup %2011 }
0x20de   :  { %v1405_v54 = vmul.f32 %v2012_v53, %v1403_v51  ;;  %vm1410_vm14 = vweird.f32 %v2012_v53 }
0x20df   :  { %vm1411_vm2 = vmor %vm1409_vm15, %vm1410_vm14 }
0x20e0   :  { %v1406_v12 = vsub.f32 1.0, %v1405_v54 }
0x20e2   :  { %v1407_v55 = vmul.f32 %v2012_v53, %v1406_v12 }
0x20e4   :  { %v1408_v13 = vadd.f32 %v2012_v53, %v1407_v55 }
0x20e6   :  { %v1412_v16 = vsel %vm1411_vm2, %v2012_v53, %v1408_v13 }
0x20e7   :  { %v1417_v20 = vsel %vm1414_vm3, %v1416_v18, %v1412_v16 }
0x20e8   :  { %v1420_v22 = vmul.f32 %v1417_v20, %v2613_v31 }
0x2145   :  { %v1423_v19 = vpop.permute.xlu0 %1422 }
0x2146   :  { %v1425_v21 = vmul.f32 %v1423_v19, %v1417_v20 }
0x2148   :  { %1427 = vrot.lane.b32.xlu2 %v1425_v21, %s2166_s4 }
0x21a2   :  { %v1428_v23 = vpop.permute.xlu2 %1427 }
0x21a3   :  { %v2645_v25 = vadd.f32 %v1428_v23, %v1420_v22 }
0x21a5   :  { %2013 = vtanh.f32 %v2645_v25 }
0x21ab   :  { %v2014_v6 = vpop.eup %2013 }
0x21ac   :  { %1433 = vrot.lane.b32.xlu1 %v2014_v6, %s2163_s21 }
0x221e   :  { %v1434_v26 = vpop.permute.xlu1 %1433 }
0x221f   :  { %v1436_v28 = vmul.f32 %v1434_v26, %v1417_v20 }
0x2221   :  { %v1437_v33 = vpack.c.bf16 %v1436_v28, %v1436_v28 }
0x2223   :  { %1439 = vrot.lane.b32.xlu0 %v1437_v33, %s2166_s4 }
0x2295   :  { %v1440_v0 = vpop.permute.xlu0 %1439 }
0x2296   :  { %1860 = vmatmul.msk.bf16.vlgmr.msrb.gmra.mxu1 %vm156_vm0, %v1440_v0  ;;  %1864 = vmatmul.msk.bf16.vlgmr.msrb.gmra.mxu0 %vm156_vm0, %v1440_v0 }
0x2297   :  { %1628 = vmatpush.bf16.msrb.mxu1 %v2428_v37 }
0x229b   :  { %1629 = vmatpush.bf16.msrb.mxu1 %v2445_v41 }
0x2313   :  { %v1453_v29 = vpop.f32.mrf.mxu1  ;;  %v1505_v30 = vpop.f32.mrf.mxu0 }
0x2314   :  { %v1454_v31 = vadd.f32 %v2496_v24, %v1453_v29 }
0x2316   :  { %1458 = vst [vmem:[#allocation10 + $0x20] sm:$0xff] %v1454_v31  ;;  %v1459_v34 = vsel %vm142_vm1, %v1454_v31, -1e+30 }
0x2317   :  { %1460 = vmax.xlane.f32.xlu2 %v1459_v34 }
0x231b   :  { %v1455_v35 = vpop.f32.mrf.mxu1  ;;  %v1507_v36 = vpop.f32.mrf.mxu0 }
0x238a   :  { %v1461_v39 = vpop.xlane.xlu2 %1460 }
0x238b   :  { %vm1462_vm4 = vcmp.eq.f32.partialorder %v1459_v34, %v1461_v39 }
0x238c   :  { %v1463_v42 = vsel %vm1462_vm4, %v2526_v32, 128 }
0x238d   :  { %v1465_v27 = vshra.s32 %v1463_v42, 16  ;;  %v1464_v37 = vand.u32 65535, %v1463_v42 }
0x238f   :  { %v1467_v43 = vcvt.s32.f32 %v1465_v27  ;;  %v1466_v44 = vcvt.s32.f32 %v1464_v37 }
0x2391   :  { %1468 = vmin.xlane.f32.xlu0 %v1467_v43 }
0x2404   :  { %v1469_v41 = vpop.xlane.xlu0 %1468 }
0x2405   :  { %vm1470_vm5 = vcmp.eq.f32.partialorder %v1467_v43, %v1469_v41  ;;  %v1475_v46 = vcvt.f32.s32 %v1469_v41 }
0x2406   :  { %v1471_v45 = vsel %vm1470_vm5, %v1466_v44, inf }
0x2407   :  { %1472 = vmin.xlane.f32.xlu1 %v1471_v45  ;;  %v1476_v2 = vshll.u32 %v1475_v46, 16 }
0x247a   :  { %v1473_v47 = vpop.xlane.xlu1 %1472 }
0x247b   :  { %v1474_v56 = vcvt.f32.s32 %v1473_v47 }
0x247d   :  { %v1477_v15 = vadd.s32 %v1476_v2, %v1474_v56 }
0x247f   :  { %vm1478_vm6 = vcmp.eq.s32.totalorder %v1477_v15, %v2526_v32 }
0x2480   :  { %vm1862_vm7 = vmpackc.low %vm1478_vm6, %vm1478_vm6 }
0x2481   :  { %1863 = vmatmul.msk.bf16.vlgmr.msra.gmra.mxu3 %vm1862_vm7, %v2167_v3 }
0x2504   :  { %v1491_v4 = vpop.f32.mrf.mxu3 }
0x2505   :  { %v1495_v57 = vpack.c.bf16 %v1491_v4, %v1491_v4 }
0x2507   :  { %1865 = vmatmul.msk.bf16.vlgmr.msra.gmra.mxu1 %vm156_vm0, %v1495_v57 }
0x250c   :  { %v1493_v17 = vpop.f32.mrf.mxu3 }
0x2584   :  { %v1521_v59 = vpop.f32.mrf.mxu1 }
0x2585   :  { %v1522_v60 = vadd.f32 %v1521_v59, %v1505_v30 }
0x2587   :  { %v1525_v61 = vadd.f32 %v2459_v52, %v1522_v60 }
0x2589   :  { %2015 = vtanh.f32 %v1525_v61  ;;  %v1866_v63 = vmul.f32 -1.442695, %v1525_v61 }
0x258b   :  { %2017 = vpow2.f32 %v1866_v63 }
0x258c   :  { %v1523_v62 = vpop.f32.mrf.mxu1 }
0x258f   :  { %v2016_v1 = vpop.eup %2015 }
0x2590   :  { %1548 = vrot.lane.b32.xlu2 %v2016_v1, %s2163_s21 }
0x2591   :  { %v2018_v5 = vpop.eup %2017 }
0x2592   :  { %v1529_v7 = vadd.f32 1.0, %v2018_v5 }
0x2594   :  { %2019 = vrcp.f32 %v1529_v7  ;;  %v1541_v48 = vand.u32 2147483648, %v1529_v7  ;;  %vm1535_vm9 = vweird.f32 %v1529_v7  ;;  %v1539_v11 = vand.u32 2147483647, %v1529_v7 }
0x2596   :  { %v1542_v50 = vor.u32 1.1754944e-38, %v1541_v48  ;;  %vm1540_vm11 = vcmp.eq.f32.partialorder %v1539_v11, 8.507059e+37 }
0x259a   :  { %v2020_v8 = vpop.eup %2019 }
0x259b   :  { %v1531_v9 = vmul.f32 %v2020_v8, %v1529_v7  ;;  %vm1536_vm8 = vweird.f32 %v2020_v8 }
0x259c   :  { %vm1537_vm10 = vmor %vm1535_vm9, %vm1536_vm8 }
0x259d   :  { %v1532_v38 = vsub.f32 1.0, %v1531_v9 }
0x259f   :  { %v1533_v40 = vmul.f32 %v2020_v8, %v1532_v38 }
0x25a1   :  { %v1534_v10 = vadd.f32 %v2020_v8, %v1533_v40 }
0x25a3   :  { %v1538_v49 = vsel %vm1537_vm10, %v2020_v8, %v1534_v10 }
0x25a4   :  { %v1543_v53 = vsel %vm1540_vm11, %v1542_v50, %v1538_v49 }
0x25a5   :  { %v1546_v12 = vmul.f32 %v1543_v53, %v2645_v25 }
0x25ea   :  { %v1549_v51 = vpop.permute.xlu2 %1548 }
0x25eb   :  { %v1551_v54 = vmul.f32 %v1549_v51, %v1543_v53 }
0x25ed   :  { %1553 = vrot.lane.b32.xlu0 %v1551_v54, %s2166_s4 }
0x265f   :  { %v1554_v55 = vpop.permute.xlu0 %1553 }
0x2660   :  { %v2665_v13 = vadd.f32 %v1554_v55, %v1546_v12 }
0x2662   :  { %2021 = vtanh.f32 %v2665_v13 }
0x2668   :  { %v2022_v58 = vpop.eup %2021 }
0x2669   :  { %1559 = vrot.lane.b32.xlu1 %v2022_v58, %s2163_s21 }
0x26db   :  { %v1560_v14 = vpop.permute.xlu1 %1559 }
0x26dc   :  { %v1562_v16 = vmul.f32 %v1560_v14, %v1543_v53 }
0x26de   :  { %v1563_v18 = vpack.c.bf16 %v1562_v16, %v1562_v16 }
0x26e0   :  { %1565 = vrot.lane.b32.xlu0 %v1563_v18, %s2166_s4 }
0x2752   :  { %v1566_v19 = vpop.permute.xlu0 %1565 }
0x2753   :  { %1867 = vmatmul.msk.bf16.vlgmr.msra.gmra.mxu2 %vm156_vm0, %v1566_v19  ;;  %1871 = vmatmul.msk.bf16.vlgmr.msrb.gmra.mxu1 %vm156_vm0, %v1566_v19 }
0x27d0   :  { %v1631_v20 = vpop.f32.mrf.mxu1 }
0x27d6   :  { %v1579_v21 = vpop.f32.mrf.mxu2 }
0x27d7   :  { %v1580_v22 = vadd.f32 %v2496_v24, %v1579_v21 }
0x27d8   :  { %v1633_v23 = vpop.f32.mrf.mxu1 }
0x27d9   :  { %1584 = vst [vmem:[#allocation10 + $0x28] sm:$0xff] %v1580_v22  ;;  %v1585_v25 = vsel %vm142_vm1, %v1580_v22, -1e+30 }
0x27da   :  { %1586 = vmax.xlane.f32.xlu2 %v1585_v25 }
0x27de   :  { %v1581_v6 = vpop.f32.mrf.mxu2 }
0x284d   :  { %v1587_v26 = vpop.xlane.xlu2 %1586 }
0x284e   :  { %vm1588_vm12 = vcmp.eq.f32.partialorder %v1585_v25, %v1587_v26 }
0x284f   :  { %v1589_v28 = vsel %vm1588_vm12, %v2526_v32, 128 }
0x2850   :  { %v1591_v33 = vshra.s32 %v1589_v28, 16  ;;  %v1590_v29 = vand.u32 65535, %v1589_v28 }
0x2852   :  { %v1593_v0 = vcvt.s32.f32 %v1591_v33  ;;  %v1592_v31 = vcvt.s32.f32 %v1590_v29 }
0x2854   :  { %1594 = vmin.xlane.f32.xlu1 %v1593_v0 }
0x28c7   :  { %v1595_v30 = vpop.xlane.xlu1 %1594 }
0x28c8   :  { %vm1596_vm13 = vcmp.eq.f32.partialorder %v1593_v0, %v1595_v30  ;;  %v1601_v35 = vcvt.f32.s32 %v1595_v30 }
0x28c9   :  { %v1597_v34 = vsel %vm1596_vm13, %v1592_v31, inf }
0x28ca   :  { %1598 = vmin.xlane.f32.xlu0 %v1597_v34  ;;  %v1602_v39 = vshll.u32 %v1601_v35, 16 }
0x293d   :  { %v1599_v36 = vpop.xlane.xlu0 %1598 }
0x293e   :  { %v1600_v42 = vcvt.f32.s32 %v1599_v36 }
0x2940   :  { %v1603_v27 = vadd.s32 %v1602_v39, %v1600_v42 }
0x2942   :  { %vm1604_vm1 = vcmp.eq.s32.totalorder %v1603_v27, %v2526_v32 }
0x2943   :  { %vm1869_vm14 = vmpackc.low %vm1604_vm1, %vm1604_vm1 }
0x2944   :  { %1870 = vmatmul.msk.bf16.vlgmr.msra.gmra.mxu0 %vm1869_vm14, %v2167_v3 }
0x29c1   :  { %v1617_v43 = vpop.f32.mrf.mxu0 }
0x29c2   :  { %v1621_v37 = vpack.c.bf16 %v1617_v43, %v1617_v43 }
0x29c4   :  { %1872 = vmatmul.msk.bf16.vlgmr.msrb.gmra.mxu2 %vm156_vm0, %v1621_v37 }
0x29c9   :  { %v1619_v41 = vpop.f32.mrf.mxu0 }
0x2a47   :  { %v1647_v44 = vpop.f32.mrf.mxu2 }
0x2a48   :  { %v1648_v45 = vadd.f32 %v1647_v44, %v1631_v20 }
0x2a4a   :  { %v1651_v46 = vadd.f32 %v2459_v52, %v1648_v45 }
0x2a4c   :  { %2023 = vtanh.f32 %v1651_v46  ;;  %v1873_v56 = vmul.f32 -1.442695, %v1651_v46 }
0x2a4e   :  { %2025 = vpow2.f32 %v1873_v56 }
0x2a4f   :  { %v1649_v47 = vpop.f32.mrf.mxu2 }
0x2a52   :  { %v2024_v2 = vpop.eup %2023 }
0x2a53   :  { %1674 = vrot.lane.b32.xlu2 %v2024_v2, %s2163_s21 }
0x2a54   :  { %v2026_v32 = vpop.eup %2025 }
0x2a55   :  { %v1655_v15 = vadd.f32 1.0, %v2026_v32 }
0x2a57   :  { %2027 = vrcp.f32 %v1655_v15  ;;  %v1667_v60 = vand.u32 2147483648, %v1655_v15  ;;  %vm1661_vm2 = vweird.f32 %v1655_v15  ;;  %v1665_v61 = vand.u32 2147483647, %v1655_v15 }
0x2a59   :  { %v1668_v62 = vor.u32 1.1754944e-38, %v1667_v60  ;;  %vm1666_vm4 = vcmp.eq.f32.partialorder %v1665_v61, 8.507059e+37 }
0x2a5d   :  { %v2028_v3 = vpop.eup %2027 }
0x2a5e   :  { %v1657_v4 = vmul.f32 %v2028_v3, %v1655_v15  ;;  %vm1662_vm15 = vweird.f32 %v2028_v3 }
0x2a5f   :  { %vm1663_vm3 = vmor %vm1661_vm2, %vm1662_vm15 }
0x2a60   :  { %v1658_v57 = vsub.f32 1.0, %v1657_v4 }
0x2a62   :  { %v1659_v17 = vmul.f32 %v2028_v3, %v1658_v57 }
0x2a64   :  { %v1660_v59 = vadd.f32 %v2028_v3, %v1659_v17 }
0x2a66   :  { %v1664_v52 = vsel %vm1663_vm3, %v2028_v3, %v1660_v59 }
0x2a67   :  { %v1669_v63 = vsel %vm1666_vm4, %v1668_v62, %v1664_v52 }
0x2a68   :  { %v1672_v7 = vmul.f32 %v1669_v63, %v2665_v13 }
0x2aad   :  { %v1675_v1 = vpop.permute.xlu2 %1674 }
0x2aae   :  { %v1677_v5 = vmul.f32 %v1675_v1, %v1669_v63 }
0x2ab0   :  { %1679 = vrot.lane.b32.xlu1 %v1677_v5, %s2166_s4 }
0x2b22   :  { %v1680_v8 = vpop.permute.xlu1 %1679 }
0x2b23   :  { %v1682_v9 = vadd.f32 %v1680_v8, %v1672_v7 }
0x2b25   :  { %2029 = vtanh.f32 %v1682_v9 }
0x2b2b   :  { %v2030_v38 = vpop.eup %2029 }
0x2b2c   :  { %1685 = vrot.lane.b32.xlu0 %v2030_v38, %s2163_s21  ;;  %s2169_s21 = smov 128  }
0x2b9e   :  { %v1686_v40 = vpop.permute.xlu0 %1685 }
0x2b9f   :  { %v1688_v10 = vmul.f32 %v1686_v40, %v1669_v63 }
0x2ba1   :  { %v1689_v48 = vpack.c.bf16 %v1688_v10, %v1688_v10 }
0x2ba3   :  { %1691 = vrot.lane.b32.xlu2 %v1689_v48, %s2166_s4 }
0x2bfd   :  { %v1692_v11 = vpop.permute.xlu2 %1691 }
0x2bfe   :  { %1874 = vmatmul.msk.bf16.vlgmr.msrb.gmra.mxu3 %vm156_vm0, %v1692_v11 }
0x2c81   :  { %v1705_v49 = vpop.f32.mrf.mxu3 }
0x2c82   :  { %v1706_v50 = vadd.f32 %v2496_v24, %v1705_v49 }
0x2c84   :  { %1710 = vst [vmem:[#allocation10 + $0x30] sm:$0xff] %v1706_v50 }
0x2c85   :  { %1723 = dma.vmem_to_hbm [thread:$0]  %s1716_s27, 896, %s1718_s5, [#allocation4], %s2169_s21, %s2169_s21, %s2170_s30  }
0x2c89   :  { %v1707_v51 = vpop.f32.mrf.mxu3 }
0x2c8a   :  { %2157 = dma.done.wait [#allocation4], 896  }
0x2c8b   :  { %2158 = vsyncadd [#allocation4], 4294966400 }
0x2c8c   :  { %1728 = vsyncpa [#allocation3], 1 }
0x2c8d   :  { %1729 = vsyncpa [#allocation6], 1 }
0x2c8e   :  { %1730 = vsyncpa [#allocation9], 1 }
0x2c8f   :  { %1731 = vsyncpa [#allocation4], 1 }

</bundles_post_ra>
